<compile_context>
chip_gen: v5e
topology: v5e:2x2
jax: 0.10.0
libtpu: 0.0.40
codegen_flags: <defaults>
</compile_context>

<pallas_src>
import functools

import jax
import jax.numpy as jnp
import numpy as np
from jax import lax
from jax.experimental import pallas as pl
from jax.experimental.pallas import tpu as pltpu

EPS = 1e-5
A_PAD = 128  # lane-dense padding for the final Linear output


# ----------------------------------------------------------------------------
# Pallas kernel
# ----------------------------------------------------------------------------
def fused_rainbow_kernel(*refs, oh1, n_dense):
    """Whole RainbowDQN forward for one batch tile; everything stays in VMEM."""
    idx = 0

    def take(n):
        nonlocal idx
        out = refs[idx:idx + n]
        idx += n
        return out

    (patches_ref,) = take(1)
    w1_ref, b1_ref, g1_ref, be1_ref = take(4)
    dense = [take(4) for _ in range(n_dense)]
    wfc1_ref, bfc1_ref, lng_ref, lnb_ref, wfc2_ref, bfc2_ref = take(6)
    (o_ref,) = take(1)
    (a1_scr,) = take(1)

    bt = o_ref.shape[0]
    owc = w1_ref.shape[1]            # OW1 * C1 (128 for the test shapes)

    # ---- conv1: single deep-K GEMM (K = OW1*k*k*Cin), lane-dense output -----
    # rows = (sample, oi), cols = (oj, cout); bf16 operands, f32 accumulation.
    y = jnp.dot(patches_ref[...], w1_ref[...],
                preferred_element_type=jnp.float32)
    y = y.reshape(bt, oh1, owc) + b1_ref[...]            # leading-dim split only

    # GroupNorm(1): per-sample stats over all (spatial, channel); single pass,
    # f32, pure slab reductions + VPU broadcasts (no segment matmuls).
    cnt = oh1 * owc
    s1 = jnp.sum(jnp.sum(y, axis=2, keepdims=True), axis=1, keepdims=True)
    s2 = jnp.sum(jnp.sum(y * y, axis=2, keepdims=True), axis=1, keepdims=True)
    mu = s1 * (1.0 / cnt)
    ex2 = s2 * (1.0 / cnt)
    inv = lax.rsqrt(jnp.maximum(ex2 - mu * mu, 0.0) + EPS)
    a1_scr[...] = jnp.maximum((y - mu) * inv * g1_ref[...] + be1_ref[...], 0.0)

    # Per-sample flatten to (bt, OH1*OW1*C1): the only layout change in the
    # kernel — OH1 lane-aligned slices of the scratch, concatenated in lanes.
    x = jnp.concatenate([a1_scr[:, i, :] for i in range(oh1)], axis=-1)

    def row_norm_relu(z, g, b_):
        n = z.shape[-1]
        mu = jnp.sum(z, axis=-1, keepdims=True) * (1.0 / n)
        ex2 = jnp.sum(z * z, axis=-1, keepdims=True) * (1.0 / n)
        inv = lax.rsqrt(jnp.maximum(ex2 - mu * mu, 0.0) + EPS)
        return jnp.maximum((z - mu) * inv * g + b_, 0.0)

    # ---- conv 2..n: one dense GEMM each (spatial folded into the weight) ----
    for (w_ref, b_ref, g_ref, be_ref) in dense:
        z = jnp.dot(x.astype(jnp.bfloat16), w_ref[...],
                    preferred_element_type=jnp.float32) + b_ref[...]
        x = row_norm_relu(z, g_ref[...], be_ref[...])     # GroupNorm(1) + ReLU

    # ---- FC head: Linear -> LayerNorm -> ReLU -> Linear (padded to 128) -----
    h = jnp.dot(x.astype(jnp.bfloat16), wfc1_ref[...],
                preferred_element_type=jnp.float32) + bfc1_ref[...]
    hn = row_norm_relu(h, lng_ref[...], lnb_ref[...])
    q = jnp.dot(hn.astype(jnp.bfloat16), wfc2_ref[...],
                preferred_element_type=jnp.float32) + bfc2_ref[...]
    o_ref[...] = q.astype(o_ref.dtype)                    # (bt, 128) lane-dense


# ----------------------------------------------------------------------------
# Wrapper-side constant construction (all O(1) in batch_tile, bf16 weights)
# ----------------------------------------------------------------------------
def im2col_nhwc(x, k, s):
    """x: (N, H, W, C) -> (N, OH, OW, k*k*C), patch ordering (kh, kw, cin)."""
    N, H, W, C = x.shape
    oh = (H - k) // s + 1
    ow = (W - k) // s + 1
    taps = []
    for i in range(k):
        for j in range(k):
            taps.append(x[:, i:i + s * oh:s, j:j + s * ow:s, :])
    p = jnp.stack(taps, axis=3)                          # (N, oh, ow, k*k, C)
    return p.reshape(N, oh, ow, k * k * C), oh, ow


def conv_dense_matrix(w, ih, iw, stride):
    """Dense (ih*iw*cin, oh*ow*cout) matrix implementing a VALID conv on a
    per-sample (spatial, channel)-flattened activation row vector."""
    cout, cin, kh, kw = w.shape
    oh = (ih - kh) // stride + 1
    ow = (iw - kw) // stride + 1
    wr = np.transpose(w, (2, 3, 1, 0))                   # (kh, kw, cin, cout)
    m = np.zeros((ih * iw * cin, oh * ow * cout), np.float32)
    for oi in range(oh):
        for oj in range(ow):
            o = oi * ow + oj
            for a in range(kh):
                for bb in range(kw):
                    p = (oi * stride + a) * iw + (oj * stride + bb)
                    m[p * cin:(p + 1) * cin, o * cout:(o + 1) * cout] = wr[a, bb]
    return m, oh, ow


def build_fused_operands(params, spatial):
    convs, fc = params["conv"], params["fc"]
    consts = []
    flops_per_sample = 0

    # conv1: weight expanded over the OW1 output columns so the GEMM output is
    # lane-dense (oj, cout) and K = OW1*k*k*Cin is deep.
    w, b, g, be, k, s = convs[0]
    w = np.asarray(w, np.float32)
    cout, cin = w.shape[0], w.shape[1]
    oh1 = (spatial - k) // s + 1
    ow1 = oh1
    K1 = k * k * cin
    w1m = np.transpose(w, (2, 3, 1, 0)).reshape(K1, cout)
    w1_exp = np.zeros((ow1 * K1, ow1 * cout), np.float32)
    for oj in range(ow1):
        w1_exp[oj * K1:(oj + 1) * K1, oj * cout:(oj + 1) * cout] = w1m
    owc = ow1 * cout
    consts += [
        jnp.asarray(w1_exp, jnp.bfloat16),
        jnp.asarray(np.tile(np.asarray(b, np.float32), ow1).reshape(1, 1, owc)),
        jnp.asarray(np.tile(np.asarray(g, np.float32), ow1).reshape(1, 1, owc)),
        jnp.asarray(np.tile(np.asarray(be, np.float32), ow1).reshape(1, 1, owc)),
    ]
    flops_per_sample += 2 * oh1 * (ow1 * K1) * owc
    ih, iw, cprev = oh1, ow1, cout

    # conv 2..n: one per-sample dense matrix each (spatial folded in at trace
    # time) + GroupNorm affines repeated to the (spatial, channel) column order.
    for (w, b, g, be, k, s) in convs[1:]:
        w = np.asarray(w, np.float32)
        cout = w.shape[0]
        m, oh, ow = conv_dense_matrix(w, ih, iw, s)
        P = oh * ow
        consts += [
            jnp.asarray(m, jnp.bfloat16),
            jnp.asarray(np.tile(np.asarray(b, np.float32), P).reshape(1, P * cout)),
            jnp.asarray(np.tile(np.asarray(g, np.float32), P).reshape(1, P * cout)),
            jnp.asarray(np.tile(np.asarray(be, np.float32), P).reshape(1, P * cout)),
        ]
        flops_per_sample += 2 * m.shape[0] * m.shape[1]
        ih, iw, cprev = oh, ow, cout

    # FC head: fold the PyTorch NCHW flatten (c*P + p) into the FC1 row order,
    # pad the final Linear to 128 lanes for an unmasked output store.
    P3, C3 = ih * iw, cprev
    conv_out = P3 * C3
    w1 = np.asarray(fc["w1"], np.float32)                 # rows in torch (c, p) order
    hidden = w1.shape[1]
    n_act = np.asarray(fc["w2"]).shape[1]
    fnew = np.arange(conv_out).reshape(P3, C3)            # kernel order (p, c)
    perm = (fnew % C3) * P3 + (fnew // C3)                # -> torch index c*P3 + p
    w1p = w1[perm.reshape(-1)]
    w2pad = np.zeros((hidden, A_PAD), np.float32)
    w2pad[:, :n_act] = np.asarray(fc["w2"], np.float32)
    b2pad = np.zeros((1, A_PAD), np.float32)
    b2pad[0, :n_act] = np.asarray(fc["b2"], np.float32)
    consts += [
        jnp.asarray(w1p, jnp.bfloat16),
        jnp.asarray(np.asarray(fc["b1"], np.float32).reshape(1, hidden)),
        jnp.asarray(np.asarray(fc["ln_g"], np.float32).reshape(1, hidden)),
        jnp.asarray(np.asarray(fc["ln_b"], np.float32).reshape(1, hidden)),
        jnp.asarray(w2pad, jnp.bfloat16),
        jnp.asarray(b2pad),
    ]
    flops_per_sample += 2 * conv_out * hidden + 2 * hidden * A_PAD
    return consts, oh1, ow1, int(flops_per_sample)


def _pick_batch_tile(n):
    """Multiple of 8, >= 2 grid steps when possible (v7x has 2 TensorCores)."""
    for bt in (32, 16, 8):
        if n % bt == 0 and n // bt >= 2:
            return bt
    for bt in (32, 16, 8):
        if n % bt == 0:
            return bt
    return n


# ----------------------------------------------------------------------------
# Forward pass (single fused pallas_call)
# ----------------------------------------------------------------------------
def rainbow_dqn_forward(x_nchw, params, batch_tile=None):
    """Pallas TPU implementation of RainbowDQN.forward. x: (N, C, H, W) f32."""
    N, _, H0, W0 = x_nchw.shape
    assert H0 == W0, "square inputs assumed (matches the original conv-out calc)"
    n_actions = params["fc"]["w2"].shape[1]
    bt = _pick_batch_tile(N) if batch_tile is None else batch_tile
    assert N % bt == 0 and (bt % 8 == 0 or bt == N), \
        "batch_tile must divide N and be a multiple of 8 (or the full batch)"

    # Layer-1 im2col stays as cheap XLA glue but now emits bf16, lane-dense
    # patches: rows (sample, oi), columns (oj, kh, kw, cin).
    k1, s1 = params["conv"][0][4], params["conv"][0][5]
    x = jnp.transpose(x_nchw, (0, 2, 3, 1)).astype(jnp.bfloat16)
    patches, oh1, ow1 = im2col_nhwc(x, k1, s1)
    K1 = patches.shape[-1]
    patches = patches.reshape(N * oh1, ow1 * K1)

    consts, oh1b, ow1b, flops_ps = build_fused_operands(params, H0)
    assert (oh1b, ow1b) == (oh1, ow1)
    owc = consts[0].shape[1]
    n_tiles = N // bt

    def _const_spec(a):
        nd = a.ndim
        return pl.BlockSpec(a.shape, lambda i, _nd=nd: (0,) * _nd)

    in_specs = [pl.BlockSpec((bt * oh1, patches.shape[1]), lambda i: (i, 0))]
    in_specs += [_const_spec(c) for c in consts]

    bytes_accessed = int(patches.size * 2
                         + sum(int(c.size) * c.dtype.itemsize for c in consts)
                         + N * A_PAD * 4)

    kernel = functools.partial(fused_rainbow_kernel,
                               oh1=oh1, n_dense=len(params["conv"]) - 1)

    q = pl.pallas_call(
        kernel,
        out_shape=jax.ShapeDtypeStruct((N, A_PAD), jnp.float32),
        grid=(n_tiles,),
        in_specs=in_specs,
        out_specs=pl.BlockSpec((bt, A_PAD), lambda i: (i, 0)),
        scratch_shapes=[pltpu.VMEM((bt, oh1, owc), jnp.float32)],
        compiler_params=pltpu.CompilerParams(
            # "parallel" shards batch tiles across v7x's 2 TensorCores.
            # Total VMEM (~1 MB constants + 256 KB patch block, double
            # buffered) is far below every chip's limit, so no Buffered(1)
            # tricks are needed.
            dimension_semantics=("parallel",),
            vmem_limit_bytes=32 * 1024 * 1024,
        ),
        cost_estimate=pl.CostEstimate(
            flops=int(flops_ps) * N,
            transcendentals=4 * N,               # one rsqrt per sample per norm
            bytes_accessed=bytes_accessed,
        ),
    )(patches, *consts)
    return q[:, :n_actions]


# ----------------------------------------------------------------------------
# Parameters + pure-JAX reference (for correctness check)
# ----------------------------------------------------------------------------
CONV_CFG = [  # (cin, cout, kernel, stride) -- matches RainbowDQN.__init__
    (None, 16, 8, 4),
    (16, 24, 4, 2),
    (24, 32, 3, 1),
]


def _bf16_round(x):
    # Matmul weights are fed to the MXU in bf16; store them at representable
    # values so the reference uses identical weights.
    return x.astype(jnp.bfloat16).astype(jnp.float32)


def init_params(key, input_shape, n_actions):
    cin0, H, W = input_shape
    params = {"conv": []}
    h, cin = H, cin0
    for (_, cout, k, s) in CONV_CFG:
        key, kw_, kb_, kg_, kbe_ = jax.random.split(key, 5)
        w = _bf16_round(0.05 * jax.random.normal(kw_, (cout, cin, k, k), jnp.float32))
        b = 0.01 * jax.random.normal(kb_, (cout,), jnp.float32)
        g = 1.0 + 0.1 * jax.random.normal(kg_, (cout,), jnp.float32)
        be = 0.1 * jax.random.normal(kbe_, (cout,), jnp.float32)
        params["conv"].append((w, b, g, be, k, s))
        h = (h - k) // s + 1
        cin = cout
    conv_out = cin * h * h
    key, k1, k2, k3, k4, k5, k6 = jax.random.split(key, 7)
    params["fc"] = dict(
        w1=_bf16_round(0.05 * jax.random.normal(k1, (conv_out, 256), jnp.float32)),
        b1=0.01 * jax.random.normal(k2, (256,), jnp.float32),
        ln_g=1.0 + 0.1 * jax.random.normal(k3, (256,), jnp.float32),
        ln_b=0.1 * jax.random.normal(k4, (256,), jnp.float32),
        w2=_bf16_round(0.05 * jax.random.normal(k5, (256, n_actions), jnp.float32)),
        b2=0.01 * jax.random.normal(k6, (n_actions,), jnp.float32),
    )
    return params, conv_out


def ref_forward(x_nchw, params):
    x = x_nchw
    for (w, b, g, be, k, s) in params["conv"]:
        x = lax.conv_general_dilated(
            x, w, (s, s), "VALID", dimension_numbers=("NCHW", "OIHW", "NCHW")
        ) + b[None, :, None, None]
        mean = jnp.mean(x, axis=(1, 2, 3), keepdims=True)
        var = jnp.mean((x - mean) ** 2, axis=(1, 2, 3), keepdims=True)
        x = (x - mean) / jnp.sqrt(var + EPS)
        x = x * g[None, :, None, None] + be[None, :, None, None]
        x = jnp.maximum(x, 0.0)
    flat = x.reshape(x.shape[0], -1)
    fc = params["fc"]
    h = flat @ fc["w1"] + fc["b1"]
    mean = jnp.mean(h, axis=-1, keepdims=True)
    var = jnp.mean((h - mean) ** 2, axis=-1, keepdims=True)
    hn = (h - mean) / jnp.sqrt(var + EPS) * fc["ln_g"] + fc["ln_b"]
    hn = jnp.maximum(hn, 0.0)
    return hn @ fc["w2"] + fc["b2"]


if __name__ == "__main__":
    # Smallest spatial size the conv stack supports is 36x36
    # (36 -> 8 -> 3 -> 1 ; conv_out_size = 32*1*1 = 32).  batch=16 so the
    # default batch_tile=8 gives two "parallel" grid steps.
    batch, channels, spatial, n_actions = 16, 4, 36, 6
    key = jax.random.PRNGKey(0)
    key, xkey = jax.random.split(key)
    x = jax.random.normal(xkey, (batch, channels, spatial, spatial), jnp.float32)

    params, _ = init_params(key, (channels, spatial, spatial), n_actions)

    q = jax.block_until_ready(rainbow_dqn_forward(x, params))
    q_ref = jax.block_until_ready(ref_forward(x, params))

    assert q.shape == (batch, n_actions), q.shape
    # bf16 MXU operands (f32 accumulation); norm/affine math in f32.
    assert jnp.allclose(q, q_ref, rtol=3e-2, atol=3e-2), (q, q_ref)
    print("KERNEL_OK")
</pallas_src>

<mosaic_0001>
module attributes {stable_mosaic.version = 11 : i64} {
  func.func @fused_rainbow_kernel(%arg0: i32, %arg1: memref<64x2048xbf16, #tpu.memory_space<vmem>>, %arg2: memref<2048x128xbf16, #tpu.memory_space<vmem>>, %arg3: memref<1x1x128xf32, #tpu.memory_space<vmem>>, %arg4: memref<1x1x128xf32, #tpu.memory_space<vmem>>, %arg5: memref<1x1x128xf32, #tpu.memory_space<vmem>>, %arg6: memref<1024x216xbf16, #tpu.memory_space<vmem>>, %arg7: memref<1x216xf32, #tpu.memory_space<vmem>>, %arg8: memref<1x216xf32, #tpu.memory_space<vmem>>, %arg9: memref<1x216xf32, #tpu.memory_space<vmem>>, %arg10: memref<216x32xbf16, #tpu.memory_space<vmem>>, %arg11: memref<1x32xf32, #tpu.memory_space<vmem>>, %arg12: memref<1x32xf32, #tpu.memory_space<vmem>>, %arg13: memref<1x32xf32, #tpu.memory_space<vmem>>, %arg14: memref<32x256xbf16, #tpu.memory_space<vmem>>, %arg15: memref<1x256xf32, #tpu.memory_space<vmem>>, %arg16: memref<1x256xf32, #tpu.memory_space<vmem>>, %arg17: memref<1x256xf32, #tpu.memory_space<vmem>>, %arg18: memref<256x128xbf16, #tpu.memory_space<vmem>>, %arg19: memref<1x128xf32, #tpu.memory_space<vmem>>, %arg20: memref<8x128xf32, #tpu.memory_space<vmem>>, %arg21: memref<8x8x128xf32, #tpu.memory_space<vmem>>) attributes {dimension_semantics = [#tpu.dimension_semantics<parallel>], iteration_bounds = array<i64: 2>, scalar_prefetch = 0 : i64, scratch_operands = 1 : i64, tpu.core_type = #tpu.core_type<tc>, window_params = [{transform_indices = @transform_0, window_bounds = array<i64: 64, 2048>}, {pipeline_mode = #tpu.pipeline_mode<synchronous>, transform_indices = @transform_1, window_bounds = array<i64: 2048, 128>}, {pipeline_mode = #tpu.pipeline_mode<synchronous>, transform_indices = @transform_2, window_bounds = array<i64: 1, 1, 128>}, {pipeline_mode = #tpu.pipeline_mode<synchronous>, transform_indices = @transform_3, window_bounds = array<i64: 1, 1, 128>}, {pipeline_mode = #tpu.pipeline_mode<synchronous>, transform_indices = @transform_4, window_bounds = array<i64: 1, 1, 128>}, {pipeline_mode = #tpu.pipeline_mode<synchronous>, transform_indices = @transform_5, window_bounds = array<i64: 1024, 216>}, {pipeline_mode = #tpu.pipeline_mode<synchronous>, transform_indices = @transform_6, window_bounds = array<i64: 1, 216>}, {pipeline_mode = #tpu.pipeline_mode<synchronous>, transform_indices = @transform_7, window_bounds = array<i64: 1, 216>}, {pipeline_mode = #tpu.pipeline_mode<synchronous>, transform_indices = @transform_8, window_bounds = array<i64: 1, 216>}, {pipeline_mode = #tpu.pipeline_mode<synchronous>, transform_indices = @transform_9, window_bounds = array<i64: 216, 32>}, {pipeline_mode = #tpu.pipeline_mode<synchronous>, transform_indices = @transform_10, window_bounds = array<i64: 1, 32>}, {pipeline_mode = #tpu.pipeline_mode<synchronous>, transform_indices = @transform_11, window_bounds = array<i64: 1, 32>}, {pipeline_mode = #tpu.pipeline_mode<synchronous>, transform_indices = @transform_12, window_bounds = array<i64: 1, 32>}, {pipeline_mode = #tpu.pipeline_mode<synchronous>, transform_indices = @transform_13, window_bounds = array<i64: 32, 256>}, {pipeline_mode = #tpu.pipeline_mode<synchronous>, transform_indices = @transform_14, window_bounds = array<i64: 1, 256>}, {pipeline_mode = #tpu.pipeline_mode<synchronous>, transform_indices = @transform_15, window_bounds = array<i64: 1, 256>}, {pipeline_mode = #tpu.pipeline_mode<synchronous>, transform_indices = @transform_16, window_bounds = array<i64: 1, 256>}, {pipeline_mode = #tpu.pipeline_mode<synchronous>, transform_indices = @transform_17, window_bounds = array<i64: 256, 128>}, {pipeline_mode = #tpu.pipeline_mode<synchronous>, transform_indices = @transform_18, window_bounds = array<i64: 1, 128>}, {transform_indices = @transform_19, window_bounds = array<i64: 8, 128>}]} {
    %c0 = arith.constant 0 : index
    %c0_0 = arith.constant 0 : index
    %0 = vector.load %arg1[%c0, %c0_0] : memref<64x2048xbf16, #tpu.memory_space<vmem>>, vector<64x2048xbf16>
    %c0_1 = arith.constant 0 : index
    %c0_2 = arith.constant 0 : index
    %1 = vector.load %arg2[%c0_1, %c0_2] : memref<2048x128xbf16, #tpu.memory_space<vmem>>, vector<2048x128xbf16>
    %cst = arith.constant dense<0.000000e+00> : vector<64x128xf32>
    %2 = tpu.matmul %0, %1, %cst {dimension_numbers = #tpu.dot_dimension_numbers<[1], [0], [0], [1], [0, 0, 1, 1], [], []>} : vector<64x2048xbf16>, vector<2048x128xbf16>, vector<64x128xf32> -> vector<64x128xf32>
    %3 = vector.shape_cast %2 : vector<64x128xf32> to vector<8x8x128xf32>
    %c0_3 = arith.constant 0 : index
    %c0_4 = arith.constant 0 : index
    %c0_5 = arith.constant 0 : index
    %4 = vector.load %arg3[%c0_3, %c0_4, %c0_5] : memref<1x1x128xf32, #tpu.memory_space<vmem>>, vector<1x1x128xf32>
    %5 = vector.broadcast %4 : vector<1x1x128xf32> to vector<8x8x128xf32>
    %6 = arith.addf %3, %5 : vector<8x8x128xf32>
    %cst_6 = arith.constant dense<0.000000e+00> : vector<8x8xf32>
    %7 = vector.multi_reduction <add>, %6, %cst_6 [2] : vector<8x8x128xf32> to vector<8x8xf32>
    %8 = vector.shape_cast %7 : vector<8x8xf32> to vector<8x8x1xf32>
    %cst_7 = arith.constant dense<0.000000e+00> : vector<8x1xf32>
    %9 = vector.multi_reduction <add>, %8, %cst_7 [1] : vector<8x8x1xf32> to vector<8x1xf32>
    %10 = vector.shape_cast %9 : vector<8x1xf32> to vector<8x1x1xf32>
    %11 = arith.mulf %6, %6 : vector<8x8x128xf32>
    %cst_8 = arith.constant dense<0.000000e+00> : vector<8x8xf32>
    %12 = vector.multi_reduction <add>, %11, %cst_8 [2] : vector<8x8x128xf32> to vector<8x8xf32>
    %13 = vector.shape_cast %12 : vector<8x8xf32> to vector<8x8x1xf32>
    %cst_9 = arith.constant dense<0.000000e+00> : vector<8x1xf32>
    %14 = vector.multi_reduction <add>, %13, %cst_9 [1] : vector<8x8x1xf32> to vector<8x1xf32>
    %15 = vector.shape_cast %14 : vector<8x1xf32> to vector<8x1x1xf32>
    %cst_10 = arith.constant 9.765625E-4 : f32
    %16 = vector.broadcast %cst_10 : f32 to vector<8x1x1xf32>
    %17 = arith.mulf %10, %16 : vector<8x1x1xf32>
    %cst_11 = arith.constant 9.765625E-4 : f32
    %18 = vector.broadcast %cst_11 : f32 to vector<8x1x1xf32>
    %19 = arith.mulf %15, %18 : vector<8x1x1xf32>
    %20 = arith.mulf %17, %17 : vector<8x1x1xf32>
    %21 = arith.subf %19, %20 : vector<8x1x1xf32>
    %cst_12 = arith.constant 0.000000e+00 : f32
    %22 = vector.broadcast %cst_12 : f32 to vector<8x1x1xf32>
    %23 = arith.maximumf %21, %22 : vector<8x1x1xf32>
    %cst_13 = arith.constant 9.99999974E-6 : f32
    %24 = vector.broadcast %cst_13 : f32 to vector<8x1x1xf32>
    %25 = arith.addf %23, %24 : vector<8x1x1xf32>
    %26 = math.rsqrt %25 : vector<8x1x1xf32>
    %27 = vector.broadcast %17 : vector<8x1x1xf32> to vector<8x8x128xf32>
    %28 = arith.subf %6, %27 : vector<8x8x128xf32>
    %29 = vector.broadcast %26 : vector<8x1x1xf32> to vector<8x8x128xf32>
    %30 = arith.mulf %28, %29 : vector<8x8x128xf32>
    %c0_14 = arith.constant 0 : index
    %c0_15 = arith.constant 0 : index
    %c0_16 = arith.constant 0 : index
    %31 = vector.load %arg4[%c0_14, %c0_15, %c0_16] : memref<1x1x128xf32, #tpu.memory_space<vmem>>, vector<1x1x128xf32>
    %32 = vector.broadcast %31 : vector<1x1x128xf32> to vector<8x8x128xf32>
    %33 = arith.mulf %30, %32 : vector<8x8x128xf32>
    %c0_17 = arith.constant 0 : index
    %c0_18 = arith.constant 0 : index
    %c0_19 = arith.constant 0 : index
    %34 = vector.load %arg5[%c0_17, %c0_18, %c0_19] : memref<1x1x128xf32, #tpu.memory_space<vmem>>, vector<1x1x128xf32>
    %35 = vector.broadcast %34 : vector<1x1x128xf32> to vector<8x8x128xf32>
    %36 = arith.addf %33, %35 : vector<8x8x128xf32>
    %cst_20 = arith.constant 0.000000e+00 : f32
    %37 = vector.broadcast %cst_20 : f32 to vector<8x8x128xf32>
    %38 = arith.maximumf %36, %37 : vector<8x8x128xf32>
    %c0_21 = arith.constant 0 : index
    %c0_22 = arith.constant 0 : index
    %c0_23 = arith.constant 0 : index
    %39 = vector.load %arg21[%c0_21, %c0_22, %c0_23] : memref<8x8x128xf32, #tpu.memory_space<vmem>>, vector<8x8x128xf32>
    tpu.vector_store %arg21[%c0_21, %c0_22, %c0_23], %38 {strides = array<i32>} : memref<8x8x128xf32, #tpu.memory_space<vmem>>, vector<8x8x128xf32>,
    %c0_24 = arith.constant 0 : index
    %c0_25 = arith.constant 0 : index
    %c0_26 = arith.constant 0 : index
    %40 = vector.load %arg21[%c0_24, %c0_25, %c0_26] : memref<8x8x128xf32, #tpu.memory_space<vmem>>, vector<8x1x128xf32>
    %41 = vector.shape_cast %40 : vector<8x1x128xf32> to vector<8x128xf32>
    %c0_27 = arith.constant 0 : index
    %c1 = arith.constant 1 : index
    %c0_28 = arith.constant 0 : index
    %42 = vector.load %arg21[%c0_27, %c1, %c0_28] : memref<8x8x128xf32, #tpu.memory_space<vmem>>, vector<8x1x128xf32>
    %43 = vector.shape_cast %42 : vector<8x1x128xf32> to vector<8x128xf32>
    %c0_29 = arith.constant 0 : index
    %c2 = arith.constant 2 : index
    %c0_30 = arith.constant 0 : index
    %44 = vector.load %arg21[%c0_29, %c2, %c0_30] : memref<8x8x128xf32, #tpu.memory_space<vmem>>, vector<8x1x128xf32>
    %45 = vector.shape_cast %44 : vector<8x1x128xf32> to vector<8x128xf32>
    %c0_31 = arith.constant 0 : index
    %c3 = arith.constant 3 : index
    %c0_32 = arith.constant 0 : index
    %46 = vector.load %arg21[%c0_31, %c3, %c0_32] : memref<8x8x128xf32, #tpu.memory_space<vmem>>, vector<8x1x128xf32>
    %47 = vector.shape_cast %46 : vector<8x1x128xf32> to vector<8x128xf32>
    %c0_33 = arith.constant 0 : index
    %c4 = arith.constant 4 : index
    %c0_34 = arith.constant 0 : index
    %48 = vector.load %arg21[%c0_33, %c4, %c0_34] : memref<8x8x128xf32, #tpu.memory_space<vmem>>, vector<8x1x128xf32>
    %49 = vector.shape_cast %48 : vector<8x1x128xf32> to vector<8x128xf32>
    %c0_35 = arith.constant 0 : index
    %c5 = arith.constant 5 : index
    %c0_36 = arith.constant 0 : index
    %50 = vector.load %arg21[%c0_35, %c5, %c0_36] : memref<8x8x128xf32, #tpu.memory_space<vmem>>, vector<8x1x128xf32>
    %51 = vector.shape_cast %50 : vector<8x1x128xf32> to vector<8x128xf32>
    %c0_37 = arith.constant 0 : index
    %c6 = arith.constant 6 : index
    %c0_38 = arith.constant 0 : index
    %52 = vector.load %arg21[%c0_37, %c6, %c0_38] : memref<8x8x128xf32, #tpu.memory_space<vmem>>, vector<8x1x128xf32>
    %53 = vector.shape_cast %52 : vector<8x1x128xf32> to vector<8x128xf32>
    %c0_39 = arith.constant 0 : index
    %c7 = arith.constant 7 : index
    %c0_40 = arith.constant 0 : index
    %54 = vector.load %arg21[%c0_39, %c7, %c0_40] : memref<8x8x128xf32, #tpu.memory_space<vmem>>, vector<8x1x128xf32>
    %55 = vector.shape_cast %54 : vector<8x1x128xf32> to vector<8x128xf32>
    %56 = tpu.concatenate %41, %43, %45, %47, %49, %51, %53, %55 in 1 : vector<8x128xf32>, vector<8x128xf32>, vector<8x128xf32>, vector<8x128xf32>, vector<8x128xf32>, vector<8x128xf32>, vector<8x128xf32>, vector<8x128xf32> -> vector<8x1024xf32>
    %57 = arith.truncf %56 : vector<8x1024xf32> to vector<8x1024xbf16>
    %c0_41 = arith.constant 0 : index
    %c0_42 = arith.constant 0 : index
    %58 = vector.load %arg6[%c0_41, %c0_42] : memref<1024x216xbf16, #tpu.memory_space<vmem>>, vector<1024x216xbf16>
    %cst_43 = arith.constant dense<0.000000e+00> : vector<8x216xf32>
    %59 = tpu.matmul %57, %58, %cst_43 {dimension_numbers = #tpu.dot_dimension_numbers<[1], [0], [0], [1], [0, 0, 1, 1], [], []>} : vector<8x1024xbf16>, vector<1024x216xbf16>, vector<8x216xf32> -> vector<8x216xf32>
    %c0_44 = arith.constant 0 : index
    %c0_45 = arith.constant 0 : index
    %60 = vector.load %arg7[%c0_44, %c0_45] : memref<1x216xf32, #tpu.memory_space<vmem>>, vector<1x216xf32>
    %61 = vector.broadcast %60 : vector<1x216xf32> to vector<8x216xf32>
    %62 = arith.addf %59, %61 : vector<8x216xf32>
    %c0_46 = arith.constant 0 : index
    %c0_47 = arith.constant 0 : index
    %63 = vector.load %arg8[%c0_46, %c0_47] : memref<1x216xf32, #tpu.memory_space<vmem>>, vector<1x216xf32>
    %c0_48 = arith.constant 0 : index
    %c0_49 = arith.constant 0 : index
    %64 = vector.load %arg9[%c0_48, %c0_49] : memref<1x216xf32, #tpu.memory_space<vmem>>, vector<1x216xf32>
    %cst_50 = arith.constant dense<0.000000e+00> : vector<8xf32>
    %65 = vector.multi_reduction <add>, %62, %cst_50 [1] : vector<8x216xf32> to vector<8xf32>
    %66 = vector.shape_cast %65 : vector<8xf32> to vector<8x1xf32>
    %cst_51 = arith.constant 0.00462962966 : f32
    %67 = vector.broadcast %cst_51 : f32 to vector<8x1xf32>
    %68 = arith.mulf %66, %67 : vector<8x1xf32>
    %69 = arith.mulf %62, %62 : vector<8x216xf32>
    %cst_52 = arith.constant dense<0.000000e+00> : vector<8xf32>
    %70 = vector.multi_reduction <add>, %69, %cst_52 [1] : vector<8x216xf32> to vector<8xf32>
    %71 = vector.shape_cast %70 : vector<8xf32> to vector<8x1xf32>
    %cst_53 = arith.constant 0.00462962966 : f32
    %72 = vector.broadcast %cst_53 : f32 to vector<8x1xf32>
    %73 = arith.mulf %71, %72 : vector<8x1xf32>
    %74 = arith.mulf %68, %68 : vector<8x1xf32>
    %75 = arith.subf %73, %74 : vector<8x1xf32>
    %cst_54 = arith.constant 0.000000e+00 : f32
    %76 = vector.broadcast %cst_54 : f32 to vector<8x1xf32>
    %77 = arith.maximumf %75, %76 : vector<8x1xf32>
    %cst_55 = arith.constant 9.99999974E-6 : f32
    %78 = vector.broadcast %cst_55 : f32 to vector<8x1xf32>
    %79 = arith.addf %77, %78 : vector<8x1xf32>
    %80 = math.rsqrt %79 : vector<8x1xf32>
    %81 = vector.broadcast %68 : vector<8x1xf32> to vector<8x216xf32>
    %82 = arith.subf %62, %81 : vector<8x216xf32>
    %83 = vector.broadcast %80 : vector<8x1xf32> to vector<8x216xf32>
    %84 = arith.mulf %82, %83 : vector<8x216xf32>
    %85 = vector.broadcast %63 : vector<1x216xf32> to vector<8x216xf32>
    %86 = arith.mulf %84, %85 : vector<8x216xf32>
    %87 = vector.broadcast %64 : vector<1x216xf32> to vector<8x216xf32>
    %88 = arith.addf %86, %87 : vector<8x216xf32>
    %cst_56 = arith.constant 0.000000e+00 : f32
    %89 = vector.broadcast %cst_56 : f32 to vector<8x216xf32>
    %90 = arith.maximumf %88, %89 : vector<8x216xf32>
    %91 = arith.truncf %90 : vector<8x216xf32> to vector<8x216xbf16>
    %c0_57 = arith.constant 0 : index
    %c0_58 = arith.constant 0 : index
    %92 = vector.load %arg10[%c0_57, %c0_58] : memref<216x32xbf16, #tpu.memory_space<vmem>>, vector<216x32xbf16>
    %cst_59 = arith.constant dense<0.000000e+00> : vector<8x32xf32>
    %93 = tpu.matmul %91, %92, %cst_59 {dimension_numbers = #tpu.dot_dimension_numbers<[1], [0], [0], [1], [0, 0, 1, 1], [], []>} : vector<8x216xbf16>, vector<216x32xbf16>, vector<8x32xf32> -> vector<8x32xf32>
    %c0_60 = arith.constant 0 : index
    %c0_61 = arith.constant 0 : index
    %94 = vector.load %arg11[%c0_60, %c0_61] : memref<1x32xf32, #tpu.memory_space<vmem>>, vector<1x32xf32>
    %95 = vector.broadcast %94 : vector<1x32xf32> to vector<8x32xf32>
    %96 = arith.addf %93, %95 : vector<8x32xf32>
    %c0_62 = arith.constant 0 : index
    %c0_63 = arith.constant 0 : index
    %97 = vector.load %arg12[%c0_62, %c0_63] : memref<1x32xf32, #tpu.memory_space<vmem>>, vector<1x32xf32>
    %c0_64 = arith.constant 0 : index
    %c0_65 = arith.constant 0 : index
    %98 = vector.load %arg13[%c0_64, %c0_65] : memref<1x32xf32, #tpu.memory_space<vmem>>, vector<1x32xf32>
    %cst_66 = arith.constant dense<0.000000e+00> : vector<8xf32>
    %99 = vector.multi_reduction <add>, %96, %cst_66 [1] : vector<8x32xf32> to vector<8xf32>
    %100 = vector.shape_cast %99 : vector<8xf32> to vector<8x1xf32>
    %cst_67 = arith.constant 3.125000e-02 : f32
    %101 = vector.broadcast %cst_67 : f32 to vector<8x1xf32>
    %102 = arith.mulf %100, %101 : vector<8x1xf32>
    %103 = arith.mulf %96, %96 : vector<8x32xf32>
    %cst_68 = arith.constant dense<0.000000e+00> : vector<8xf32>
    %104 = vector.multi_reduction <add>, %103, %cst_68 [1] : vector<8x32xf32> to vector<8xf32>
    %105 = vector.shape_cast %104 : vector<8xf32> to vector<8x1xf32>
    %cst_69 = arith.constant 3.125000e-02 : f32
    %106 = vector.broadcast %cst_69 : f32 to vector<8x1xf32>
    %107 = arith.mulf %105, %106 : vector<8x1xf32>
    %108 = arith.mulf %102, %102 : vector<8x1xf32>
    %109 = arith.subf %107, %108 : vector<8x1xf32>
    %cst_70 = arith.constant 0.000000e+00 : f32
    %110 = vector.broadcast %cst_70 : f32 to vector<8x1xf32>
    %111 = arith.maximumf %109, %110 : vector<8x1xf32>
    %cst_71 = arith.constant 9.99999974E-6 : f32
    %112 = vector.broadcast %cst_71 : f32 to vector<8x1xf32>
    %113 = arith.addf %111, %112 : vector<8x1xf32>
    %114 = math.rsqrt %113 : vector<8x1xf32>
    %115 = vector.broadcast %102 : vector<8x1xf32> to vector<8x32xf32>
    %116 = arith.subf %96, %115 : vector<8x32xf32>
    %117 = vector.broadcast %114 : vector<8x1xf32> to vector<8x32xf32>
    %118 = arith.mulf %116, %117 : vector<8x32xf32>
    %119 = vector.broadcast %97 : vector<1x32xf32> to vector<8x32xf32>
    %120 = arith.mulf %118, %119 : vector<8x32xf32>
    %121 = vector.broadcast %98 : vector<1x32xf32> to vector<8x32xf32>
    %122 = arith.addf %120, %121 : vector<8x32xf32>
    %cst_72 = arith.constant 0.000000e+00 : f32
    %123 = vector.broadcast %cst_72 : f32 to vector<8x32xf32>
    %124 = arith.maximumf %122, %123 : vector<8x32xf32>
    %125 = arith.truncf %124 : vector<8x32xf32> to vector<8x32xbf16>
    %c0_73 = arith.constant 0 : index
    %c0_74 = arith.constant 0 : index
    %126 = vector.load %arg14[%c0_73, %c0_74] : memref<32x256xbf16, #tpu.memory_space<vmem>>, vector<32x256xbf16>
    %cst_75 = arith.constant dense<0.000000e+00> : vector<8x256xf32>
    %127 = tpu.matmul %125, %126, %cst_75 {dimension_numbers = #tpu.dot_dimension_numbers<[1], [0], [0], [1], [0, 0, 1, 1], [], []>} : vector<8x32xbf16>, vector<32x256xbf16>, vector<8x256xf32> -> vector<8x256xf32>
    %c0_76 = arith.constant 0 : index
    %c0_77 = arith.constant 0 : index
    %128 = vector.load %arg15[%c0_76, %c0_77] : memref<1x256xf32, #tpu.memory_space<vmem>>, vector<1x256xf32>
    %129 = vector.broadcast %128 : vector<1x256xf32> to vector<8x256xf32>
    %130 = arith.addf %127, %129 : vector<8x256xf32>
    %c0_78 = arith.constant 0 : index
    %c0_79 = arith.constant 0 : index
    %131 = vector.load %arg16[%c0_78, %c0_79] : memref<1x256xf32, #tpu.memory_space<vmem>>, vector<1x256xf32>
    %c0_80 = arith.constant 0 : index
    %c0_81 = arith.constant 0 : index
    %132 = vector.load %arg17[%c0_80, %c0_81] : memref<1x256xf32, #tpu.memory_space<vmem>>, vector<1x256xf32>
    %cst_82 = arith.constant dense<0.000000e+00> : vector<8xf32>
    %133 = vector.multi_reduction <add>, %130, %cst_82 [1] : vector<8x256xf32> to vector<8xf32>
    %134 = vector.shape_cast %133 : vector<8xf32> to vector<8x1xf32>
    %cst_83 = arith.constant 3.906250e-03 : f32
    %135 = vector.broadcast %cst_83 : f32 to vector<8x1xf32>
    %136 = arith.mulf %134, %135 : vector<8x1xf32>
    %137 = arith.mulf %130, %130 : vector<8x256xf32>
    %cst_84 = arith.constant dense<0.000000e+00> : vector<8xf32>
    %138 = vector.multi_reduction <add>, %137, %cst_84 [1] : vector<8x256xf32> to vector<8xf32>
    %139 = vector.shape_cast %138 : vector<8xf32> to vector<8x1xf32>
    %cst_85 = arith.constant 3.906250e-03 : f32
    %140 = vector.broadcast %cst_85 : f32 to vector<8x1xf32>
    %141 = arith.mulf %139, %140 : vector<8x1xf32>
    %142 = arith.mulf %136, %136 : vector<8x1xf32>
    %143 = arith.subf %141, %142 : vector<8x1xf32>
    %cst_86 = arith.constant 0.000000e+00 : f32
    %144 = vector.broadcast %cst_86 : f32 to vector<8x1xf32>
    %145 = arith.maximumf %143, %144 : vector<8x1xf32>
    %cst_87 = arith.constant 9.99999974E-6 : f32
    %146 = vector.broadcast %cst_87 : f32 to vector<8x1xf32>
    %147 = arith.addf %145, %146 : vector<8x1xf32>
    %148 = math.rsqrt %147 : vector<8x1xf32>
    %149 = vector.broadcast %136 : vector<8x1xf32> to vector<8x256xf32>
    %150 = arith.subf %130, %149 : vector<8x256xf32>
    %151 = vector.broadcast %148 : vector<8x1xf32> to vector<8x256xf32>
    %152 = arith.mulf %150, %151 : vector<8x256xf32>
    %153 = vector.broadcast %131 : vector<1x256xf32> to vector<8x256xf32>
    %154 = arith.mulf %152, %153 : vector<8x256xf32>
    %155 = vector.broadcast %132 : vector<1x256xf32> to vector<8x256xf32>
    %156 = arith.addf %154, %155 : vector<8x256xf32>
    %cst_88 = arith.constant 0.000000e+00 : f32
    %157 = vector.broadcast %cst_88 : f32 to vector<8x256xf32>
    %158 = arith.maximumf %156, %157 : vector<8x256xf32>
    %159 = arith.truncf %158 : vector<8x256xf32> to vector<8x256xbf16>
    %c0_89 = arith.constant 0 : index
    %c0_90 = arith.constant 0 : index
    %160 = vector.load %arg18[%c0_89, %c0_90] : memref<256x128xbf16, #tpu.memory_space<vmem>>, vector<256x128xbf16>
    %cst_91 = arith.constant dense<0.000000e+00> : vector<8x128xf32>
    %161 = tpu.matmul %159, %160, %cst_91 {dimension_numbers = #tpu.dot_dimension_numbers<[1], [0], [0], [1], [0, 0, 1, 1], [], []>} : vector<8x256xbf16>, vector<256x128xbf16>, vector<8x128xf32> -> vector<8x128xf32>
    %c0_92 = arith.constant 0 : index
    %c0_93 = arith.constant 0 : index
    %162 = vector.load %arg19[%c0_92, %c0_93] : memref<1x128xf32, #tpu.memory_space<vmem>>, vector<1x128xf32>
    %163 = vector.broadcast %162 : vector<1x128xf32> to vector<8x128xf32>
    %164 = arith.addf %161, %163 : vector<8x128xf32>
    %c0_94 = arith.constant 0 : index
    %c0_95 = arith.constant 0 : index
    %165 = vector.load %arg20[%c0_94, %c0_95] : memref<8x128xf32, #tpu.memory_space<vmem>>, vector<8x128xf32>
    tpu.vector_store %arg20[%c0_94, %c0_95], %164 {strides = array<i32>} : memref<8x128xf32, #tpu.memory_space<vmem>>, vector<8x128xf32>,
    return
  }
  func.func @transform_0(%arg0: i32) -> (i32, i32) {
    %c0_i32 = arith.constant 0 : i32
    %c0_i32_0 = arith.constant 0 : i32
    return %arg0, %c0_i32 : i32, i32
  }
  func.func @transform_1(%arg0: i32) -> (i32, i32) {
    %c0_i32 = arith.constant 0 : i32
    %c0_i32_0 = arith.constant 0 : i32
    %c0_i32_1 = arith.constant 0 : i32
    return %c0_i32, %c0_i32_0 : i32, i32
  }
  func.func @transform_2(%arg0: i32) -> (i32, i32, i32) {
    %c0_i32 = arith.constant 0 : i32
    %c0_i32_0 = arith.constant 0 : i32
    %c0_i32_1 = arith.constant 0 : i32
    %c0_i32_2 = arith.constant 0 : i32
    return %c0_i32, %c0_i32_0, %c0_i32_1 : i32, i32, i32
  }
  func.func @transform_3(%arg0: i32) -> (i32, i32, i32) {
    %c0_i32 = arith.constant 0 : i32
    %c0_i32_0 = arith.constant 0 : i32
    %c0_i32_1 = arith.constant 0 : i32
    %c0_i32_2 = arith.constant 0 : i32
    return %c0_i32, %c0_i32_0, %c0_i32_1 : i32, i32, i32
  }
  func.func @transform_4(%arg0: i32) -> (i32, i32, i32) {
    %c0_i32 = arith.constant 0 : i32
    %c0_i32_0 = arith.constant 0 : i32
    %c0_i32_1 = arith.constant 0 : i32
    %c0_i32_2 = arith.constant 0 : i32
    return %c0_i32, %c0_i32_0, %c0_i32_1 : i32, i32, i32
  }
  func.func @transform_5(%arg0: i32) -> (i32, i32) {
    %c0_i32 = arith.constant 0 : i32
    %c0_i32_0 = arith.constant 0 : i32
    %c0_i32_1 = arith.constant 0 : i32
    return %c0_i32, %c0_i32_0 : i32, i32
  }
  func.func @transform_6(%arg0: i32) -> (i32, i32) {
    %c0_i32 = arith.constant 0 : i32
    %c0_i32_0 = arith.constant 0 : i32
    %c0_i32_1 = arith.constant 0 : i32
    return %c0_i32, %c0_i32_0 : i32, i32
  }
  func.func @transform_7(%arg0: i32) -> (i32, i32) {
    %c0_i32 = arith.constant 0 : i32
    %c0_i32_0 = arith.constant 0 : i32
    %c0_i32_1 = arith.constant 0 : i32
    return %c0_i32, %c0_i32_0 : i32, i32
  }
  func.func @transform_8(%arg0: i32) -> (i32, i32) {
    %c0_i32 = arith.constant 0 : i32
    %c0_i32_0 = arith.constant 0 : i32
    %c0_i32_1 = arith.constant 0 : i32
    return %c0_i32, %c0_i32_0 : i32, i32
  }
  func.func @transform_9(%arg0: i32) -> (i32, i32) {
    %c0_i32 = arith.constant 0 : i32
    %c0_i32_0 = arith.constant 0 : i32
    %c0_i32_1 = arith.constant 0 : i32
    return %c0_i32, %c0_i32_0 : i32, i32
  }
  func.func @transform_10(%arg0: i32) -> (i32, i32) {
    %c0_i32 = arith.constant 0 : i32
    %c0_i32_0 = arith.constant 0 : i32
    %c0_i32_1 = arith.constant 0 : i32
    return %c0_i32, %c0_i32_0 : i32, i32
  }
  func.func @transform_11(%arg0: i32) -> (i32, i32) {
    %c0_i32 = arith.constant 0 : i32
    %c0_i32_0 = arith.constant 0 : i32
    %c0_i32_1 = arith.constant 0 : i32
    return %c0_i32, %c0_i32_0 : i32, i32
  }
  func.func @transform_12(%arg0: i32) -> (i32, i32) {
    %c0_i32 = arith.constant 0 : i32
    %c0_i32_0 = arith.constant 0 : i32
    %c0_i32_1 = arith.constant 0 : i32
    return %c0_i32, %c0_i32_0 : i32, i32
  }
  func.func @transform_13(%arg0: i32) -> (i32, i32) {
    %c0_i32 = arith.constant 0 : i32
    %c0_i32_0 = arith.constant 0 : i32
    %c0_i32_1 = arith.constant 0 : i32
    return %c0_i32, %c0_i32_0 : i32, i32
  }
  func.func @transform_14(%arg0: i32) -> (i32, i32) {
    %c0_i32 = arith.constant 0 : i32
    %c0_i32_0 = arith.constant 0 : i32
    %c0_i32_1 = arith.constant 0 : i32
    return %c0_i32, %c0_i32_0 : i32, i32
  }
  func.func @transform_15(%arg0: i32) -> (i32, i32) {
    %c0_i32 = arith.constant 0 : i32
    %c0_i32_0 = arith.constant 0 : i32
    %c0_i32_1 = arith.constant 0 : i32
    return %c0_i32, %c0_i32_0 : i32, i32
  }
  func.func @transform_16(%arg0: i32) -> (i32, i32) {
    %c0_i32 = arith.constant 0 : i32
    %c0_i32_0 = arith.constant 0 : i32
    %c0_i32_1 = arith.constant 0 : i32
    return %c0_i32, %c0_i32_0 : i32, i32
  }
  func.func @transform_17(%arg0: i32) -> (i32, i32) {
    %c0_i32 = arith.constant 0 : i32
    %c0_i32_0 = arith.constant 0 : i32
    %c0_i32_1 = arith.constant 0 : i32
    return %c0_i32, %c0_i32_0 : i32, i32
  }
  func.func @transform_18(%arg0: i32) -> (i32, i32) {
    %c0_i32 = arith.constant 0 : i32
    %c0_i32_0 = arith.constant 0 : i32
    %c0_i32_1 = arith.constant 0 : i32
    return %c0_i32, %c0_i32_0 : i32, i32
  }
  func.func @transform_19(%arg0: i32) -> (i32, i32) {
    %c0_i32 = arith.constant 0 : i32
    %c0_i32_0 = arith.constant 0 : i32
    return %arg0, %c0_i32 : i32, i32
  }
}

</mosaic_0001>

<bundles_post_ra>
// kernel: tpu_custom_call.1
= control target key start
LH: loop header
LB: loop body
LE: loop exit
PB: predicated region body
PF: predicated region fallthrough
CT: control target
= control target key end

     0   :  { %s8577_s0 = inlined_call_operand.vmem [shape: bf16[128,2048], index: 0, kind: input, shape index: {}]   ;;  %s8578_s1 = inlined_call_operand.hbm [shape: bf16[2048,128], index: 1, kind: input, shape index: {}]   ;;  %s8579_s2 = inlined_call_operand.vmem [shape: f32[1,1,128], index: 2, kind: input, shape index: {}]   ;;  %s8580_s3 = inlined_call_operand.vmem [shape: f32[1,1,128], index: 3, kind: input, shape index: {}]   ;;  %s8581_s4 = inlined_call_operand.vmem [shape: f32[1,1,128], index: 4, kind: input, shape index: {}]   ;;  %s8582_s5 = inlined_call_operand.vmem [shape: bf16[1024,216], index: 5, kind: input, shape index: {}]   ;;  %s8583_s6 = inlined_call_operand.vmem [shape: f32[1,216], index: 6, kind: input, shape index: {}]   ;;  %s8584_s7 = inlined_call_operand.vmem [shape: f32[1,216], index: 7, kind: input, shape index: {}]   ;;  %s8585_s8 = inlined_call_operand.vmem [shape: f32[1,216], index: 8, kind: input, shape index: {}]   ;;  %s8586_s9 = inlined_call_operand.vmem [shape: bf16[216,32], index: 9, kind: input, shape index: {}]   ;;  %s8587_s10 = inlined_call_operand.vmem [shape: f32[1,32], index: 10, kind: input, shape index: {}]   ;;  %s8588_s11 = inlined_call_operand.vmem [shape: f32[1,32], index: 11, kind: input, shape index: {}]   ;;  %s8589_s12 = inlined_call_operand.vmem [shape: f32[1,32], index: 12, kind: input, shape index: {}]   ;;  %s8590_s13 = inlined_call_operand.vmem [shape: bf16[32,256], index: 13, kind: input, shape index: {}]   ;;  %s8591_s14 = inlined_call_operand.vmem [shape: f32[1,256], index: 14, kind: input, shape index: {}]   ;;  %s8592_s15 = inlined_call_operand.vmem [shape: f32[1,256], index: 15, kind: input, shape index: {}]   ;;  %s8593_s16 = inlined_call_operand.vmem [shape: f32[1,256], index: 16, kind: input, shape index: {}]   ;;  %s8594_s17 = inlined_call_operand.vmem [shape: bf16[256,128], index: 17, kind: input, shape index: {}]   ;;  %s8595_s18 = inlined_call_operand.vmem [shape: f32[1,128], index: 18, kind: input, shape index: {}]   ;;  %s8596_s19 = inlined_call_operand.hbm [shape: f32[16,128], index: 19, kind: output, shape index: {}]  }
   0x1   :  { %8602 = sst [smem:[#allocation14_spill]] %s8577_s0 }
   0x2   :  { %8603 = sst [smem:[#allocation15_spill]] %s8578_s1 }
   0x3   :  { %8604 = sst [smem:[#allocation16_spill]] %s8579_s2 }
   0x4   :  { %8605 = sst [smem:[#allocation17_spill]] %s8580_s3 }
   0x5   :  { %8606 = sst [smem:[#allocation18_spill]] %s8581_s4 }
   0x6   :  { %24 = vsyncpa [#allocation4], 0 }
   0x7   :  { %25 = vsyncpa [#allocation5], 0 }
   0x8   :  { %27 = vsyncpa [#allocation5 + $0x1], 0  ;;  %s6725_s0 = smov 0   ;;  %s6727_s30 = smov 0  }
   0x9   :  { %s6729_s20 = smov 0   ;;  %s6731_s21 = smov 0  }
   0xa LB: > { %8607 = sst [smem:[#allocation9_spill]] %s6608_s0  ;;  %s6746_s1 = sadd.s32 4294967295, %s6620_s21   ;;  %s6620_s21 = sphi %s6731_s21, %s8625_s21   ;;  %s6616_s20 = sphi %s6729_s20, %s8627_s20   ;;  %s6612_s30 = sphi %s6727_s30, %s8629_s30   ;;  %s6608_s0 = sphi %s6725_s0, %s8628_s0  }
   0xb   : > { %8608 = sst [smem:[#allocation10_spill]] %s6616_s20  ;;  %s4660_s22 = sadd.s32 4294967294, %s6620_s21  }
   0xc   : > { %s6750_s2 = sadd.s32 1, %s6620_s21   ;;  %s444_s23 = sadd.s32 1, %s6616_s20 }
   0xd   : > { %8609 = sst [smem:[#allocation11_spill]] %s6750_s2  ;;  %s441_s24 = ssub.s32 %s6620_s21, %s6750_s2 }
   0xe   : > { %p454_p0 = scmp.ne.s32.totalorder %s6616_s20, %s6612_s30  ;;  %p442_p1 = scmp.eq.s32.totalorder %s441_s24, 0 }
   0xf   : > { %p455_p2 = scmp.eq.s32.totalorder %s6746_s1, 1  ;;  %p460_p3 = scmp.ne.s32.totalorder %s6612_s30, %s6608_s0 }
  0x10   : > { %p461_p4 = scmp.eq.s32.totalorder %s4660_s22, 1  ;;  %p4661_p7 = scmp.ge.s32.totalorder %s6620_s21, 1 }
  0x11   : > { %s6761_s25 = scalar_select %p442_p1, %s6616_s20, %s444_s23  }
  0x12   : > { %p6763_p5 = por %p455_p2, %p454_p0  ;;  %p6767_p6 = por %p461_p4, %p460_p3 }
  0x13   : > { %8610 = sst [smem:[#allocation12_spill]] %s6761_s25  ;;  %p468_p8 = scmp.lt.s32.totalorder %s6620_s21, 3 }
  0x14   : > { %s8612_s26 = scalar_select %p6767_p6, 1, 0 }
  0x15   : > { %p6457_p9 = scmp.eq.s32.totalorder %s6746_s1, 0  ;;  %p469_p10 = pnand %p4661_p7, %p468_p8 }
  0x16   : > { %8613 = sst [smem:[#allocation13_spill]] %s8612_s26  ;;  %s6622_s22 = smov [#allocation3]  }
  0x17   : > { %s8614_s29 = sld [smem:[#allocation15_spill]]  ;;  %p6449_p11 = pneg %p469_p10 }
  0x18   : > { %s481_s23 = sshll.u32 %s6622_s22, 4  ;;  %s6623_s25 = smov 64   ;;  %s482_s23 = int_to_ptr.vmem [resolvable:$true] %s481_s23 }
  0x19   : > { %p6450_p12 = pnand %p6457_p9, %p6449_p11  ;;  %s6624_s20 = smov 4  }
  0x1a   : > { %558 = sbr.rel (%p469_p10) target bundleno = 1714 (0x6b2), region = 96 }
  0x1d   : > { %s479_s24 = sshll.u32 %s8614_s29, 4  ;;  %s480_s24 = int_to_ptr.hbm [resolvable:$true] %s479_s24 }
  0x1e   : > { %6452 = dma.hbm_to_vmem [thread:$0]  (!%p6450_p12), %s480_s24, 16384, %s482_s23, [#allocation4], %s6623_s25, %s6623_s25, %s6624_s20  }
  0x1f   : > { %6599 = dma.done.wait (%p6457_p9), [#allocation4], 16384  }
  0x20   : > { %6601 = vsyncadd (%p6457_p9), [#allocation4], 4294950912  ;;  %v6161_v0 = vld [vmem:[#allocation3 + $0x38] sm:$0xff]  ;;  %v6160_v4 = vld [vmem:[#allocation3 + $0x30] sm:$0xff]  ;;  %s6784_s20 = sshll.u32 %s6746_s1, 3  ;;  %s8615_s29 = sld [smem:[#allocation14_spill]] }
  0x21   : > { %v6169_v1 = vld [vmem:[#allocation3 + $0x78] sm:$0xff]  ;;  %2032 = vmatpush.bf16.msra.mxu0 %v6161_v0  ;;  %v6168_v5 = vld [vmem:[#allocation3 + $0x70] sm:$0xff]  ;;  %v6159_v8 = vld [vmem:[#allocation3 + $0x28] sm:$0xff]  ;;  %p617_p13 = scmp.lt.s32.totalorder %s6784_s20, 15  ;;  %s8617_s23 = sld [smem:[#allocation17_spill]] }
  0x22   : > { %v6177_v2 = vld [vmem:[#allocation3 + $0xb8] sm:$0xff]  ;;  %2061 = vmatpush.bf16.msra.mxu1 %v6169_v1  ;;  %v6176_v6 = vld [vmem:[#allocation3 + $0xb0] sm:$0xff]  ;;  %v6167_v9 = vld [vmem:[#allocation3 + $0x68] sm:$0xff]  ;;  %s8618_s4 = sld [smem:[#allocation18_spill]]  ;;  %s4584_s26 = scalar_lea.hbm %s8596_s19, %s6784_s20 }
  0x23   : > { %v6185_v3 = vld [vmem:[#allocation3 + $0xf8] sm:$0xff]  ;;  %2090 = vmatpush.bf16.msra.mxu2 %v6177_v2  ;;  %v6184_v7 = vld [vmem:[#allocation3 + $0xf0] sm:$0xff]  ;;  %v6175_v10 = vld [vmem:[#allocation3 + $0xa8] sm:$0xff]  ;;  %s618_s1 = scalar_select %p617_p13, %s6784_s20, 15 }
  0x24   : > { %2119 = vmatpush.bf16.msra.mxu3 %v6185_v3  ;;  %v6183_v11 = vld [vmem:[#allocation3 + $0xe8] sm:$0xff]  ;;  %v6158_v12 = vld [vmem:[#allocation3 + $0x20] sm:$0xff]  ;;  %v6157_v16 = vld [vmem:[#allocation3 + $0x18] sm:$0xff]  ;;  %s6574_s0 = scalar_lea.hbm %s8596_s19, 16 }
  0x25   : > { %2033 = vmatpush.bf16.msra.mxu0 %v6160_v4  ;;  %v6166_v13 = vld [vmem:[#allocation3 + $0x60] sm:$0xff]  ;;  %v6165_v17 = vld [vmem:[#allocation3 + $0x58] sm:$0xff]  ;;  %v6156_v20 = vld [vmem:[#allocation3 + $0x10] sm:$0xff]  ;;  %s6089_s25 = sshll.u32 %s618_s1, 6  ;;  %s8616_s1 = sld [smem:[#allocation16_spill]] }
  0x26   : > { %2062 = vmatpush.bf16.msra.mxu1 %v6168_v5  ;;  %v6174_v14 = vld [vmem:[#allocation3 + $0xa0] sm:$0xff]  ;;  %v6173_v18 = vld [vmem:[#allocation3 + $0x98] sm:$0xff]  ;;  %v6164_v21 = vld [vmem:[#allocation3 + $0x50] sm:$0xff]  ;;  %s6791_s24 = scalar_lea.vmem %s8615_s29, %s6089_s25  ;;  %s613_s29 = sand.u32 1, %s6612_s30  }
  0x27   : > { %2091 = vmatpush.bf16.msra.mxu2 %v6176_v6  ;;  %v6182_v15 = vld [vmem:[#allocation3 + $0xe0] sm:$0xff]  ;;  %v6181_v19 = vld [vmem:[#allocation3 + $0xd8] sm:$0xff]  ;;  %v6172_v22 = vld [vmem:[#allocation3 + $0x90] sm:$0xff]  ;;  %s4588_s25 = sshll.u32 %s4584_s26, 4  ;;  %s4574_s27 = scalar_lea.sflag [#allocation5], %s613_s29  ;;  %s4589_s25 = int_to_ptr.hbm [resolvable:$true] %s4588_s25 }
  0x28   : > { %2120 = vmatpush.bf16.msra.mxu3 %v6184_v7  ;;  %v6180_v23 = vld [vmem:[#allocation3 + $0xd0] sm:$0xff]  ;;  %v6155_v24 = vld [vmem:[#allocation3 + $0x8] sm:$0xff]  ;;  %v6154_v28 = vld [vmem:[#allocation3] sm:$0xff]  ;;  %s6568_s28 = sshra.s32 %s4589_s25, 4  ;;  %s6569_s28 = int_to_ptr.hbm [resolvable:$true] %s6568_s28 }
  0x29   : > { %2034 = vmatpush.bf16.msra.mxu0 %v6159_v8  ;;  %v6163_v25 = vld [vmem:[#allocation3 + $0x48] sm:$0xff]  ;;  %v6162_v29 = vld [vmem:[#allocation3 + $0x40] sm:$0xff]  ;;  %v6209_v40 = vld [vmem:[#allocation3 + $0x1b8] sm:$0xff]  ;;  %s6570_s22 = scalar_lea.hbm %s6569_s28, 8  ;;  %p6575_p3 = scmp.lt.s32.totalorder %s6569_s28, %s8596_s19 }
  0x2a   : > { %2063 = vmatpush.bf16.msra.mxu1 %v6167_v9  ;;  %v6171_v26 = vld [vmem:[#allocation3 + $0x88] sm:$0xff]  ;;  %v6170_v30 = vld [vmem:[#allocation3 + $0x80] sm:$0xff]  ;;  %v6193_v41 = vld [vmem:[#allocation3 + $0x138] sm:$0xff]  ;;  %p6571_p0 = scmp.ne.s32.totalorder %s6569_s28, %s6570_s22  ;;  %p6576_p4 = scmp.lt.s32.totalorder %s6574_s0, %s6570_s22 }
  0x2b   : > { %2092 = vmatpush.bf16.msra.mxu2 %v6175_v10  ;;  %v6179_v27 = vld [vmem:[#allocation3 + $0xc8] sm:$0xff]  ;;  %v6178_v31 = vld [vmem:[#allocation3 + $0xc0] sm:$0xff]  ;;  %v6217_v46 = vld [vmem:[#allocation3 + $0x1f8] sm:$0xff] }
  0x2c   : > { %2121 = vmatpush.bf16.msra.mxu3 %v6183_v11  ;;  %v4672_v32 = vld [vmem:[%s6791_s24] sm:$0xf]  ;;  %v6090_v34 = vld [vmem:[%s6791_s24 + $0x4] sm:$0xf]  ;;  %v4680_v36 = vld [vmem:[%s6791_s24 + $0x8] sm:$0xf]  ;;  %p6572_p1 = pnand %p6571_p0, %p6763_p5  ;;  %p6577_p7 = por %p6576_p4, %p6575_p3 }
  0x2d   : > { %2035 = vmatpush.bf16.msra.mxu0 %v6158_v12  ;;  %v6098_v33 = vld [vmem:[%s6791_s24 + $0x3c] sm:$0xf0]  ;;  %v4674_v35 = vld [vmem:[%s6791_s24 + $0x40] sm:$0xf0]  ;;  %v6099_v37 = vld [vmem:[%s6791_s24 + $0x44] sm:$0xf0] }
  0x2e   : > { %2064 = vmatpush.bf16.msra.mxu1 %v6166_v13  ;;  %v6091_v38 = vld [vmem:[%s6791_s24 + $0xc] sm:$0xf]  ;;  %v4673_v42 = vor.u32 %v6098_v33, %v4672_v32  ;;  %v4677_v43 = vor.u32 %v6090_v34, %v4674_v35  ;;  %v4681_v44 = vor.u32 %v6099_v37, %v4680_v36  ;;  %v6201_v47 = vld [vmem:[#allocation3 + $0x178] sm:$0xff]  ;;  %v6208_v48 = vld [vmem:[#allocation3 + $0x1b0] sm:$0xff]  ;;  %p6573_p2 = pneg %p6572_p1 }
  0x2f   : > { %2093 = vmatpush.bf16.msra.mxu2 %v6174_v14  ;;  %v4682_v39 = vld [vmem:[%s6791_s24 + $0x48] sm:$0xf0]  ;;  %v6192_v49 = vld [vmem:[#allocation3 + $0x130] sm:$0xff]  ;;  %v4736_v56 = vld [vmem:[%s6791_s24 + $0x80] sm:$0xf] }
  0x30   : > { %2122 = vmatpush.bf16.msra.mxu3 %v6182_v15  ;;  %v4685_v45 = vor.u32 %v6091_v38, %v4682_v39  ;;  %v6216_v50 = vld [vmem:[#allocation3 + $0x1f0] sm:$0xff]  ;;  %v6207_v52 = vld [vmem:[#allocation3 + $0x1a8] sm:$0xff]  ;;  %v6206_v57 = vld [vmem:[#allocation3 + $0x1a0] sm:$0xff]  ;;  %p6578_p8 = pnand %p6577_p7, %p6573_p2 }
  0x31   : > { %2036 = vmatpush.bf16.msra.mxu0 %v6157_v16  ;;  %v6200_v51 = vld [vmem:[#allocation3 + $0x170] sm:$0xff]  ;;  %v6191_v53 = vld [vmem:[#allocation3 + $0x128] sm:$0xff]  ;;  %v6190_v58 = vld [vmem:[#allocation3 + $0x120] sm:$0xff] }
  0x32   : > { %2065 = vmatpush.bf16.msra.mxu1 %v6165_v17  ;;  %v6215_v54 = vld [vmem:[#allocation3 + $0x1e8] sm:$0xff]  ;;  %v6114_v59 = vld [vmem:[%s6791_s24 + $0xbc] sm:$0xf0]  ;;  %v6106_v60 = vld [vmem:[%s6791_s24 + $0x84] sm:$0xf] }
  0x33   : > { %2094 = vmatpush.bf16.msra.mxu2 %v6173_v18  ;;  %v6199_v55 = vld [vmem:[#allocation3 + $0x168] sm:$0xff]  ;;  %v4738_v61 = vld [vmem:[%s6791_s24 + $0xc0] sm:$0xf0]  ;;  %v6205_v4 = vld [vmem:[#allocation3 + $0x198] sm:$0xff]  ;;  %v4737_v6 = vor.u32 %v6114_v59, %v4736_v56 }
  0x34   : > { %2123 = vmatpush.bf16.msra.mxu3 %v6181_v19  ;;  %v4744_v62 = vld [vmem:[%s6791_s24 + $0x88] sm:$0xf]  ;;  %v6107_v0 = vld [vmem:[%s6791_s24 + $0x8c] sm:$0xf]  ;;  %v6214_v2 = vld [vmem:[#allocation3 + $0x1e0] sm:$0xff]  ;;  %v4741_v7 = vor.u32 %v6106_v60, %v4738_v61 }
  0x35   : > { %2037 = vmatpush.bf16.msra.mxu0 %v6156_v20  ;;  %v6115_v63 = vld [vmem:[%s6791_s24 + $0xc4] sm:$0xf0]  ;;  %v4746_v1 = vld [vmem:[%s6791_s24 + $0xc8] sm:$0xf0]  ;;  %v6198_v3 = vld [vmem:[#allocation3 + $0x160] sm:$0xff] }
  0x36   : > { %2066 = vmatpush.bf16.msra.mxu1 %v6164_v21  ;;  %v6189_v5 = vld [vmem:[#allocation3 + $0x118] sm:$0xff]  ;;  %v4745_v8 = vor.u32 %v6115_v63, %v4744_v62  ;;  %v4749_v9 = vor.u32 %v6107_v0, %v4746_v1  ;;  %v6204_v12 = vld [vmem:[#allocation3 + $0x190] sm:$0xff]  ;;  %v6187_v16 = vld [vmem:[#allocation3 + $0x108] sm:$0xff] }
  0x37   : > { %2095 = vmatpush.bf16.msra.mxu2 %v6172_v22  ;;  %v6213_v10 = vld [vmem:[#allocation3 + $0x1d8] sm:$0xff]  ;;  %v6188_v13 = vld [vmem:[#allocation3 + $0x110] sm:$0xff]  ;;  %v6203_v17 = vld [vmem:[#allocation3 + $0x188] sm:$0xff] }
  0x38   : > { %2124 = vmatpush.bf16.msra.mxu3 %v6180_v23  ;;  %v6197_v11 = vld [vmem:[#allocation3 + $0x158] sm:$0xff]  ;;  %v6196_v14 = vld [vmem:[#allocation3 + $0x150] sm:$0xff]  ;;  %v6195_v18 = vld [vmem:[#allocation3 + $0x148] sm:$0xff] }
  0x39   : > { %2038 = vmatpush.bf16.msra.mxu0 %v6155_v24  ;;  %v6212_v15 = vld [vmem:[#allocation3 + $0x1d0] sm:$0xff]  ;;  %v6211_v19 = vld [vmem:[#allocation3 + $0x1c8] sm:$0xff]  ;;  %v4800_v20 = vld [vmem:[%s6791_s24 + $0x100] sm:$0xf] }
  0x3a   : > { %2067 = vmatpush.bf16.msra.mxu1 %v6163_v25  ;;  %v6186_v21 = vld [vmem:[#allocation3 + $0x100] sm:$0xff]  ;;  %v6241_v36 = vld [vmem:[#allocation3 + $0x2b8] sm:$0xff]  ;;  %v6239_v56 = vld [vmem:[#allocation3 + $0x2a8] sm:$0xff] }
  0x3b   : > { %2096 = vmatpush.bf16.msra.mxu2 %v6171_v26  ;;  %v6202_v22 = vld [vmem:[#allocation3 + $0x180] sm:$0xff]  ;;  %v4808_v26 = vld [vmem:[%s6791_s24 + $0x108] sm:$0xf]  ;;  %v6225_v37 = vld [vmem:[#allocation3 + $0x238] sm:$0xff] }
  0x3c   : > { %2125 = vmatpush.bf16.msra.mxu3 %v6179_v27  ;;  %v6130_v23 = vld [vmem:[%s6791_s24 + $0x13c] sm:$0xf0]  ;;  %v6122_v24 = vld [vmem:[%s6791_s24 + $0x104] sm:$0xf]  ;;  %v6131_v27 = vld [vmem:[%s6791_s24 + $0x144] sm:$0xf0] }
  0x3d   : > { %2039 = vmatpush.bf16.msra.mxu0 %v6154_v28  ;;  %v4802_v25 = vld [vmem:[%s6791_s24 + $0x140] sm:$0xf0]  ;;  %v6123_v28 = vld [vmem:[%s6791_s24 + $0x10c] sm:$0xf]  ;;  %v4801_v32 = vor.u32 %v6130_v23, %v4800_v20  ;;  %v4809_v34 = vor.u32 %v6131_v27, %v4808_v26  ;;  %v6249_v38 = vld [vmem:[#allocation3 + $0x2f8] sm:$0xff] }
  0x3e   : > { %2068 = vmatpush.bf16.msra.mxu1 %v6162_v29  ;;  %v4810_v29 = vld [vmem:[%s6791_s24 + $0x148] sm:$0xf0]  ;;  %v4805_v33 = vor.u32 %v6122_v24, %v4802_v25  ;;  %v4864_v39 = vld [vmem:[%s6791_s24 + $0x180] sm:$0xf]  ;;  %v4688_v59 = vld [vmem:[%s6791_s24 + $0x10] sm:$0xf] }
  0x3f   : > { %2097 = vmatpush.bf16.msra.mxu2 %v6170_v30  ;;  %v6194_v30 = vld [vmem:[#allocation3 + $0x140] sm:$0xff]  ;;  %v4813_v35 = vor.u32 %v6123_v28, %v4810_v29  ;;  %v6100_v60 = vld [vmem:[%s6791_s24 + $0x4c] sm:$0xf0]  ;;  %v6092_v61 = vld [vmem:[%s6791_s24 + $0x14] sm:$0xf] }
  0x40   : > { %2126 = vmatpush.bf16.msra.mxu3 %v6178_v31  ;;  %2040 = vmatmul.bf16.vlgmr.msra.gmra.mxu0 %v4673_v42  ;;  %v6210_v31 = vld [vmem:[#allocation3 + $0x1c0] sm:$0xff]  ;;  %v4690_v62 = vld [vmem:[%s6791_s24 + $0x50] sm:$0xf0]  ;;  %v4696_v63 = vld [vmem:[%s6791_s24 + $0x18] sm:$0xf] }
  0x41   : > { %2148 = vmatpush.bf16.msrb.mxu0 %v6193_v41  ;;  %2069 = vmatmul.bf16.vlgmr.msra.gmra.mxu1 %v4677_v43  ;;  %v6138_v41 = vld [vmem:[%s6791_s24 + $0x184] sm:$0xf]  ;;  %v4872_v43 = vld [vmem:[%s6791_s24 + $0x188] sm:$0xf]  ;;  %v6101_v0 = vld [vmem:[%s6791_s24 + $0x54] sm:$0xf0] }
  0x42   : > { %2098 = vmatmul.bf16.vlgmr.msra.gmra.mxu2 %v4681_v44  ;;  %2177 = vmatpush.bf16.msrb.mxu1 %v6201_v47  ;;  %v4866_v42 = vld [vmem:[%s6791_s24 + $0x1c0] sm:$0xf0]  ;;  %v6147_v44 = vld [vmem:[%s6791_s24 + $0x1c4] sm:$0xf0]  ;;  %v6093_v1 = vld [vmem:[%s6791_s24 + $0x1c] sm:$0xf] }
  0x43   : > { %2206 = vmatpush.bf16.msrb.mxu2 %v6209_v40  ;;  %2127 = vmatmul.bf16.vlgmr.msra.gmra.mxu3 %v4685_v45  ;;  %v6146_v40 = vld [vmem:[%s6791_s24 + $0x1bc] sm:$0xf0]  ;;  %v6139_v45 = vld [vmem:[%s6791_s24 + $0x18c] sm:$0xf]  ;;  %v6117_v20 = vld [vmem:[%s6791_s24 + $0xd4] sm:$0xf0] }
  0x44   : > { %2235 = vmatpush.bf16.msrb.mxu3 %v6217_v46  ;;  %v4874_v46 = vld [vmem:[%s6791_s24 + $0x1c8] sm:$0xf0]  ;;  %v4865_v47 = vor.u32 %v6146_v40, %v4864_v39  ;;  %v6229_v27 = vld [vmem:[#allocation3 + $0x258] sm:$0xff]  ;;  %v6236_v28 = vld [vmem:[#allocation3 + $0x290] sm:$0xff] }
  0x45   : > { %2149 = vmatpush.bf16.msrb.mxu0 %v6192_v49  ;;  %v4873_v49 = vor.u32 %v6147_v44, %v4872_v43  ;;  %v6220_v29 = vld [vmem:[#allocation3 + $0x210] sm:$0xff]  ;;  %v4824_v40 = vld [vmem:[%s6791_s24 + $0x118] sm:$0xf]  ;;  %v4826_v43 = vld [vmem:[%s6791_s24 + $0x158] sm:$0xf0] }
  0x46   : > { %2178 = vmatpush.bf16.msrb.mxu1 %v6200_v51  ;;  %v6233_v51 = vld [vmem:[#allocation3 + $0x278] sm:$0xff]  ;;  %v4818_v39 = vld [vmem:[%s6791_s24 + $0x150] sm:$0xf0] }
  0x47   : > { %2207 = vmatpush.bf16.msrb.mxu2 %v6208_v48  ;;  %v4869_v48 = vor.u32 %v6138_v41, %v4866_v42  ;;  %v6133_v41 = vld [vmem:[%s6791_s24 + $0x154] sm:$0xf0]  ;;  %v6125_v42 = vld [vmem:[%s6791_s24 + $0x11c] sm:$0xf] }
  0x48   : > { %2236 = vmatpush.bf16.msrb.mxu3 %v6216_v50  ;;  %v4877_v50 = vor.u32 %v6139_v45, %v4874_v46  ;;  %v6218_v46 = vld [vmem:[#allocation3 + $0x200] sm:$0xff] }
  0x49   : > { %2150 = vmatpush.bf16.msrb.mxu0 %v6191_v53  ;;  %v6224_v53 = vld [vmem:[#allocation3 + $0x230] sm:$0xff] }
  0x4a   : > { %2179 = vmatpush.bf16.msrb.mxu1 %v6199_v55  ;;  %v6232_v55 = vld [vmem:[#allocation3 + $0x270] sm:$0xff] }
  0x4b   : > { %2208 = vmatpush.bf16.msrb.mxu2 %v6207_v52  ;;  %v6240_v52 = vld [vmem:[#allocation3 + $0x2b0] sm:$0xff] }
  0x4c   : > { %2237 = vmatpush.bf16.msrb.mxu3 %v6215_v54  ;;  %v6248_v54 = vld [vmem:[#allocation3 + $0x2f0] sm:$0xff] }
  0x4d   : > { %2151 = vmatpush.bf16.msrb.mxu0 %v6190_v58  ;;  %v6247_v58 = vld [vmem:[#allocation3 + $0x2e8] sm:$0xff] }
  0x4e   : > { %2180 = vmatpush.bf16.msrb.mxu1 %v6198_v3  ;;  %v4689_v3 = vor.u32 %v6100_v60, %v4688_v59  ;;  %v4890_v59 = vld [vmem:[%s6791_s24 + $0x1d8] sm:$0xf0] }
  0x4f   : > { %2209 = vmatpush.bf16.msrb.mxu2 %v6206_v57  ;;  %v6223_v57 = vld [vmem:[#allocation3 + $0x228] sm:$0xff] }
  0x50   : > { %2238 = vmatpush.bf16.msrb.mxu3 %v6214_v2  ;;  %2045 = vmatmul.bf16.gmra.mxu0 %v4737_v6  ;;  %v4698_v2 = vld [vmem:[%s6791_s24 + $0x58] sm:$0xf0] }
  0x51   : > { %2152 = vmatpush.bf16.msrb.mxu0 %v6189_v5  ;;  %2074 = vmatmul.bf16.gmra.mxu1 %v4741_v7  ;;  %v4697_v5 = vor.u32 %v6101_v0, %v4696_v63  ;;  %v4701_v6 = vor.u32 %v6093_v1, %v4698_v2  ;;  %v6231_v7 = vld [vmem:[#allocation3 + $0x268] sm:$0xff]  ;;  %v6273_v0 = vld [vmem:[#allocation3 + $0x3b8] sm:$0xff] }
  0x52   : > { %2103 = vmatmul.bf16.gmra.mxu2 %v4745_v8  ;;  %2181 = vmatpush.bf16.msrb.mxu1 %v6197_v11  ;;  %v6238_v8 = vld [vmem:[#allocation3 + $0x2a0] sm:$0xff]  ;;  %v6257_v1 = vld [vmem:[#allocation3 + $0x338] sm:$0xff] }
  0x53   : > { %2210 = vmatpush.bf16.msrb.mxu2 %v6205_v4  ;;  %2132 = vmatmul.bf16.gmra.mxu3 %v4749_v9  ;;  %v4693_v4 = vor.u32 %v6092_v61, %v4690_v62  ;;  %v6222_v9 = vld [vmem:[#allocation3 + $0x220] sm:$0xff]  ;;  %v6281_v2 = vld [vmem:[#allocation3 + $0x3f8] sm:$0xff] }
  0x54   : > { %2239 = vmatpush.bf16.msrb.mxu3 %v6213_v10  ;;  %v6246_v10 = vld [vmem:[#allocation3 + $0x2e0] sm:$0xff] }
  0x55   : > { %2153 = vmatpush.bf16.msrb.mxu0 %v6188_v13  ;;  %v6230_v11 = vld [vmem:[#allocation3 + $0x260] sm:$0xff]  ;;  %v6221_v13 = vld [vmem:[#allocation3 + $0x218] sm:$0xff] }
  0x56   : > { %2182 = vmatpush.bf16.msrb.mxu1 %v6196_v14  ;;  %v6245_v14 = vld [vmem:[#allocation3 + $0x2d8] sm:$0xff] }
  0x57   : > { %2211 = vmatpush.bf16.msrb.mxu2 %v6204_v12  ;;  %v6237_v12 = vld [vmem:[#allocation3 + $0x298] sm:$0xff] }
  0x58   : > { %2240 = vmatpush.bf16.msrb.mxu3 %v6212_v15  ;;  %v4752_v15 = vld [vmem:[%s6791_s24 + $0x90] sm:$0xf] }
  0x59   : > { %2154 = vmatpush.bf16.msrb.mxu0 %v6187_v16  ;;  %v6116_v16 = vld [vmem:[%s6791_s24 + $0xcc] sm:$0xf0] }
  0x5a   : > { %2183 = vmatpush.bf16.msrb.mxu1 %v6195_v18  ;;  %v4754_v18 = vld [vmem:[%s6791_s24 + $0xd0] sm:$0xf0]  ;;  %v4753_v23 = vor.u32 %v6116_v16, %v4752_v15  ;;  %v4714_v15 = vld [vmem:[%s6791_s24 + $0x68] sm:$0xf0] }
  0x5b   : > { %2212 = vmatpush.bf16.msrb.mxu2 %v6203_v17  ;;  %v6108_v17 = vld [vmem:[%s6791_s24 + $0x94] sm:$0xf] }
  0x5c   : > { %2241 = vmatpush.bf16.msrb.mxu3 %v6211_v19  ;;  %v4760_v19 = vld [vmem:[%s6791_s24 + $0x98] sm:$0xf]  ;;  %v4757_v24 = vor.u32 %v6108_v17, %v4754_v18 }
  0x5d   : > { %2155 = vmatpush.bf16.msrb.mxu0 %v6186_v21  ;;  %v6109_v21 = vld [vmem:[%s6791_s24 + $0x9c] sm:$0xf]  ;;  %v4761_v25 = vor.u32 %v6117_v20, %v4760_v19 }
  0x5e   : > { %2184 = vmatpush.bf16.msrb.mxu1 %v6194_v30  ;;  %v6228_v30 = vld [vmem:[#allocation3 + $0x250] sm:$0xff] }
  0x5f   : > { %2213 = vmatpush.bf16.msrb.mxu2 %v6202_v22  ;;  %v4762_v22 = vld [vmem:[%s6791_s24 + $0xd8] sm:$0xf0] }
  0x60   : > { %2242 = vmatpush.bf16.msrb.mxu3 %v6210_v31  ;;  %2050 = vmatmul.bf16.gmra.mxu0 %v4801_v32  ;;  %v4765_v26 = vor.u32 %v6109_v21, %v4762_v22  ;;  %v6244_v31 = vld [vmem:[#allocation3 + $0x2d0] sm:$0xff]  ;;  %v6219_v32 = vld [vmem:[#allocation3 + $0x208] sm:$0xff] }
  0x61   : > { %2079 = vmatmul.bf16.gmra.mxu1 %v4805_v33  ;;  %2264 = vmatpush.bf16.msra.mxu0 %v6225_v37  ;;  %v6235_v33 = vld [vmem:[#allocation3 + $0x288] sm:$0xff]  ;;  %v6132_v37 = vld [vmem:[%s6791_s24 + $0x14c] sm:$0xf0] }
  0x62   : > { %2108 = vmatmul.bf16.gmra.mxu2 %v4809_v34  ;;  %2293 = vmatpush.bf16.msra.mxu1 %v6233_v51  ;;  %v6243_v34 = vld [vmem:[#allocation3 + $0x2c8] sm:$0xff]  ;;  %v6242_v51 = vld [vmem:[#allocation3 + $0x2c0] sm:$0xff] }
  0x63   : > { %2137 = vmatmul.bf16.gmra.mxu3 %v4813_v35  ;;  %2322 = vmatpush.bf16.msra.mxu2 %v6241_v36  ;;  %v6227_v35 = vld [vmem:[#allocation3 + $0x248] sm:$0xff]  ;;  %v4816_v36 = vld [vmem:[%s6791_s24 + $0x110] sm:$0xf] }
  0x64   : > { %2351 = vmatpush.bf16.msra.mxu3 %v6249_v38  ;;  %v6124_v38 = vld [vmem:[%s6791_s24 + $0x114] sm:$0xf]  ;;  %v4817_v44 = vor.u32 %v6132_v37, %v4816_v36  ;;  %v6278_v36 = vld [vmem:[#allocation3 + $0x3e0] sm:$0xff] }
  0x65   : > { %2265 = vmatpush.bf16.msra.mxu0 %v6224_v53  ;;  %v4821_v45 = vor.u32 %v6124_v38, %v4818_v39  ;;  %v6148_v53 = vld [vmem:[%s6791_s24 + $0x1cc] sm:$0xf0]  ;;  %v4768_v37 = vld [vmem:[%s6791_s24 + $0xa0] sm:$0xf] }
  0x66   : > { %2294 = vmatpush.bf16.msra.mxu1 %v6232_v55  ;;  %v4882_v55 = vld [vmem:[%s6791_s24 + $0x1d0] sm:$0xf0]  ;;  %v6118_v38 = vld [vmem:[%s6791_s24 + $0xdc] sm:$0xf0] }
  0x67   : > { %2323 = vmatpush.bf16.msra.mxu2 %v6240_v52  ;;  %v4880_v52 = vld [vmem:[%s6791_s24 + $0x190] sm:$0xf]  ;;  %v6262_v39 = vld [vmem:[#allocation3 + $0x360] sm:$0xff] }
  0x68   : > { %2352 = vmatpush.bf16.msra.mxu3 %v6248_v54  ;;  %v6140_v54 = vld [vmem:[%s6791_s24 + $0x194] sm:$0xf]  ;;  %v4881_v60 = vor.u32 %v6148_v53, %v4880_v52 }
  0x69   : > { %2266 = vmatpush.bf16.msra.mxu0 %v6223_v57  ;;  %v6149_v57 = vld [vmem:[%s6791_s24 + $0x1d4] sm:$0xf0]  ;;  %v4885_v61 = vor.u32 %v6140_v54, %v4882_v55 }
  0x6a   : > { %2295 = vmatpush.bf16.msra.mxu1 %v6231_v7  ;;  %v4704_v7 = vld [vmem:[%s6791_s24 + $0x20] sm:$0xf] }
  0x6b   : > { %2324 = vmatpush.bf16.msra.mxu2 %v6239_v56  ;;  %v4888_v56 = vld [vmem:[%s6791_s24 + $0x198] sm:$0xf] }
  0x6c   : > { %2353 = vmatpush.bf16.msra.mxu3 %v6247_v58  ;;  %v6141_v58 = vld [vmem:[%s6791_s24 + $0x19c] sm:$0xf]  ;;  %v4889_v62 = vor.u32 %v6149_v57, %v4888_v56 }
  0x6d   : > { %2267 = vmatpush.bf16.msra.mxu0 %v6222_v9  ;;  %v4893_v63 = vor.u32 %v6141_v58, %v4890_v59  ;;  %v6264_v9 = vld [vmem:[#allocation3 + $0x370] sm:$0xff]  ;;  %v6269_v57 = vld [vmem:[#allocation3 + $0x398] sm:$0xff] }
  0x6e   : > { %2296 = vmatpush.bf16.msra.mxu1 %v6230_v11  ;;  %v4706_v11 = vld [vmem:[%s6791_s24 + $0x60] sm:$0xf0]  ;;  %v6253_v58 = vld [vmem:[#allocation3 + $0x318] sm:$0xff] }
  0x6f   : > { %2325 = vmatpush.bf16.msra.mxu2 %v6238_v8  ;;  %v6102_v8 = vld [vmem:[%s6791_s24 + $0x5c] sm:$0xf0]  ;;  %v6277_v59 = vld [vmem:[#allocation3 + $0x3d8] sm:$0xff] }
  0x70   : > { %2055 = vmatmul.bf16.gmra.mxu0 %v4865_v47  ;;  %2354 = vmatpush.bf16.msra.mxu3 %v6246_v10  ;;  %v6226_v47 = vld [vmem:[#allocation3 + $0x240] sm:$0xff]  ;;  %v4705_v16 = vor.u32 %v6102_v8, %v4704_v7  ;;  %v6251_v8 = vld [vmem:[#allocation3 + $0x308] sm:$0xff] }
  0x71   : > { %2084 = vmatmul.bf16.gmra.mxu1 %v4869_v48  ;;  %2268 = vmatpush.bf16.msra.mxu0 %v6221_v13  ;;  %v6234_v48 = vld [vmem:[#allocation3 + $0x280] sm:$0xff]  ;;  %v6103_v13 = vld [vmem:[%s6791_s24 + $0x64] sm:$0xf0] }
  0x72   : > { %2113 = vmatmul.bf16.gmra.mxu2 %v4873_v49  ;;  %2297 = vmatpush.bf16.msra.mxu1 %v6229_v27  ;;  %v4825_v49 = vor.u32 %v6133_v41, %v4824_v40  ;;  %v6094_v10 = vld [vmem:[%s6791_s24 + $0x24] sm:$0xf] }
  0x73   : > { %2142 = vmatmul.bf16.gmra.mxu3 %v4877_v50  ;;  %2326 = vmatpush.bf16.msra.mxu2 %v6237_v12  ;;  %v4829_v50 = vor.u32 %v6125_v42, %v4826_v43  ;;  %v4712_v12 = vld [vmem:[%s6791_s24 + $0x28] sm:$0xf]  ;;  %v4709_v17 = vor.u32 %v6094_v10, %v4706_v11  ;;  %v6110_v40 = vld [vmem:[%s6791_s24 + $0xa4] sm:$0xf]  ;;  %v4832_v11 = vld [vmem:[%s6791_s24 + $0x120] sm:$0xf] }
  0x74   : > { %2355 = vmatpush.bf16.msra.mxu3 %v6245_v14  ;;  %v6095_v14 = vld [vmem:[%s6791_s24 + $0x2c] sm:$0xf]  ;;  %v4713_v20 = vor.u32 %v6103_v13, %v4712_v12  ;;  %v4770_v41 = vld [vmem:[%s6791_s24 + $0xe0] sm:$0xf0]  ;;  %v4776_v42 = vld [vmem:[%s6791_s24 + $0xa8] sm:$0xf] }
  0x75   : > { %2269 = vmatpush.bf16.msra.mxu0 %v6220_v29  ;;  %v4717_v21 = vor.u32 %v6095_v14, %v4714_v15  ;;  %v6119_v43 = vld [vmem:[%s6791_s24 + $0xe4] sm:$0xf0]  ;;  %v6134_v12 = vld [vmem:[%s6791_s24 + $0x15c] sm:$0xf0]  ;;  %v6126_v14 = vld [vmem:[%s6791_s24 + $0x124] sm:$0xf] }
  0x76   : > { %2298 = vmatpush.bf16.msra.mxu1 %v6228_v30  ;;  %v4777_v53 = vor.u32 %v6119_v43, %v4776_v42  ;;  %v6267_v10 = vld [vmem:[#allocation3 + $0x388] sm:$0xff]  ;;  %v4834_v15 = vld [vmem:[%s6791_s24 + $0x160] sm:$0xf0]  ;;  %v4896_v43 = vld [vmem:[%s6791_s24 + $0x1a0] sm:$0xf] }
  0x77   : > { %2327 = vmatpush.bf16.msra.mxu2 %v6236_v28  ;;  %v6275_v13 = vld [vmem:[#allocation3 + $0x3c8] sm:$0xff] }
  0x78   : > { %2356 = vmatpush.bf16.msra.mxu3 %v6244_v31 }
  0x79   : > { %2270 = vmatpush.bf16.msra.mxu0 %v6219_v32 }
  0x7a   : > { %2299 = vmatpush.bf16.msra.mxu1 %v6227_v35  ;;  %v6254_v35 = vld [vmem:[#allocation3 + $0x320] sm:$0xff] }
  0x7b   : > { %2328 = vmatpush.bf16.msra.mxu2 %v6235_v33 }
  0x7c   : > { %2357 = vmatpush.bf16.msra.mxu3 %v6243_v34  ;;  %v6270_v34 = vld [vmem:[#allocation3 + $0x3a0] sm:$0xff] }
  0x7d   : > { %2271 = vmatpush.bf16.msra.mxu0 %v6218_v46 }
  0x7e   : > { %2300 = vmatpush.bf16.msra.mxu1 %v6226_v47 }
  0x7f   : > { %2329 = vmatpush.bf16.msra.mxu2 %v6234_v48  ;;  %v4769_v48 = vor.u32 %v6118_v38, %v4768_v37 }
  0x80   : > { %2156 = vmatmul.bf16.vlgmr.msrb.gmra.mxu0 %v4689_v3  ;;  %2358 = vmatpush.bf16.msra.mxu3 %v6242_v51  ;;  %v6265_v3 = vld [vmem:[#allocation3 + $0x378] sm:$0xff] }
  0x81   : > { %2185 = vmatmul.bf16.vlgmr.msrb.gmra.mxu1 %v4693_v4  ;;  %2380 = vmatpush.bf16.msrb.mxu0 %v6257_v1  ;;  %v6272_v4 = vld [vmem:[#allocation3 + $0x3b0] sm:$0xff] }
  0x82   : > { %2214 = vmatmul.bf16.vlgmr.msrb.gmra.mxu2 %v4697_v5  ;;  %2409 = vmatpush.bf16.msrb.mxu1 %v6265_v3  ;;  %v6256_v5 = vld [vmem:[#allocation3 + $0x330] sm:$0xff] }
  0x83   : > { %2243 = vmatmul.bf16.vlgmr.msrb.gmra.mxu3 %v4701_v6  ;;  %2438 = vmatpush.bf16.msrb.mxu2 %v6273_v0  ;;  %v6280_v6 = vld [vmem:[#allocation3 + $0x3f0] sm:$0xff] }
  0x84   : > { %2467 = vmatpush.bf16.msrb.mxu3 %v6281_v2  ;;  %v6252_v0 = vld [vmem:[#allocation3 + $0x310] sm:$0xff] }
  0x85   : > { %2381 = vmatpush.bf16.msrb.mxu0 %v6256_v5  ;;  %v6260_v1 = vld [vmem:[#allocation3 + $0x350] sm:$0xff] }
  0x86   : > { %2410 = vmatpush.bf16.msrb.mxu1 %v6264_v9  ;;  %v6276_v5 = vld [vmem:[#allocation3 + $0x3d0] sm:$0xff]  ;;  %v6259_v9 = vld [vmem:[#allocation3 + $0x348] sm:$0xff] }
  0x87   : > { %2439 = vmatpush.bf16.msrb.mxu2 %v6272_v4 }
  0x88   : > { %2468 = vmatpush.bf16.msrb.mxu3 %v6280_v6 }
  0x90   : > { %2161 = vmatmul.bf16.gmra.mxu0 %v4753_v23  ;;  %v6271_v23 = vld [vmem:[#allocation3 + $0x3a8] sm:$0xff] }
  0x91   : > { %2190 = vmatmul.bf16.gmra.mxu1 %v4757_v24  ;;  %v6255_v24 = vld [vmem:[#allocation3 + $0x328] sm:$0xff]  ;;  %2440 = vmatpush.bf16.msrb.mxu2 %v6271_v23  ;;  %v4837_v23 = vor.u32 %v6126_v14, %v4834_v15  ;;  %v4730_v14 = vld [vmem:[%s6791_s24 + $0x78] sm:$0xf0] }
  0x92   : > { %2219 = vmatmul.bf16.gmra.mxu2 %v4761_v25  ;;  %v6279_v25 = vld [vmem:[#allocation3 + $0x3e8] sm:$0xff]  ;;  %2382 = vmatpush.bf16.msrb.mxu0 %v6255_v24  ;;  %v6250_v24 = vld [vmem:[#allocation3 + $0x300] sm:$0xff] }
  0x93   : > { %2248 = vmatmul.bf16.gmra.mxu3 %v4765_v26  ;;  %v6263_v26 = vld [vmem:[#allocation3 + $0x368] sm:$0xff] }
  0x94   : > { %2469 = vmatpush.bf16.msrb.mxu3 %v6279_v25  ;;  %2411 = vmatpush.bf16.msrb.mxu1 %v6263_v26  ;;  %v6258_v25 = vld [vmem:[#allocation3 + $0x340] sm:$0xff] }
  0x95   : > { %2441 = vmatpush.bf16.msrb.mxu2 %v6270_v34  ;;  %v6266_v26 = vld [vmem:[#allocation3 + $0x380] sm:$0xff] }
  0x96   : > { %2383 = vmatpush.bf16.msrb.mxu0 %v6254_v35 }
  0x98   : > { %2470 = vmatpush.bf16.msrb.mxu3 %v6278_v36  ;;  %2412 = vmatpush.bf16.msrb.mxu1 %v6262_v39 }
  0x99   : > { %2442 = vmatpush.bf16.msrb.mxu2 %v6269_v57 }
  0x9a   : > { %2384 = vmatpush.bf16.msrb.mxu0 %v6253_v58 }
  0x9c   : > { %2471 = vmatpush.bf16.msrb.mxu3 %v6277_v59 }
  0x9e   : > { %2385 = vmatpush.bf16.msrb.mxu0 %v6252_v0 }
  0xa0   : > { %2166 = vmatmul.bf16.gmra.mxu0 %v4817_v44  ;;  %v6111_v44 = vld [vmem:[%s6791_s24 + $0xac] sm:$0xf]  ;;  %2472 = vmatpush.bf16.msrb.mxu3 %v6276_v5 }
  0xa1   : > { %2195 = vmatmul.bf16.gmra.mxu1 %v4821_v45  ;;  %v4778_v45 = vld [vmem:[%s6791_s24 + $0xe8] sm:$0xf0] }
  0xa2   : > { %2224 = vmatmul.bf16.gmra.mxu2 %v4825_v49  ;;  %v4773_v49 = vor.u32 %v6110_v40, %v4770_v41  ;;  %v4781_v54 = vor.u32 %v6111_v44, %v4778_v45  ;;  %2386 = vmatpush.bf16.msrb.mxu0 %v6251_v8  ;;  %v6150_v44 = vld [vmem:[%s6791_s24 + $0x1dc] sm:$0xf0]  ;;  %v6142_v45 = vld [vmem:[%s6791_s24 + $0x1a4] sm:$0xf]  ;;  %v6104_v8 = vld [vmem:[%s6791_s24 + $0x6c] sm:$0xf0] }
  0xa3   : > { %2253 = vmatmul.bf16.gmra.mxu3 %v4829_v50 }
  0xa4   : > { %2473 = vmatpush.bf16.msrb.mxu3 %v6275_v13  ;;  %v6097_v13 = vld [vmem:[%s6791_s24 + $0x3c] sm:$0xf] }
  0xa6   : > { %2387 = vmatpush.bf16.msrb.mxu0 %v6250_v24 }
  0xb0   : > { %2171 = vmatmul.bf16.gmra.mxu0 %v4881_v60  ;;  %v6261_v60 = vld [vmem:[#allocation3 + $0x358] sm:$0xff] }
  0xb1   : > { %2200 = vmatmul.bf16.gmra.mxu1 %v4885_v61 }
  0xb2   : > { %2229 = vmatmul.bf16.gmra.mxu2 %v4889_v62  ;;  %2413 = vmatpush.bf16.msrb.mxu1 %v6261_v60 }
  0xb3   : > { %2258 = vmatmul.bf16.gmra.mxu3 %v4893_v63  ;;  %v6268_v63 = vld [vmem:[#allocation3 + $0x390] sm:$0xff] }
  0xb4   : > { %2443 = vmatpush.bf16.msrb.mxu2 %v6268_v63 }
  0xb6   : > { %2414 = vmatpush.bf16.msrb.mxu1 %v6260_v1 }
  0xb8   : > { %2444 = vmatpush.bf16.msrb.mxu2 %v6267_v10  ;;  %v4722_v10 = vld [vmem:[%s6791_s24 + $0x70] sm:$0xf0] }
  0xba   : > { %2415 = vmatpush.bf16.msrb.mxu1 %v6259_v9  ;;  %v6096_v9 = vld [vmem:[%s6791_s24 + $0x34] sm:$0xf] }
  0xbc   : > { %2445 = vmatpush.bf16.msrb.mxu2 %v6266_v26 }
  0xbd   : > { %v2041_v18 = vpop.f32.mrf.mxu0 }
  0xbe   : > { %v2070_v19 = vpop.f32.mrf.mxu1  ;;  %2416 = vmatpush.bf16.msrb.mxu1 %v6258_v25 }
  0xbf   : > { %v2071_v22 = vadd.f32 %v2070_v19, %v2041_v18  ;;  %v6127_v18 = vld [vmem:[%s6791_s24 + $0x12c] sm:$0xf] }
  0xc0   : > { %2272 = vmatmul.bf16.vlgmr.msra.gmra.mxu0 %v4705_v16  ;;  %v4840_v16 = vld [vmem:[%s6791_s24 + $0x128] sm:$0xf]  ;;  %v4842_v19 = vld [vmem:[%s6791_s24 + $0x168] sm:$0xf0] }
  0xc1   : > { %2301 = vmatmul.bf16.vlgmr.msra.gmra.mxu1 %v4709_v17  ;;  %v6135_v17 = vld [vmem:[%s6791_s24 + $0x164] sm:$0xf0] }
  0xc2   : > { %2330 = vmatmul.bf16.vlgmr.msra.gmra.mxu2 %v4713_v20 }
  0xc3   : > { %2359 = vmatmul.bf16.vlgmr.msra.gmra.mxu3 %v4717_v21 }
  0xc5   : > { %v2099_v27 = vpop.f32.mrf.mxu2  ;;  %v2043_v30 = vpop.f32.mrf.mxu0 }
  0xc6   : > { %v2128_v28 = vpop.f32.mrf.mxu3  ;;  %v2100_v29 = vadd.f32 %v2099_v27, %v2071_v22  ;;  %v2072_v31 = vpop.f32.mrf.mxu1  ;;  %v4833_v22 = vor.u32 %v6134_v12, %v4832_v11  ;;  %v4728_v11 = vld [vmem:[%s6791_s24 + $0x38] sm:$0xf] }
  0xc7   : > { %v2073_v32 = vadd.f32 %v2072_v31, %v2043_v30  ;;  %v4841_v30 = vor.u32 %v6135_v17, %v4840_v16  ;;  %v4845_v31 = vor.u32 %v6127_v18, %v4842_v19  ;;  %v6105_v12 = vld [vmem:[%s6791_s24 + $0x74] sm:$0xf0]  ;;  %v4725_v18 = vor.u32 %v6096_v9, %v4722_v10 }
  0xc8   : > { %v6865_v33 = vadd.f32 %v2128_v28, %v2100_v29 }
  0xcd   : > { %v2101_v46 = vpop.f32.mrf.mxu2  ;;  %v2046_v51 = vpop.f32.mrf.mxu0 }
  0xce   : > { %v2130_v47 = vpop.f32.mrf.mxu3  ;;  %v2102_v50 = vadd.f32 %v2101_v46, %v2073_v32  ;;  %v2075_v52 = vpop.f32.mrf.mxu1  ;;  %v6274_v32 = vld [vmem:[#allocation3 + $0x3c0] sm:$0xff] }
  0xcf   : > { %v2076_v55 = vadd.f32 %v2075_v52, %v2046_v51  ;;  %2474 = vmatpush.bf16.msrb.mxu3 %v6274_v32  ;;  %v4898_v46 = vld [vmem:[%s6791_s24 + $0x1e0] sm:$0xf0]  ;;  %v4784_v32 = vld [vmem:[%s6791_s24 + $0xb0] sm:$0xf] }
  0xd0   : > { %v6875_v56 = vadd.f32 %v2130_v47, %v2102_v50  ;;  %2277 = vmatmul.bf16.gmra.mxu0 %v4769_v48  ;;  %v4904_v47 = vld [vmem:[%s6791_s24 + $0x1a8] sm:$0xf]  ;;  %v4906_v50 = vld [vmem:[%s6791_s24 + $0x1e8] sm:$0xf0] }
  0xd1   : > { %2306 = vmatmul.bf16.gmra.mxu1 %v4773_v49  ;;  %v6151_v48 = vld [vmem:[%s6791_s24 + $0x1e4] sm:$0xf0]  ;;  %v6143_v49 = vld [vmem:[%s6791_s24 + $0x1ac] sm:$0xf] }
  0xd2   : > { %2335 = vmatmul.bf16.gmra.mxu2 %v4777_v53  ;;  %v4897_v53 = vor.u32 %v6150_v44, %v4896_v43  ;;  %v4905_v59 = vor.u32 %v6151_v48, %v4904_v47  ;;  %v4909_v60 = vor.u32 %v6143_v49, %v4906_v50 }
  0xd3   : > { %2364 = vmatmul.bf16.gmra.mxu3 %v4781_v54  ;;  %v4901_v54 = vor.u32 %v6142_v45, %v4898_v46 }
  0xd5   : > { %v2104_v61 = vpop.f32.mrf.mxu2  ;;  %v2048_v3 = vpop.f32.mrf.mxu0 }
  0xd6   : > { %v2133_v62 = vpop.f32.mrf.mxu3  ;;  %v2105_v2 = vadd.f32 %v2104_v61, %v2076_v55  ;;  %v2077_v4 = vpop.f32.mrf.mxu1 }
  0xd7   : > { %v2078_v6 = vadd.f32 %v2077_v4, %v2048_v3 }
  0xd8   : > { %v6877_v7 = vadd.f32 %v2133_v62, %v2105_v2 }
  0xdd   : > { %v2106_v20 = vpop.f32.mrf.mxu2  ;;  %v2051_v28 = vpop.f32.mrf.mxu0 }
  0xde   : > { %v2135_v21 = vpop.f32.mrf.mxu3  ;;  %v2107_v27 = vadd.f32 %v2106_v20, %v2078_v6  ;;  %v2080_v29 = vpop.f32.mrf.mxu1  ;;  %v4720_v6 = vld [vmem:[%s6791_s24 + $0x30] sm:$0xf] }
  0xdf   : > { %v2081_v34 = vadd.f32 %v2080_v29, %v2051_v28  ;;  %v4721_v17 = vor.u32 %v6104_v8, %v4720_v6 }
  0xe0   : > { %v6887_v35 = vadd.f32 %v2135_v21, %v2107_v27  ;;  %2282 = vmatmul.bf16.gmra.mxu0 %v4833_v22  ;;  %v4729_v22 = vor.u32 %v6105_v12, %v4728_v11 }
  0xe1   : > { %2311 = vmatmul.bf16.gmra.mxu1 %v4837_v23  ;;  %v4733_v23 = vor.u32 %v6097_v13, %v4730_v14 }
  0xe2   : > { %2340 = vmatmul.bf16.gmra.mxu2 %v4841_v30 }
  0xe3   : > { %2369 = vmatmul.bf16.gmra.mxu3 %v4845_v31 }
  0xe5   : > { %v2109_v36 = vpop.f32.mrf.mxu2  ;;  %v2053_v39 = vpop.f32.mrf.mxu0 }
  0xe6   : > { %v2138_v37 = vpop.f32.mrf.mxu3  ;;  %v2110_v38 = vadd.f32 %v2109_v36, %v2081_v34  ;;  %v2082_v40 = vpop.f32.mrf.mxu1  ;;  %v6120_v34 = vld [vmem:[%s6791_s24 + $0xec] sm:$0xf0]  ;;  %v6112_v36 = vld [vmem:[%s6791_s24 + $0xb4] sm:$0xf] }
  0xe7   : > { %v2083_v41 = vadd.f32 %v2082_v40, %v2053_v39  ;;  %v6121_v39 = vld [vmem:[%s6791_s24 + $0xf4] sm:$0xf0]  ;;  %v6113_v40 = vld [vmem:[%s6791_s24 + $0xbc] sm:$0xf]  ;;  %v4785_v45 = vor.u32 %v6120_v34, %v4784_v32 }
  0xe8   : > { %v6889_v42 = vadd.f32 %v2138_v37, %v2110_v38  ;;  %v4786_v37 = vld [vmem:[%s6791_s24 + $0xf0] sm:$0xf0]  ;;  %v4792_v38 = vld [vmem:[%s6791_s24 + $0xb8] sm:$0xf] }
  0xe9   : > { %v4789_v46 = vor.u32 %v6112_v36, %v4786_v37  ;;  %v4793_v49 = vor.u32 %v6121_v39, %v4792_v38 }
  0xed   : > { %v2111_v51 = vpop.f32.mrf.mxu2  ;;  %v2056_v57 = vpop.f32.mrf.mxu0 }
  0xee   : > { %v2140_v52 = vpop.f32.mrf.mxu3  ;;  %v2112_v55 = vadd.f32 %v2111_v51, %v2083_v41  ;;  %v2085_v58 = vpop.f32.mrf.mxu1  ;;  %v4794_v41 = vld [vmem:[%s6791_s24 + $0xf8] sm:$0xf0] }
  0xef   : > { %v2086_v61 = vadd.f32 %v2085_v58, %v2056_v57  ;;  %v4797_v50 = vor.u32 %v6113_v40, %v4794_v41 }
  0xf0   : > { %v6899_v62 = vadd.f32 %v2140_v52, %v2112_v55  ;;  %2287 = vmatmul.bf16.gmra.mxu0 %v4897_v53 }
  0xf1   : > { %2316 = vmatmul.bf16.gmra.mxu1 %v4901_v54 }
  0xf2   : > { %2345 = vmatmul.bf16.gmra.mxu2 %v4905_v59 }
  0xf3   : > { %2374 = vmatmul.bf16.gmra.mxu3 %v4909_v60  ;;  %v4848_v60 = vld [vmem:[%s6791_s24 + $0x130] sm:$0xf] }
  0xf5   : > { %v2114_v63 = vpop.f32.mrf.mxu2  ;;  %v2058_v2 = vpop.f32.mrf.mxu0 }
  0xf6   : > { %v2143_v0 = vpop.f32.mrf.mxu3  ;;  %v2115_v1 = vadd.f32 %v2114_v63, %v2086_v61  ;;  %v2087_v3 = vpop.f32.mrf.mxu1  ;;  %v6128_v61 = vld [vmem:[%s6791_s24 + $0x134] sm:$0xf] }
  0xf7   : > { %v2088_v4 = vadd.f32 %v2087_v3, %v2058_v2  ;;  %v4850_v63 = vld [vmem:[%s6791_s24 + $0x170] sm:$0xf0]  ;;  %v6129_v2 = vld [vmem:[%s6791_s24 + $0x13c] sm:$0xf] }
  0xf8   : > { %v6901_v5 = vadd.f32 %v2143_v0, %v2115_v1  ;;  %v4856_v0 = vld [vmem:[%s6791_s24 + $0x138] sm:$0xf]  ;;  %v4858_v3 = vld [vmem:[%s6791_s24 + $0x178] sm:$0xf0]  ;;  %v4853_v9 = vor.u32 %v6128_v61, %v4850_v63 }
  0xf9   : > { %v6137_v1 = vld [vmem:[%s6791_s24 + $0x174] sm:$0xf0]  ;;  %v4861_v13 = vor.u32 %v6129_v2, %v4858_v3 }
  0xfa   : > { %v4857_v12 = vor.u32 %v6137_v1, %v4856_v0 }
  0xfd   : > { %v2116_v15 = vpop.f32.mrf.mxu2  ;;  %v2157_v20 = vpop.f32.mrf.mxu0 }
  0xfe   : > { %v2145_v16 = vpop.f32.mrf.mxu3  ;;  %v2117_v19 = vadd.f32 %v2116_v15, %v2088_v4  ;;  %v2186_v21 = vpop.f32.mrf.mxu1  ;;  %v2158_v24 = vadd.f32 %v2157_v20, %v6865_v33 }
 0x100   : > { %v6912_v25 = vadd.f32 %v2145_v16, %v2117_v19  ;;  %v2187_v26 = vadd.f32 %v2186_v21, %v2158_v24  ;;  %2388 = vmatmul.bf16.vlgmr.msrb.gmra.mxu0 %v4721_v17  ;;  %v4914_v24 = vld [vmem:[%s6791_s24 + $0x1f0] sm:$0xf0] }
 0x101   : > { %2417 = vmatmul.bf16.vlgmr.msrb.gmra.mxu1 %v4725_v18 }
 0x102   : > { %2446 = vmatmul.bf16.vlgmr.msrb.gmra.mxu2 %v4729_v22  ;;  %v4912_v22 = vld [vmem:[%s6791_s24 + $0x1b0] sm:$0xf] }
 0x103   : > { %2475 = vmatmul.bf16.vlgmr.msrb.gmra.mxu3 %v4733_v23  ;;  %v6144_v23 = vld [vmem:[%s6791_s24 + $0x1b4] sm:$0xf] }
 0x104   : > { %v4917_v37 = vor.u32 %v6144_v23, %v4914_v24 }
 0x105   : > { %v2215_v27 = vpop.f32.mrf.mxu2  ;;  %v6914_v30 = vpop.f32.mrf.mxu0 }
 0x106   : > { %v2244_v28 = vpop.f32.mrf.mxu3  ;;  %v2216_v29 = vadd.f32 %v2215_v27, %v2187_v26  ;;  %v6916_v31 = vpop.f32.mrf.mxu1  ;;  %v4920_v26 = vld [vmem:[%s6791_s24 + $0x1b8] sm:$0xf] }
 0x107   : > { %v6153_v27 = vld [vmem:[%s6791_s24 + $0x1f4] sm:$0xf0] }
 0x108   : > { %v6918_v33 = vadd.f32 %v2244_v28, %v2216_v29  ;;  %v6145_v28 = vld [vmem:[%s6791_s24 + $0x1bc] sm:$0xf]  ;;  %v4921_v40 = vor.u32 %v6153_v27, %v4920_v26  ;;  %v2160_v27 = vadd.f32 %v6914_v30, %v6875_v56 }
 0x109   : > { %v4922_v29 = vld [vmem:[%s6791_s24 + $0x1f8] sm:$0xf0] }
 0x10a   : > { %v4925_v41 = vor.u32 %v6145_v28, %v4922_v29  ;;  %v2189_v28 = vadd.f32 %v6916_v31, %v2160_v27 }
 0x10d   : > { %v6928_v43 = vpop.f32.mrf.mxu2  ;;  %v2162_v47 = vpop.f32.mrf.mxu0 }
 0x10e   : > { %v6930_v44 = vpop.f32.mrf.mxu3  ;;  %v2191_v48 = vpop.f32.mrf.mxu1  ;;  %v2163_v51 = vadd.f32 %v2162_v47, %v6877_v7  ;;  %v6136_v7 = vld [vmem:[%s6791_s24 + $0x16c] sm:$0xf0] }
 0x10f   : > { %v4849_v8 = vor.u32 %v6136_v7, %v4848_v60 }
 0x110   : > { %v2192_v52 = vadd.f32 %v2191_v48, %v2163_v51  ;;  %2393 = vmatmul.bf16.gmra.mxu0 %v4785_v45 }
 0x111   : > { %2422 = vmatmul.bf16.gmra.mxu1 %v4789_v46 }
 0x112   : > { %2451 = vmatmul.bf16.gmra.mxu2 %v4793_v49 }
 0x113   : > { %2480 = vmatmul.bf16.gmra.mxu3 %v4797_v50 }
 0x115   : > { %v2220_v53 = vpop.f32.mrf.mxu2  ;;  %v6933_v57 = vpop.f32.mrf.mxu0 }
 0x116   : > { %v2249_v54 = vpop.f32.mrf.mxu3  ;;  %v2221_v55 = vadd.f32 %v2220_v53, %v2192_v52  ;;  %v6935_v58 = vpop.f32.mrf.mxu1 }
 0x118   : > { %v6937_v59 = vadd.f32 %v2249_v54, %v2221_v55 }
 0x11d   : > { %v6947_v4 = vpop.f32.mrf.mxu2  ;;  %v2167_v10 = vpop.f32.mrf.mxu0 }
 0x11e   : > { %v6949_v6 = vpop.f32.mrf.mxu3  ;;  %v2196_v11 = vpop.f32.mrf.mxu1  ;;  %v2168_v14 = vadd.f32 %v2167_v10, %v6889_v42  ;;  %v6152_v42 = vld [vmem:[%s6791_s24 + $0x1ec] sm:$0xf0]  ;;  %s4666_s24 = sshll.u32 %s613_s29, 3 }
 0x11f   : > { %v4913_v36 = vor.u32 %v6152_v42, %v4912_v22 }
 0x120   : > { %v2197_v15 = vadd.f32 %v2196_v11, %v2168_v14  ;;  %2398 = vmatmul.bf16.gmra.mxu0 %v4849_v8 }
 0x121   : > { %2427 = vmatmul.bf16.gmra.mxu1 %v4853_v9 }
 0x122   : > { %2456 = vmatmul.bf16.gmra.mxu2 %v4857_v12 }
 0x123   : > { %2485 = vmatmul.bf16.gmra.mxu3 %v4861_v13 }
 0x125   : > { %v2225_v16 = vpop.f32.mrf.mxu2  ;;  %v6952_v19 = vpop.f32.mrf.mxu0 }
 0x126   : > { %v2254_v17 = vpop.f32.mrf.mxu3  ;;  %v2226_v18 = vadd.f32 %v2225_v16, %v2197_v15  ;;  %v6954_v20 = vpop.f32.mrf.mxu1 }
 0x128   : > { %v6956_v21 = vadd.f32 %v2254_v17, %v2226_v18 }
 0x12d   : > { %v6966_v32 = vpop.f32.mrf.mxu2  ;;  %v2172_v38 = vpop.f32.mrf.mxu0 }
 0x12e   : > { %v6968_v34 = vpop.f32.mrf.mxu3  ;;  %v2201_v39 = vpop.f32.mrf.mxu1  ;;  %v2173_v45 = vadd.f32 %v2172_v38, %v6901_v5  ;;  %v2218_v38 = vadd.f32 %v6928_v43, %v2189_v28 }
 0x130   : > { %v2202_v46 = vadd.f32 %v2201_v39, %v2173_v45  ;;  %2403 = vmatmul.bf16.gmra.mxu0 %v4913_v36  ;;  %v2247_v45 = vadd.f32 %v6930_v44, %v2218_v38 }
 0x131   : > { %2432 = vmatmul.bf16.gmra.mxu1 %v4917_v37 }
 0x132   : > { %2461 = vmatmul.bf16.gmra.mxu2 %v4921_v40 }
 0x133   : > { %2490 = vmatmul.bf16.gmra.mxu3 %v4925_v41 }
 0x135   : > { %v2230_v47 = vpop.f32.mrf.mxu2  ;;  %v6971_v50 = vpop.f32.mrf.mxu0 }
 0x136   : > { %v2259_v48 = vpop.f32.mrf.mxu3  ;;  %v2231_v49 = vadd.f32 %v2230_v47, %v2202_v46  ;;  %v6973_v51 = vpop.f32.mrf.mxu1 }
 0x138   : > { %v6975_v52 = vadd.f32 %v2259_v48, %v2231_v49  ;;  %v2165_v49 = vadd.f32 %v6933_v57, %v6887_v35 }
 0x13a   : > { %v2194_v28 = vadd.f32 %v6935_v58, %v2165_v49 }
 0x13d   : > { %v6977_v53 = vpop.f32.mrf.mxu2  ;;  %v2273_v55 = vpop.f32.mrf.mxu0 }
 0x13e   : > { %v6979_v54 = vpop.f32.mrf.mxu3  ;;  %v2302_v5 = vpop.f32.mrf.mxu1  ;;  %v2274_v29 = vadd.f32 %v2273_v55, %v6918_v33 }
 0x140   : > { %v2303_v41 = vadd.f32 %v2302_v5, %v2274_v29  ;;  %v2223_v29 = vadd.f32 %v6947_v4, %v2194_v28 }
 0x142   : > { %v2252_v58 = vadd.f32 %v6949_v6, %v2223_v29  ;;  %v2170_v6 = vadd.f32 %v6952_v19, %v6899_v62 }
 0x144   : > { %v2199_v28 = vadd.f32 %v6954_v20, %v2170_v6 }
 0x145   : > { %v2331_v60 = vpop.f32.mrf.mxu2  ;;  %v2275_v61 = vpop.f32.mrf.mxu0 }
 0x146   : > { %v2360_v7 = vpop.f32.mrf.mxu3  ;;  %v2304_v63 = vpop.f32.mrf.mxu1  ;;  %v2332_v46 = vadd.f32 %v2331_v60, %v2303_v41  ;;  %v2276_v47 = vadd.f32 %v2275_v61, %v2247_v45 }
 0x148   : > { %v2361_v31 = vadd.f32 %v2360_v7, %v2332_v46  ;;  %v2305_v43 = vadd.f32 %v2304_v63, %v2276_v47  ;;  %v7033_v7 = vld [vmem:[%s8616_s1] ss:$0 sm:$0xff] }
 0x14d   : > { %v2333_v0 = vpop.f32.mrf.mxu2  ;;  %v2278_v2 = vpop.f32.mrf.mxu0 }
 0x14e   : > { %v2362_v1 = vpop.f32.mrf.mxu3  ;;  %v2307_v3 = vpop.f32.mrf.mxu1  ;;  %v2334_v27 = vadd.f32 %v2333_v0, %v2305_v43  ;;  %v2279_v5 = vadd.f32 %v2278_v2, %v6937_v59 }
 0x150   : > { %v2363_v38 = vadd.f32 %v2362_v1, %v2334_v27  ;;  %v2308_v63 = vadd.f32 %v2307_v3, %v2279_v5 }
 0x155   : > { %v2336_v8 = vpop.f32.mrf.mxu2  ;;  %v2280_v10 = vpop.f32.mrf.mxu0 }
 0x156   : > { %v2365_v9 = vpop.f32.mrf.mxu3  ;;  %v6981_v11 = vpop.f32.mrf.mxu1  ;;  %v2337_v59 = vadd.f32 %v2336_v8, %v2308_v63  ;;  %v2281_v46 = vadd.f32 %v2280_v10, %v2252_v58 }
 0x158   : > { %v2310_v8 = vadd.f32 %v6981_v11, %v2281_v46 }
 0x15d   : > { %v6983_v12 = vpop.f32.mrf.mxu2  ;;  %v6987_v14 = vpop.f32.mrf.mxu0 }
 0x15e   : > { %v6985_v13 = vpop.f32.mrf.mxu3  ;;  %v6989_v15 = vpop.f32.mrf.mxu1 }
 0x165   : > { %v6991_v16 = vpop.f32.mrf.mxu2  ;;  %v6995_v18 = vpop.f32.mrf.mxu0 }
 0x166   : > { %v6993_v17 = vpop.f32.mrf.mxu3  ;;  %v6997_v22 = vpop.f32.mrf.mxu1 }
 0x16d   : > { %v6999_v42 = vpop.f32.mrf.mxu2  ;;  %v7003_v24 = vpop.f32.mrf.mxu0 }
 0x16e   : > { %v7001_v23 = vpop.f32.mrf.mxu3  ;;  %v7005_v26 = vpop.f32.mrf.mxu1 }
 0x175   : > { %v7011_v36 = vpop.f32.mrf.mxu2  ;;  %v7016_v39 = vpop.f32.mrf.mxu0 }
 0x176   : > { %v7013_v37 = vpop.f32.mrf.mxu3  ;;  %v7018_v40 = vpop.f32.mrf.mxu1 }
 0x17d   : > { %v7021_v56 = vpop.f32.mrf.mxu2  ;;  %v2389_v33 = vpop.f32.mrf.mxu0 }
 0x17e   : > { %v7023_v30 = vpop.f32.mrf.mxu3  ;;  %v2418_v48 = vpop.f32.mrf.mxu1  ;;  %v2390_v55 = vadd.f32 %v2389_v33, %v2361_v31  ;;  %v2366_v33 = vadd.f32 %v2365_v9, %v2337_v59  ;;  %v2284_v9 = vadd.f32 %v6987_v14, %v6956_v21 }
 0x180   : > { %v2419_v44 = vadd.f32 %v2418_v48, %v2390_v55  ;;  %v2339_v55 = vadd.f32 %v6983_v12, %v2310_v8  ;;  %v2313_v20 = vadd.f32 %v6989_v15, %v2284_v9 }
 0x182   : > { %v2368_v12 = vadd.f32 %v6985_v13, %v2339_v55 }
 0x185   : > { %v2447_v60 = vpop.f32.mrf.mxu2  ;;  %v2391_v35 = vpop.f32.mrf.mxu0 }
 0x186   : > { %v2476_v61 = vpop.f32.mrf.mxu3  ;;  %v2448_v41 = vadd.f32 %v2447_v60, %v2419_v44  ;;  %v2420_v57 = vpop.f32.mrf.mxu1  ;;  %v2392_v45 = vadd.f32 %v2391_v35, %v2363_v38  ;;  %v2228_v44 = vadd.f32 %v6966_v32, %v2199_v28 }
 0x188   : > { %v2477_v0 = vadd.f32 %v2476_v61, %v2448_v41  ;;  %v2421_v4 = vadd.f32 %v2420_v57, %v2392_v45  ;;  %v2257_v14 = vadd.f32 %v6968_v34, %v2228_v44  ;;  %v2342_v41 = vadd.f32 %v6991_v16, %v2313_v20 }
 0x189   : > { %v2175_v34 = vadd.f32 %v6971_v50, %v6912_v25 }
 0x18a   : > { %v7037_v2 = vadd.f32 %v7033_v7, %v2477_v0  ;;  %v2286_v57 = vadd.f32 %v6995_v18, %v2257_v14  ;;  %v2371_v0 = vadd.f32 %v6993_v17, %v2342_v41 }
 0x18b   : > { %v2204_v17 = vadd.f32 %v6973_v51, %v2175_v34 }
 0x18c   : > { %2508 = vadd.xlane.f32.xlu1 %v7037_v2  ;;  %v2572_v1 = vmul.f32 %v7037_v2, %v7037_v2  ;;  %v2315_v16 = vadd.f32 %v6997_v22, %v2286_v57 }
 0x18d   : > { %v2449_v47 = vpop.f32.mrf.mxu2  ;;  %v2394_v3 = vpop.f32.mrf.mxu0  ;;  %v2233_v22 = vadd.f32 %v6977_v53, %v2204_v17 }
 0x18e   : > { %v2478_v31 = vpop.f32.mrf.mxu3  ;;  %v2450_v48 = vadd.f32 %v2449_v47, %v2421_v4  ;;  %2580 = vadd.xlane.f32.xlu2 %v2572_v1  ;;  %v2423_v49 = vpop.f32.mrf.mxu1  ;;  %v2395_v10 = vadd.f32 %v2394_v3, %v2366_v33  ;;  %v2344_v4 = vadd.f32 %v6999_v42, %v2315_v16  ;;  %v2289_v47 = vadd.f32 %v7003_v24, %v6975_v52 }
 0x18f   : > { %v2262_v8 = vadd.f32 %v6979_v54, %v2233_v22 }
 0x190   : > { %v2479_v43 = vadd.f32 %v2478_v31, %v2450_v48  ;;  %v2424_v5 = vadd.f32 %v2423_v49, %v2395_v10  ;;  %v2373_v42 = vadd.f32 %v7001_v23, %v2344_v4  ;;  %v2318_v49 = vadd.f32 %v7005_v26, %v2289_v47 }
 0x191   : > { %v2291_v53 = vadd.f32 %v7016_v39, %v2262_v8 }
 0x192   : > { %v7047_v27 = vadd.f32 %v7033_v7, %v2479_v43  ;;  %v2347_v52 = vadd.f32 %v7011_v36, %v2318_v49 }
 0x193   : > { %v2320_v36 = vadd.f32 %v7018_v40, %v2291_v53 }
 0x194   : > { %2510 = vadd.xlane.f32.xlu0 %v7047_v27  ;;  %v2573_v62 = vmul.f32 %v7047_v27, %v7047_v27  ;;  %v2376_v55 = vadd.f32 %v7013_v37, %v2347_v52 }
 0x195   : > { %v2452_v19 = vpop.f32.mrf.mxu2  ;;  %v2396_v61 = vpop.f32.mrf.mxu0 }
 0x196   : > { %v2481_v11 = vpop.f32.mrf.mxu3  ;;  %v2453_v60 = vadd.f32 %v2452_v19, %v2424_v5  ;;  %2582 = vadd.xlane.f32.xlu2 %v2573_v62  ;;  %v2425_v29 = vpop.f32.mrf.mxu1  ;;  %v2397_v21 = vadd.f32 %v2396_v61, %v2368_v12  ;;  %v2349_v19 = vadd.f32 %v7021_v56, %v2320_v36 }
 0x198   : > { %v2482_v38 = vadd.f32 %v2481_v11, %v2453_v60  ;;  %v2426_v32 = vadd.f32 %v2425_v29, %v2397_v21  ;;  %v2378_v60 = vadd.f32 %v7023_v30, %v2349_v19 }
 0x19a   : > { %v7061_v35 = vadd.f32 %v7033_v7, %v2482_v38 }
 0x19c   : > { %2512 = vadd.xlane.f32.xlu0 %v7061_v35  ;;  %v2574_v1 = vmul.f32 %v7061_v35, %v7061_v35 }
 0x19d   : > { %v2454_v13 = vpop.f32.mrf.mxu2  ;;  %v2399_v15 = vpop.f32.mrf.mxu0 }
 0x19e   : > { %v2483_v63 = vpop.f32.mrf.mxu3  ;;  %v2455_v45 = vadd.f32 %v2454_v13, %v2426_v32  ;;  %v2428_v58 = vpop.f32.mrf.mxu1  ;;  %v2400_v46 = vadd.f32 %v2399_v15, %v2371_v0 }
 0x1a0   : > { %v2484_v59 = vadd.f32 %v2483_v63, %v2455_v45  ;;  %v2429_v31 = vadd.f32 %v2428_v58, %v2400_v46 }
 0x1a2   : > { %v7071_v18 = vadd.f32 %v7033_v7, %v2484_v59 }
 0x1a4   : > { %2584 = vadd.xlane.f32.xlu0 %v2574_v1  ;;  %2514 = vadd.xlane.f32.xlu1 %v7071_v18  ;;  %v2575_v43 = vmul.f32 %v7071_v18, %v7071_v18 }
 0x1a5   : > { %v2457_v25 = vpop.f32.mrf.mxu2  ;;  %v2401_v48 = vpop.f32.mrf.mxu0 }
 0x1a6   : > { %v2486_v50 = vpop.f32.mrf.mxu3  ;;  %v2458_v33 = vadd.f32 %v2457_v25, %v2429_v31  ;;  %v2430_v3 = vpop.f32.mrf.mxu1  ;;  %v2402_v51 = vadd.f32 %v2401_v48, %v2373_v42 }
 0x1a8   : > { %v2487_v6 = vadd.f32 %v2486_v50, %v2458_v33  ;;  %v2431_v23 = vadd.f32 %v2430_v3, %v2402_v51 }
 0x1aa   : > { %v7085_v24 = vadd.f32 %v7033_v7, %v2487_v6 }
 0x1ac   : > { %2586 = vadd.xlane.f32.xlu0 %v2575_v43  ;;  %2516 = vadd.xlane.f32.xlu2 %v7085_v24  ;;  %v2576_v39 = vmul.f32 %v7085_v24, %v7085_v24 }
 0x1ad   : > { %v2459_v10 = vpop.f32.mrf.mxu2  ;;  %v2404_v54 = vpop.f32.mrf.mxu0 }
 0x1ae   : > { %v2488_v26 = vpop.f32.mrf.mxu3  ;;  %v2460_v28 = vadd.f32 %v2459_v10, %v2431_v23  ;;  %v2405_v5 = vadd.f32 %v2404_v54, %v2376_v55  ;;  %v2433_v62 = vpop.f32.mrf.mxu1 }
 0x1b0   : > { %v2489_v9 = vadd.f32 %v2488_v26, %v2460_v28  ;;  %v2434_v44 = vadd.f32 %v2433_v62, %v2405_v5 }
 0x1b2   : > { %v7095_v11 = vadd.f32 %v7033_v7, %v2489_v9 }
 0x1b4   : > { %2518 = vadd.xlane.f32.xlu1 %v7095_v11  ;;  %2588 = vadd.xlane.f32.xlu2 %v2576_v39  ;;  %v2577_v63 = vmul.f32 %v7095_v11, %v7095_v11 }
 0x1b5   : > { %v2462_v37 = vpop.f32.mrf.mxu2  ;;  %v2406_v61 = vpop.f32.mrf.mxu0 }
 0x1b6   : > { %v2491_v12 = vpop.f32.mrf.mxu3  ;;  %v2463_v40 = vadd.f32 %v2462_v37, %v2434_v44  ;;  %v2407_v20 = vadd.f32 %v2406_v61, %v2378_v60  ;;  %v2435_v38 = vpop.f32.mrf.mxu1 }
 0x1b8   : > { %v2492_v29 = vadd.f32 %v2491_v12, %v2463_v40  ;;  %v2436_v21 = vadd.f32 %v2435_v38, %v2407_v20 }
 0x1ba   : > { %v7102_v56 = vadd.f32 %v7033_v7, %v2492_v29 }
 0x1bc   : > { %2520 = vadd.xlane.f32.xlu1 %v7102_v56  ;;  %v2578_v14 = vmul.f32 %v7102_v56, %v7102_v56 }
 0x1bd   : > { %v2464_v41 = vpop.f32.mrf.mxu2 }
 0x1be   : > { %v2465_v57 = vadd.f32 %v2464_v41, %v2436_v21  ;;  %2592 = vadd.xlane.f32.xlu2 %v2578_v14  ;;  %v2493_v32 = vpop.f32.mrf.mxu3 }
 0x1c0   : > { %v2494_v13 = vadd.f32 %v2493_v32, %v2465_v57 }
 0x1c2   : > { %v7108_v30 = vadd.f32 %v7033_v7, %v2494_v13 }
 0x1c4   : > { %2522 = vadd.xlane.f32.xlu0 %v7108_v30  ;;  %2590 = vadd.xlane.f32.xlu1 %v2577_v63  ;;  %v2579_v0 = vmul.f32 %v7108_v30, %v7108_v30 }
 0x1cc   : > { %2594 = vadd.xlane.f32.xlu0 %v2579_v0 }
 0x1ff   : > { %v2509_v45 = vpop.xlane.xlu1 %2508 }
 0x200   : > { %v2524_v15 = vrot.slane %v2509_v45, 4 }
 0x201   : > { %v2581_v58 = vpop.xlane.xlu2 %2580 }
 0x202   : > { %v2525_v34 = vadd.f32 %v2524_v15, %v2509_v45  ;;  %v2596_v16 = vrot.slane %v2581_v58, 4 }
 0x204   : > { %v2526_v59 = vrot.slane %v2525_v34, 2  ;;  %v2597_v46 = vadd.f32 %v2596_v16, %v2581_v58 }
 0x206   : > { %v2527_v4 = vadd.f32 %v2526_v59, %v2525_v34  ;;  %v2598_v7 = vrot.slane %v2597_v46, 2 }
 0x207   : > { %v2511_v1 = vpop.xlane.xlu0 %2510 }
 0x208   : > { %v2528_v17 = vrot.slane %v2527_v4, 1  ;;  %v2599_v47 = vadd.f32 %v2598_v7, %v2597_v46  ;;  %v2530_v31 = vrot.slane %v2511_v1, 4 }
 0x209   : > { %v2583_v25 = vpop.xlane.xlu2 %2582 }
 0x20a   : > { %v2529_v50 = vadd.f32 %v2528_v17, %v2527_v4  ;;  %v2600_v22 = vrot.slane %v2599_v47, 1  ;;  %v2531_v42 = vadd.f32 %v2530_v31, %v2511_v1  ;;  %v2602_v33 = vrot.slane %v2583_v25, 4  ;;  %v5496_v17 = vld [vmem:[%s8582_s5 + $0x70] sm:$0xf] }
 0x20c   : > { %v7115_v48 = vmul.f32 0.0009765625, %v2529_v50  ;;  %v2601_v3 = vadd.f32 %v2600_v22, %v2599_v47  ;;  %v2532_v49 = vrot.slane %v2531_v42, 2  ;;  %v2603_v6 = vadd.f32 %v2602_v33, %v2583_v25  ;;  %v6297_v25 = vld [vmem:[%s8582_s5 + $0x74] sm:$0xf0]  ;;  %v5560_v50 = vld [vmem:[%s8582_s5 + $0xf0] sm:$0xf] }
 0x20e   : > { %v2660_v51 = vmul.f32 %v7115_v48, %v7115_v48  ;;  %v2652_v8 = vmul.f32 0.0009765625, %v2601_v3  ;;  %v2533_v52 = vadd.f32 %v2532_v49, %v2531_v42  ;;  %v2604_v43 = vrot.slane %v2603_v6, 2  ;;  %v6313_v49 = vld [vmem:[%s8582_s5 + $0xf4] sm:$0xf0] }
 0x20f   : > { %v2513_v53 = vpop.xlane.xlu0 %2512  ;;  %v5497_v3 = vor.u32 %v6297_v25, %v5496_v17  ;;  %v5680_v25 = vld [vmem:[%s8582_s5 + $0x1e0] sm:$0xf] }
 0x210   : > { %v2668_v23 = vsub.f32 %v2652_v8, %v2660_v51  ;;  %v2534_v10 = vrot.slane %v2533_v52, 1  ;;  %v2536_v26 = vrot.slane %v2513_v53, 4  ;;  %v2605_v55 = vadd.f32 %v2604_v43, %v2603_v6  ;;  %v5624_v6 = vld [vmem:[%s8582_s5 + $0x170] sm:$0xf]  ;;  %v6329_v51 = vld [vmem:[%s8582_s5 + $0x174] sm:$0xf0] }
 0x211   : > { %v5561_v43 = vor.u32 %v6313_v49, %v5560_v50  ;;  %3865 = vmatpush.bf16.msra.mxu0 %v5497_v3  ;;  %v6343_v50 = vld [vmem:[%s8582_s5 + $0x1e4] sm:$0xf0] }
 0x212   : > { %v2676_v28 = vmax.f32 %v2668_v23, 0.0  ;;  %v2535_v54 = vadd.f32 %v2534_v10, %v2533_v52  ;;  %v2537_v36 = vadd.f32 %v2536_v26, %v2513_v53  ;;  %v2606_v9 = vrot.slane %v2605_v55, 1  ;;  %v5688_v23 = vld [vmem:[%s8582_s5 + $0x1f0] sm:$0xf]  ;;  %v6345_v10 = vld [vmem:[%s8582_s5 + $0x1f4] sm:$0xf0] }
 0x213   : > { %v5625_v53 = vor.u32 %v6329_v51, %v5624_v6  ;;  %3878 = vmatpush.bf16.msra.mxu1 %v5561_v43 }
 0x214   : > { %v7119_v5 = vadd.f32 1e-05, %v2676_v28  ;;  %v7121_v62 = vmul.f32 0.0009765625, %v2535_v54  ;;  %v2538_v19 = vrot.slane %v2537_v36, 2  ;;  %v2607_v39 = vadd.f32 %v2606_v9, %v2605_v55  ;;  %v7168_v9 = vld [vmem:[%s8617_s23] ss:$0 sm:$0xff] }
 0x215   : > { %v5689_v54 = vor.u32 %v6345_v10, %v5688_v23  ;;  %3891 = vmatpush.bf16.msra.mxu2 %v5625_v53  ;;  %v5681_v53 = vor.u32 %v6343_v50, %v5680_v25  ;;  %v5480_v23 = vld [vmem:[%s8582_s5 + $0x50] sm:$0xf]  ;;  %v6293_v10 = vld [vmem:[%s8582_s5 + $0x54] sm:$0xf0]  ;;  %v6291_v25 = vld [vmem:[%s8582_s5 + $0x44] sm:$0xf0] }
 0x216   : > { %6502 = vrsqrt.f32 %v7119_v5  ;;  %v2661_v44 = vmul.f32 %v7121_v62, %v7121_v62  ;;  %v2653_v37 = vmul.f32 0.0009765625, %v2607_v39  ;;  %v2539_v12 = vadd.f32 %v2538_v19, %v2537_v36  ;;  %s615_s23 = scalar_lea.vmem [#allocation6], %s4666_s24 }
 0x217   : > { %v2585_v60 = vpop.xlane.xlu0 %2584  ;;  %v2515_v40 = vpop.xlane.xlu1 %2514  ;;  %vm2698_vm1 = vweird.f32 %v7119_v5  ;;  %3904 = vmatpush.bf16.msra.mxu3 %v5689_v54  ;;  %s4586_s1 = sshll.u32 %s615_s23, 4  ;;  %s4587_s1 = int_to_ptr.vmem [resolvable:$true] %s4586_s1 }
 0x218   : > { %v2608_v61 = vrot.slane %v2585_v60, 4  ;;  %v2542_v29 = vrot.slane %v2515_v40, 4  ;;  %v2669_v20 = vsub.f32 %v2653_v37, %v2661_v44  ;;  %v2540_v38 = vrot.slane %v2539_v12, 1 }
 0x219   : > { %v2772_v44 = vsub.f32 %v7037_v2, %v7115_v48  ;;  %v7188_v2 = vld [vmem:[%s8618_s4] ss:$0 sm:$0xff] }
 0x21a   : > { %v2609_v21 = vadd.f32 %v2608_v61, %v2585_v60  ;;  %v2543_v14 = vadd.f32 %v2542_v29, %v2515_v40  ;;  %v2677_v41 = vmax.f32 %v2669_v20, 0.0  ;;  %v2541_v32 = vadd.f32 %v2540_v38, %v2539_v12  ;;  %v6295_v60 = vld [vmem:[%s8582_s5 + $0x64] sm:$0xf0] }
 0x21b   : > { %3905 = vmatpush.bf16.msra.mxu3 %v5681_v53 }
 0x21c   : > { %v7126_v57 = vpop.eup %6502  ;;  %v2610_v13 = vrot.slane %v2609_v21, 2  ;;  %v2544_v63 = vrot.slane %v2543_v14, 2  ;;  %v7130_v45 = vadd.f32 1e-05, %v2677_v41  ;;  %v7134_v46 = vmul.f32 0.0009765625, %v2541_v32 }
 0x21d   : > { %v2693_v0 = vmul.f32 %v7126_v57, %v7119_v5  ;;  %vm2699_vm0 = vweird.f32 %v7126_v57  ;;  %v5488_v5 = vld [vmem:[%s8582_s5 + $0x60] sm:$0xf] }
 0x21e   : > { %v2611_v15 = vadd.f32 %v2610_v13, %v2609_v21  ;;  %v2545_v58 = vadd.f32 %v2544_v63, %v2543_v14  ;;  %6504 = vrsqrt.f32 %v7130_v45  ;;  %v2662_v26 = vmul.f32 %v7134_v46, %v7134_v46  ;;  %vm2700_vm2 = vmor %vm2698_vm1, %vm2699_vm0  ;;  %v5552_v13 = vld [vmem:[%s8582_s5 + $0xe0] sm:$0xf]  ;;  %v6311_v63 = vld [vmem:[%s8582_s5 + $0xe4] sm:$0xf0] }
 0x21f   : > { %v2694_v34 = vmul.f32 %v7126_v57, %v2693_v0  ;;  %v2587_v16 = vpop.xlane.xlu0 %2586  ;;  %v2517_v59 = vpop.xlane.xlu2 %2516  ;;  %vm2708_vm3 = vweird.f32 %v7130_v45 }
 0x220   : > { %v2612_v4 = vrot.slane %v2611_v15, 1  ;;  %v2546_v7 = vrot.slane %v2545_v58, 1  ;;  %v2614_v1 = vrot.slane %v2587_v16, 4  ;;  %v2548_v31 = vrot.slane %v2517_v59, 4 }
 0x221   : > { %v2695_v47 = vmul.f32 0.5, %v2694_v34 }
 0x222   : > { %v2613_v22 = vadd.f32 %v2612_v4, %v2611_v15  ;;  %v2547_v42 = vadd.f32 %v2546_v7, %v2545_v58  ;;  %v2615_v33 = vadd.f32 %v2614_v1, %v2587_v16  ;;  %v2549_v52 = vadd.f32 %v2548_v31, %v2517_v59  ;;  %v5616_v7 = vld [vmem:[%s8582_s5 + $0x160] sm:$0xf]  ;;  %v6327_v31 = vld [vmem:[%s8582_s5 + $0x164] sm:$0xf0] }
 0x223   : > { %v2696_v8 = vsub.f32 1.5, %v2695_v47  ;;  %v5489_v58 = vor.u32 %v6295_v60, %v5488_v5  ;;  %v5553_v47 = vor.u32 %v6311_v63, %v5552_v13  ;;  %v5617_v43 = vor.u32 %v6327_v31, %v5616_v7  ;;  %v6325_v13 = vld [vmem:[%s8582_s5 + $0x154] sm:$0xf0]  ;;  %v5472_v31 = vld [vmem:[%s8582_s5 + $0x40] sm:$0xf] }
 0x224   : > { %v2654_v55 = vmul.f32 0.0009765625, %v2613_v22  ;;  %v2616_v28 = vrot.slane %v2615_v33, 2  ;;  %v7163_v36 = vpop.eup %6504  ;;  %v2550_v39 = vrot.slane %v2549_v52, 2  ;;  %v7191_v40 = vmul.f32 0.0009765625, %v2547_v42 }
 0x225   : > { %v2697_v19 = vmul.f32 %v7126_v57, %v2696_v8  ;;  %v2703_v37 = vmul.f32 %v7163_v36, %v7130_v45  ;;  %vm2709_vm4 = vweird.f32 %v7163_v36  ;;  %3866 = vmatpush.bf16.msra.mxu0 %v5489_v58  ;;  %3879 = vmatpush.bf16.msra.mxu1 %v5553_v47  ;;  %v5481_v60 = vor.u32 %v6293_v10, %v5480_v23  ;;  %v5672_v58 = vld [vmem:[%s8582_s5 + $0x1d0] sm:$0xf] }
 0x226   : > { %v2670_v12 = vsub.f32 %v2654_v55, %v2662_v26  ;;  %v2617_v61 = vadd.f32 %v2616_v28, %v2615_v33  ;;  %v2551_v29 = vadd.f32 %v2550_v39, %v2549_v52  ;;  %v2663_v33 = vmul.f32 %v7191_v40, %v7191_v40  ;;  %vm2710_vm5 = vmor %vm2708_vm3, %vm2709_vm4  ;;  %v6309_v39 = vld [vmem:[%s8582_s5 + $0xd4] sm:$0xf0]  ;;  %3892 = vmatpush.bf16.msra.mxu2 %v5617_v43 }
 0x227   : > { %v2701_v48 = vsel %vm2700_vm2, %v7126_v57, %v2697_v19  ;;  %v2519_v20 = vpop.xlane.xlu1 %2518  ;;  %v2589_v38 = vpop.xlane.xlu2 %2588  ;;  %v2704_v14 = vmul.f32 %v7163_v36, %v2703_v37  ;;  %v2773_v26 = vsub.f32 %v7047_v27, %v7121_v62  ;;  %v5544_v19 = vld [vmem:[%s8582_s5 + $0xd0] sm:$0xf] }
 0x228   : > { %v2780_v21 = vmul.f32 %v2772_v44, %v2701_v48  ;;  %v2678_v41 = vmax.f32 %v2670_v12, 0.0  ;;  %v2554_v32 = vrot.slane %v2519_v20, 4  ;;  %v2618_v57 = vrot.slane %v2617_v61, 1 }
 0x229   : > { %v2552_v0 = vrot.slane %v2551_v29, 1  ;;  %v2620_v15 = vrot.slane %v2589_v38, 4  ;;  %v2705_v16 = vmul.f32 0.5, %v2704_v14  ;;  %3867 = vmatpush.bf16.msra.mxu0 %v5481_v60 }
 0x22a   : > { %v2792_v34 = vmul.f32 %v7168_v9, %v2780_v21  ;;  %v7201_v59 = vadd.f32 1e-05, %v2678_v41  ;;  %v2555_v4 = vadd.f32 %v2554_v32, %v2519_v20  ;;  %v2619_v1 = vadd.f32 %v2618_v57, %v2617_v61  ;;  %v5608_v32 = vld [vmem:[%s8582_s5 + $0x150] sm:$0xf] }
 0x22b   : > { %v2621_v17 = vadd.f32 %v2620_v15, %v2589_v38  ;;  %v2706_v42 = vsub.f32 1.5, %v2705_v16  ;;  %v2553_v49 = vadd.f32 %v2552_v0, %v2551_v29  ;;  %v5545_v38 = vor.u32 %v6309_v39, %v5544_v19 }
 0x22c   : > { %v2804_v22 = vadd.f32 %v7188_v2, %v2792_v34  ;;  %6506 = vrsqrt.f32 %v7201_v59  ;;  %v2655_v3 = vmul.f32 0.0009765625, %v2619_v1  ;;  %v2556_v6 = vrot.slane %v2555_v4, 2  ;;  %v6341_v34 = vld [vmem:[%s8582_s5 + $0x1d4] sm:$0xf0] }
 0x22d   : > { %v2622_v51 = vrot.slane %v2621_v17, 2  ;;  %v2707_v52 = vmul.f32 %v7163_v36, %v2706_v42  ;;  %v7240_v12 = vmul.f32 0.0009765625, %v2553_v49  ;;  %3880 = vmatpush.bf16.msra.mxu1 %v5545_v38  ;;  %vm2718_vm6 = vweird.f32 %v7201_v59 }
 0x22e   : > { %v2812_v8 = vmax.f32 %v2804_v22, 0.0  ;;  %v2671_v55 = vsub.f32 %v2655_v3, %v2663_v33  ;;  %v2557_v28 = vadd.f32 %v2556_v6, %v2555_v4  ;;  %v5609_v3 = vor.u32 %v6325_v13, %v5608_v32  ;;  %v5536_v6 = vld [vmem:[%s8582_s5 + $0xc0] sm:$0xf] }
 0x22f   : > { %v2521_v54 = vpop.xlane.xlu1 %2520  ;;  %v2711_v44 = vsel %vm2710_vm5, %v7163_v36, %v2707_v52  ;;  %v2623_v27 = vadd.f32 %v2622_v51, %v2621_v17  ;;  %v2774_v36 = vsub.f32 %v7061_v35, %v7134_v46  ;;  %v2664_v7 = vmul.f32 %v7240_v12, %v7240_v12  ;;  %v6307_v51 = vld [vmem:[%s8582_s5 + $0xc4] sm:$0xf0] }
 0x230   : > { %2820 = vst [vmem:[#allocation2] sm:$0xff] %v2812_v8  ;;  %v2560_v62 = vrot.slane %v2521_v54, 4  ;;  %v2781_v45 = vmul.f32 %v2773_v26, %v2711_v44  ;;  %v2679_v37 = vmax.f32 %v2671_v55, 0.0  ;;  %v2558_v63 = vrot.slane %v2557_v28, 1  ;;  %3893 = vmatpush.bf16.msra.mxu2 %v5609_v3 }
 0x231   : > { %v2593_v5 = vpop.xlane.xlu2 %2592  ;;  %v2624_v61 = vrot.slane %v2623_v27, 1  ;;  %v5673_v49 = vor.u32 %v6341_v34, %v5672_v58  ;;  %v5473_v19 = vor.u32 %v6291_v25, %v5472_v31  ;;  %v5537_v39 = vor.u32 %v6307_v51, %v5536_v6 }
 0x232   : > { %v7242_v48 = vpop.eup %6506  ;;  %v2561_v29 = vadd.f32 %v2560_v62, %v2521_v54  ;;  %v2632_v20 = vrot.slane %v2593_v5, 4  ;;  %v2793_v21 = vmul.f32 %v7168_v9, %v2781_v45  ;;  %v7249_v41 = vadd.f32 1e-05, %v2679_v37 }
 0x233   : > { %v2713_v14 = vmul.f32 %v7242_v48, %v7201_v59  ;;  %v2625_v57 = vadd.f32 %v2624_v61, %v2623_v27  ;;  %vm2719_vm7 = vweird.f32 %v7242_v48  ;;  %v2559_v8 = vadd.f32 %v2558_v63, %v2557_v28  ;;  %3906 = vmatpush.bf16.msra.mxu3 %v5673_v49  ;;  %3868 = vmatpush.bf16.msra.mxu0 %v5473_v19  ;;  %v5600_v59 = vld [vmem:[%s8582_s5 + $0x140] sm:$0xf]  ;;  %v6339_v63 = vld [vmem:[%s8582_s5 + $0x1c4] sm:$0xf0] }
 0x234   : > { %v2562_v0 = vrot.slane %v2561_v29, 2  ;;  %v2633_v15 = vadd.f32 %v2632_v20, %v2593_v5  ;;  %v2805_v16 = vadd.f32 %v7188_v2, %v2793_v21  ;;  %6508 = vrsqrt.f32 %v7249_v41  ;;  %vm2720_vm8 = vmor %vm2718_vm6, %vm2719_vm7  ;;  %3881 = vmatpush.bf16.msra.mxu1 %v5537_v39  ;;  %v6323_v21 = vld [vmem:[%s8582_s5 + $0x144] sm:$0xf0]  ;;  %v5456_v19 = vld [vmem:[%s8582_s5 + $0x20] sm:$0xf] }
 0x235   : > { %v2714_v4 = vmul.f32 %v7242_v48, %v2713_v14  ;;  %v2656_v1 = vmul.f32 0.0009765625, %v2625_v57  ;;  %vm2728_vm9 = vweird.f32 %v7249_v41  ;;  %v7307_v13 = vmul.f32 0.0009765625, %v2559_v8  ;;  %v5592_v8 = vld [vmem:[%s8582_s5 + $0x130] sm:$0xf]  ;;  %v6287_v39 = vld [vmem:[%s8582_s5 + $0x24] sm:$0xf0] }
 0x236   : > { %v2563_v17 = vadd.f32 %v2562_v0, %v2561_v29  ;;  %v2634_v47 = vrot.slane %v2633_v15, 2  ;;  %v2813_v50 = vmax.f32 %v2805_v16, 0.0  ;;  %v5464_v0 = vld [vmem:[%s8582_s5 + $0x30] sm:$0xf]  ;;  %v5601_v31 = vor.u32 %v6323_v21, %v5600_v59  ;;  %v7388_v21 = vld [vmem:[%s8582_s5 + $0x1a0] sm:$0xf] }
 0x237   : > { %v2715_v22 = vmul.f32 0.5, %v2714_v4  ;;  %v2523_v42 = vpop.xlane.xlu0 %2522  ;;  %v2591_v33 = vpop.xlane.xlu1 %2590  ;;  %v2672_v52 = vsub.f32 %v2656_v1, %v2664_v7  ;;  %v5528_v7 = vld [vmem:[%s8582_s5 + $0xb0] sm:$0xf]  ;;  %v6305_v1 = vld [vmem:[%s8582_s5 + $0xb4] sm:$0xf0] }
 0x238   : > { %v2564_v43 = vrot.slane %v2563_v17, 1  ;;  %2821 = vst [vmem:[#allocation2 + $0x8] sm:$0xff] %v2813_v50  ;;  %v2635_v23 = vadd.f32 %v2634_v47, %v2633_v15  ;;  %v2566_v10 = vrot.slane %v2523_v42, 4  ;;  %v2626_v26 = vrot.slane %v2591_v33, 4  ;;  %v6289_v15 = vld [vmem:[%s8582_s5 + $0x34] sm:$0xf0]  ;;  %3894 = vmatpush.bf16.msra.mxu2 %v5601_v31 }
 0x239   : > { %v2716_v53 = vsub.f32 1.5, %v2715_v22  ;;  %v2680_v55 = vmax.f32 %v2672_v52, 0.0  ;;  %v5465_v6 = vor.u32 %v6289_v15, %v5464_v0  ;;  %v5529_v51 = vor.u32 %v6305_v1, %v5528_v7  ;;  %v6321_v52 = vld [vmem:[%s8582_s5 + $0x134] sm:$0xf0]  ;;  %v7432_v31 = vld [vmem:[%s8582_s5] sm:$0xf] }
 0x23a   : > { %v2565_v54 = vadd.f32 %v2564_v43, %v2563_v17  ;;  %v7282_v44 = vpop.eup %6508  ;;  %v2636_v62 = vrot.slane %v2635_v23, 1  ;;  %v2567_v45 = vadd.f32 %v2566_v10, %v2523_v42  ;;  %v2627_v28 = vadd.f32 %v2626_v26, %v2591_v33 }
 0x23b   : > { %v2717_v27 = vmul.f32 %v7242_v48, %v2716_v53  ;;  %v2723_v37 = vmul.f32 %v7282_v44, %v7249_v41  ;;  %v7292_v5 = vadd.f32 1e-05, %v2680_v55  ;;  %vm2729_vm10 = vweird.f32 %v7282_v44  ;;  %v5656_v55 = vld [vmem:[%s8582_s5 + $0x1b0] sm:$0xf]  ;;  %3869 = vmatpush.bf16.msra.mxu0 %v5465_v6  ;;  %3882 = vmatpush.bf16.msra.mxu1 %v5529_v51  ;;  %v5584_v41 = vld [vmem:[%s8582_s5 + $0x120] sm:$0xf] }
 0x23c   : > { %v7294_v60 = vmul.f32 0.0009765625, %v2565_v54  ;;  %v2637_v29 = vadd.f32 %v2636_v62, %v2635_v23  ;;  %v2568_v20 = vrot.slane %v2567_v45, 2  ;;  %v2628_v38 = vrot.slane %v2627_v28, 2  ;;  %v6337_v54 = vld [vmem:[%s8582_s5 + $0x1b4] sm:$0xf0]  ;;  %vm7360_vm11 = vmor %vm2728_vm9, %vm2729_vm10 }
 0x23d   : > { %v2721_v61 = vsel %vm2720_vm8, %v7242_v48, %v2717_v27  ;;  %v2724_v32 = vmul.f32 %v7282_v44, %v2723_v37  ;;  %6510 = vrsqrt.f32 %v7292_v5  ;;  %v5664_v48 = vld [vmem:[%s8582_s5 + $0x1c0] sm:$0xf]  ;;  %v2775_v27 = vsub.f32 %v7071_v18, %v7191_v40  ;;  %v6303_v40 = vld [vmem:[%s8582_s5 + $0xa4] sm:$0xf0] }
 0x23e   : > { %v2782_v14 = vmul.f32 %v2774_v36, %v2721_v61  ;;  %v2666_v35 = vmul.f32 %v7294_v60, %v7294_v60  ;;  %v2658_v46 = vmul.f32 0.0009765625, %v2637_v29  ;;  %v2569_v36 = vadd.f32 %v2568_v20, %v2567_v45  ;;  %v5520_v18 = vld [vmem:[%s8582_s5 + $0xa0] sm:$0xf]  ;;  %v6319_v61 = vld [vmem:[%s8582_s5 + $0x124] sm:$0xf0] }
 0x23f   : > { %v2595_v57 = vpop.xlane.xlu0 %2594  ;;  %v2725_v34 = vmul.f32 0.5, %v2724_v32  ;;  %v2629_v16 = vadd.f32 %v2628_v38, %v2627_v28  ;;  %v5665_v25 = vor.u32 %v6339_v63, %v5664_v48  ;;  %v2665_v45 = vmul.f32 %v7307_v13, %v7307_v13  ;;  %v5448_v32 = vld [vmem:[%s8582_s5 + $0x10] sm:$0xf] }
 0x240   : > { %v2794_v58 = vmul.f32 %v7168_v9, %v2782_v14  ;;  %v2638_v4 = vrot.slane %v2595_v57, 4  ;;  %v2674_v17 = vsub.f32 %v2658_v46, %v2666_v35  ;;  %v2570_v47 = vrot.slane %v2569_v36, 1  ;;  %v6335_v14 = vld [vmem:[%s8582_s5 + $0x1a4] sm:$0xf0]  ;;  %v6285_v35 = vld [vmem:[%s8582_s5 + $0x14] sm:$0xf0] }
 0x241   : > { %v2726_v22 = vsub.f32 1.5, %v2725_v34  ;;  %v2630_v42 = vrot.slane %v2629_v16, 1  ;;  %3907 = vmatpush.bf16.msra.mxu3 %v5665_v25  ;;  %v5593_v59 = vor.u32 %v6321_v52, %v5592_v8  ;;  %v5512_v46 = vld [vmem:[%s8582_s5 + $0x90] sm:$0xf]  ;;  %v6317_v34 = vld [vmem:[%s8582_s5 + $0x114] sm:$0xf0]  ;;  %v5657_v7 = vor.u32 %v6337_v54, %v5656_v55 }
 0x242   : > { %v2806_v50 = vadd.f32 %v7188_v2, %v2794_v58  ;;  %v2639_v33 = vadd.f32 %v2638_v4, %v2595_v57  ;;  %v2682_v3 = vmax.f32 %v2674_v17, 0.0  ;;  %v2571_v49 = vadd.f32 %v2570_v47, %v2569_v36  ;;  %v6301_v36 = vld [vmem:[%s8582_s5 + $0x94] sm:$0xf0]  ;;  %v5576_v58 = vld [vmem:[%s8582_s5 + $0x110] sm:$0xf] }
 0x243   : > { %v7339_v43 = vpop.eup %6510  ;;  %v2727_v23 = vmul.f32 %v7282_v44, %v2726_v22  ;;  %v2631_v10 = vadd.f32 %v2630_v42, %v2629_v16  ;;  %3895 = vmatpush.bf16.msra.mxu2 %v5593_v59  ;;  %v5457_v1 = vor.u32 %v6287_v39, %v5456_v19  ;;  %v7422_v17 = vld [vmem:[%s8582_s5 + $0x190] sm:$0xf]  ;;  %v7427_v47 = vld [vmem:[%s8582_s5 + $0x194] sm:$0xf0]  ;;  %v5521_v22 = vor.u32 %v6303_v40, %v5520_v18  ;;  %v6299_v52 = vld [vmem:[%s8582_s5 + $0x84] sm:$0xf0] }
 0x244   : > { %v2814_v53 = vmax.f32 %v2806_v50, 0.0  ;;  %v2640_v26 = vrot.slane %v2639_v33, 2  ;;  %v2733_v28 = vmul.f32 %v7339_v43, %v7292_v5  ;;  %v7368_v37 = vadd.f32 1e-05, %v2682_v3  ;;  %v7440_v3 = vld [vmem:[%s8582_s5 + $0x80] sm:$0xf] }
 0x245   : > { %v2731_v29 = vsel %vm7360_vm11, %v7282_v44, %v2727_v23  ;;  %v2657_v20 = vmul.f32 0.0009765625, %v2631_v10  ;;  %v2776_v44 = vsub.f32 %v7085_v24, %v7240_v12  ;;  %vm2739_vm12 = vweird.f32 %v7339_v43  ;;  %3908 = vmatpush.bf16.msra.mxu3 %v5657_v7  ;;  %3870 = vmatpush.bf16.msra.mxu0 %v5457_v1  ;;  %v6315_v54 = vld [vmem:[%s8582_s5 + $0x104] sm:$0xf0] }
 0x246   : > { %2822 = vst [vmem:[#allocation2 + $0x10] sm:$0xff] %v2814_v53  ;;  %v2641_v38 = vadd.f32 %v2640_v26, %v2639_v33  ;;  %v2783_v48 = vmul.f32 %v2775_v27, %v2731_v29  ;;  %v2734_v63 = vmul.f32 %v7339_v43, %v2733_v28  ;;  %6512 = vrsqrt.f32 %v7368_v37  ;;  %v6283_v33 = vld [vmem:[%s8582_s5 + $0x4] sm:$0xf0]  ;;  %v5568_v53 = vld [vmem:[%s8582_s5 + $0x100] sm:$0xf]  ;;  %3883 = vmatpush.bf16.msra.mxu1 %v5521_v22 }
 0x247   : > { %v7410_v57 = vmul.f32 0.0009765625, %v2571_v49  ;;  %v2673_v0 = vsub.f32 %v2657_v20, %v2665_v45  ;;  %v5585_v42 = vor.u32 %v6319_v61, %v5584_v41  ;;  %v5649_v51 = vor.u32 %v6335_v14, %v7388_v21  ;;  %v5752_v45 = vld [vmem:[%s8582_s5 + $0x270] sm:$0xf]  ;;  %v6361_v28 = vld [vmem:[%s8582_s5 + $0x274] sm:$0xf0] }
 0x248   : > { %v2642_v15 = vrot.slane %v2641_v38, 1  ;;  %v2795_v16 = vmul.f32 %v7168_v9, %v2783_v48  ;;  %v2735_v4 = vmul.f32 0.5, %v2734_v63  ;;  %v5449_v8 = vor.u32 %v6285_v35, %v5448_v32  ;;  %v5632_v61 = vld [vmem:[%s8582_s5 + $0x180] sm:$0xf]  ;;  %v5816_v29 = vld [vmem:[%s8582_s5 + $0x2f0] sm:$0xf] }
 0x249   : > { %v2681_v25 = vmax.f32 %v2673_v0, 0.0  ;;  %3896 = vmatpush.bf16.msra.mxu2 %v5585_v42  ;;  %v5513_v26 = vor.u32 %v6301_v36, %v5512_v46  ;;  %v5577_v55 = vor.u32 %v6317_v34, %v5576_v58  ;;  %vm2738_vm13 = vweird.f32 %v7292_v5  ;;  %v6377_v20 = vld [vmem:[%s8582_s5 + $0x2f4] sm:$0xf0]  ;;  %3909 = vmatpush.bf16.msra.mxu3 %v5649_v51  ;;  %v5880_v14 = vld [vmem:[%s8582_s5 + $0x370] sm:$0xf] }
 0x24a   : > { %v2643_v50 = vadd.f32 %v2642_v15, %v2641_v38  ;;  %v2807_v49 = vadd.f32 %v7188_v2, %v2795_v16  ;;  %v2736_v6 = vsub.f32 1.5, %v2735_v4  ;;  %v2667_v62 = vmul.f32 %v7410_v57, %v7410_v57  ;;  %vm7469_vm14 = vmor %vm2738_vm13, %vm2739_vm12  ;;  %3871 = vmatpush.bf16.msra.mxu0 %v5449_v8  ;;  %v6393_v32 = vld [vmem:[%s8582_s5 + $0x374] sm:$0xf0]  ;;  %v6331_v35 = vld [vmem:[%s8582_s5 + $0x184] sm:$0xf0] }
 0x24b   : > { %v7450_v23 = vadd.f32 1e-05, %v2681_v25  ;;  %v5641_v40 = vor.u32 %v7427_v47, %v7422_v17  ;;  %v5441_v41 = vor.u32 %v6283_v33, %v7432_v31  ;;  %v5505_v21 = vor.u32 %v6299_v52, %v7440_v3  ;;  %3884 = vmatpush.bf16.msra.mxu1 %v5513_v26  ;;  %v5944_v46 = vld [vmem:[%s8582_s5 + $0x3f0] sm:$0xf]  ;;  %v6409_v36 = vld [vmem:[%s8582_s5 + $0x3f4] sm:$0xf0] }
 0x24c   : > { %v2659_v10 = vmul.f32 0.0009765625, %v2643_v50  ;;  %v7455_v19 = vpop.eup %6512  ;;  %v2815_v39 = vmax.f32 %v2807_v49, 0.0  ;;  %v2737_v27 = vmul.f32 %v7339_v43, %v2736_v6  ;;  %v5753_v24 = vor.u32 %v6361_v28, %v5752_v45  ;;  %v6359_v15 = vld [vmem:[%s8582_s5 + $0x264] sm:$0xf0]  ;;  %v5808_v4 = vld [vmem:[%s8582_s5 + $0x2e0] sm:$0xf] }
 0x24d   : > { %v2753_v5 = vmul.f32 %v7455_v19, %v7368_v37  ;;  %6514 = vrsqrt.f32 %v7450_v23  ;;  %3897 = vmatpush.bf16.msra.mxu2 %v5577_v55  ;;  %v5817_v12 = vor.u32 %v6377_v20, %v5816_v29  ;;  %v5881_v16 = vor.u32 %v6393_v32, %v5880_v14  ;;  %v6375_v7 = vld [vmem:[%s8582_s5 + $0x2e4] sm:$0xf0]  ;;  %3910 = vmatpush.bf16.msra.mxu3 %v5641_v40  ;;  %v5872_v47 = vld [vmem:[%s8582_s5 + $0x360] sm:$0xf]  ;;  %v5736_v8 = vld [vmem:[%s8582_s5 + $0x250] sm:$0xf] }
 0x24e   : > { %2823 = vst [vmem:[#allocation2 + $0x18] sm:$0xff] %v2815_v39  ;;  %v2741_v38 = vsel %vm7469_vm14, %v7339_v43, %v2737_v27  ;;  %v2675_v59 = vsub.f32 %v2659_v10, %v2667_v62  ;;  %v5569_v43 = vor.u32 %v6315_v54, %v5568_v53  ;;  %3872 = vmatpush.bf16.msra.mxu0 %v5441_v41  ;;  %v6391_v31 = vld [vmem:[%s8582_s5 + $0x364] sm:$0xf0]  ;;  %vm2759_vm15 = vweird.f32 %v7455_v19  ;;  %v5936_v33 = vld [vmem:[%s8582_s5 + $0x3e0] sm:$0xf] }
 0x24f   : > { %v2784_v48 = vmul.f32 %v2776_v44, %v2741_v38  ;;  %v2754_v63 = vmul.f32 %v7455_v19, %v2753_v5  ;;  %v5744_v44 = vld [vmem:[%s8582_s5 + $0x260] sm:$0xf]  ;;  %v5633_v17 = vor.u32 %v6331_v35, %v5632_v61  ;;  %3885 = vmatpush.bf16.msra.mxu1 %v5505_v21  ;;  %v5945_v42 = vor.u32 %v6409_v36, %v5944_v46  ;;  %v6407_v51 = vld [vmem:[%s8582_s5 + $0x3e4] sm:$0xf0]  ;;  %v6357_v52 = vld [vmem:[%s8582_s5 + $0x254] sm:$0xf0] }
 0x250   : > { %v2683_v0 = vmax.f32 %v2675_v59, 0.0  ;;  %v5745_v49 = vor.u32 %v6359_v15, %v5744_v44  ;;  %v5809_v6 = vor.u32 %v6375_v7, %v5808_v4  ;;  %vm2758_vm0 = vweird.f32 %v7368_v37  ;;  %v5800_v55 = vld [vmem:[%s8582_s5 + $0x2d0] sm:$0xf]  ;;  %v6373_v54 = vld [vmem:[%s8582_s5 + $0x2d4] sm:$0xf0] }
 0x251   : > { %v2796_v58 = vmul.f32 %v7168_v9, %v2784_v48  ;;  %v2755_v34 = vmul.f32 0.5, %v2754_v63  ;;  %3898 = vmatpush.bf16.msra.mxu2 %v5569_v43  ;;  %v5873_v26 = vor.u32 %v6391_v31, %v5872_v47  ;;  %v2778_v39 = vsub.f32 %v7102_v56, %v7294_v60  ;;  %vm2760_vm1 = vmor %vm2758_vm0, %vm2759_vm15  ;;  %3911 = vmatpush.bf16.msra.mxu3 %v5633_v17  ;;  %v5864_v37 = vld [vmem:[%s8582_s5 + $0x350] sm:$0xf]  ;;  %v6389_v62 = vld [vmem:[%s8582_s5 + $0x354] sm:$0xf0] }
 0x252   : > { %v7524_v1 = vadd.f32 1e-05, %v2683_v0  ;;  %3917 = vmatpush.bf16.msrb.mxu0 %v5753_v24  ;;  %v5937_v28 = vor.u32 %v6407_v51, %v5936_v33  ;;  %v5928_v56 = vld [vmem:[%s8582_s5 + $0x3d0] sm:$0xf]  ;;  %v6405_v60 = vld [vmem:[%s8582_s5 + $0x3d4] sm:$0xf0]  ;;  %v5737_v40 = vor.u32 %v6357_v52, %v5736_v8  ;;  %v5801_v41 = vor.u32 %v6373_v54, %v5800_v55 }
 0x253   : > { %v7532_v25 = vpop.eup %6514  ;;  %v2808_v50 = vadd.f32 %v7188_v2, %v2796_v58  ;;  %v2756_v22 = vsub.f32 1.5, %v2755_v34  ;;  %3930 = vmatpush.bf16.msrb.mxu1 %v5817_v12  ;;  %v6355_v61 = vld [vmem:[%s8582_s5 + $0x244] sm:$0xf0]  ;;  %v5865_v29 = vor.u32 %v6389_v62, %v5864_v37  ;;  %v5792_v20 = vld [vmem:[%s8582_s5 + $0x2c0] sm:$0xf]  ;;  %v5929_v43 = vor.u32 %v6405_v60, %v5928_v56 }
 0x254   : > { %v2743_v3 = vmul.f32 %v7532_v25, %v7450_v23  ;;  %6516 = vrsqrt.f32 %v7524_v1  ;;  %v6371_v38 = vld [vmem:[%s8582_s5 + $0x2c4] sm:$0xf0]  ;;  %vm2749_vm2 = vweird.f32 %v7532_v25  ;;  %v5856_v32 = vld [vmem:[%s8582_s5 + $0x340] sm:$0xf]  ;;  %v5720_v0 = vld [vmem:[%s8582_s5 + $0x230] sm:$0xf]  ;;  %vm2748_vm3 = vweird.f32 %v7450_v23 }
 0x255   : > { %v2816_v53 = vmax.f32 %v2808_v50, 0.0  ;;  %v2757_v10 = vmul.f32 %v7455_v19, %v2756_v22  ;;  %3943 = vmatpush.bf16.msrb.mxu2 %v5881_v16  ;;  %3956 = vmatpush.bf16.msrb.mxu3 %v5945_v42  ;;  %v6387_v48 = vld [vmem:[%s8582_s5 + $0x344] sm:$0xf0]  ;;  %v5920_v46 = vld [vmem:[%s8582_s5 + $0x3c0] sm:$0xf]  ;;  %v5793_v44 = vor.u32 %v6371_v38, %v5792_v20  ;;  %v2777_v16 = vsub.f32 %v7095_v11, %v7307_v13  ;;  %vm2750_vm4 = vmor %vm2748_vm3, %vm2749_vm2 }
 0x256   : > { %v2744_v27 = vmul.f32 %v7532_v25, %v2743_v3  ;;  %3918 = vmatpush.bf16.msrb.mxu0 %v5745_v49  ;;  %v6403_v36 = vld [vmem:[%s8582_s5 + $0x3c4] sm:$0xf0]  ;;  %v6353_v15 = vld [vmem:[%s8582_s5 + $0x234] sm:$0xf0]  ;;  %v5784_v58 = vld [vmem:[%s8582_s5 + $0x2b0] sm:$0xf]  ;;  %v5857_v4 = vor.u32 %v6387_v48, %v5856_v32  ;;  %vm2768_vm6 = vweird.f32 %v7524_v1 }
 0x257   : > { %2824 = vst [vmem:[#allocation2 + $0x20] sm:$0xff] %v2816_v53  ;;  %v2761_v45 = vsel %vm2760_vm1, %v7455_v19, %v2757_v10  ;;  %3931 = vmatpush.bf16.msrb.mxu1 %v5809_v6  ;;  %v5728_v19 = vld [vmem:[%s8582_s5 + $0x240] sm:$0xf]  ;;  %v6369_v34 = vld [vmem:[%s8582_s5 + $0x2b4] sm:$0xf0]  ;;  %v5921_v42 = vor.u32 %v6403_v36, %v5920_v46  ;;  %v5721_v6 = vor.u32 %v6353_v15, %v5720_v0  ;;  %vm2901_vm8 = vcmask 1041409  }
 0x258   : > { %v2786_v18 = vmul.f32 %v2778_v39, %v2761_v45  ;;  %v2745_v5 = vmul.f32 0.5, %v2744_v27  ;;  %v5729_v35 = vor.u32 %v6355_v61, %v5728_v19  ;;  %v5848_v7 = vld [vmem:[%s8582_s5 + $0x330] sm:$0xf]  ;;  %v6385_v17 = vld [vmem:[%s8582_s5 + $0x334] sm:$0xf0]  ;;  %v5785_v51 = vor.u32 %v6369_v34, %v5784_v58 }
 0x259   : > { %3944 = vmatpush.bf16.msrb.mxu2 %v5873_v26  ;;  %3957 = vmatpush.bf16.msrb.mxu3 %v5937_v28  ;;  %v7637_v11 = vld [vmem:[%s8582_s5 + $0x3b0] sm:$0xf]  ;;  %v6401_v13 = vld [vmem:[%s8582_s5 + $0x3b4] sm:$0xf0]  ;;  %v7645_v33 = vld [vmem:[%s8582_s5 + $0x220] sm:$0xf]  ;;  %v5849_v26 = vor.u32 %v6385_v17, %v5848_v7  ;;  %v2779_v19 = vsub.f32 %v7108_v30, %v7410_v57 }
 0x25a   : > { %v7589_v59 = vpop.eup %6516  ;;  %v2798_v21 = vmul.f32 %v7168_v9, %v2786_v18  ;;  %v2746_v14 = vsub.f32 1.5, %v2745_v5  ;;  %3919 = vmatpush.bf16.msrb.mxu0 %v5737_v40  ;;  %v7655_v3 = vld [vmem:[%s8582_s5 + $0x2a0] sm:$0xf]  ;;  %v7660_v49 = vld [vmem:[%s8582_s5 + $0x2a4] sm:$0xf0]  ;;  %v5913_v18 = vor.u32 %v6401_v13, %v7637_v11  ;;  %vm2904_vm9 = vcmask 1042434  }
 0x25b   : > { %v2763_v63 = vmul.f32 %v7589_v59, %v7524_v1  ;;  %3932 = vmatpush.bf16.msrb.mxu1 %v5801_v41  ;;  %v7665_v8 = vld [vmem:[%s8582_s5 + $0x320] sm:$0xf]  ;;  %v7670_v52 = vld [vmem:[%s8582_s5 + $0x324] sm:$0xf0]  ;;  %vm2769_vm5 = vweird.f32 %v7589_v59  ;;  %v7687_v39 = vld [vmem:[%s8582_s5 + $0x210] sm:$0xf] }
 0x25c   : > { %v2810_v24 = vadd.f32 %v7188_v2, %v2798_v21  ;;  %v2747_v12 = vmul.f32 %v7532_v25, %v2746_v14  ;;  %v7677_v55 = vld [vmem:[%s8582_s5 + $0x3a0] sm:$0xf]  ;;  %v7682_v54 = vld [vmem:[%s8582_s5 + $0x3a4] sm:$0xf0]  ;;  %v7692_v27 = vld [vmem:[%s8582_s5 + $0x214] sm:$0xf0]  ;;  %v5841_v30 = vor.u32 %v7670_v52, %v7665_v8 }
 0x25d   : > { %v2764_v23 = vmul.f32 %v7589_v59, %v2763_v63  ;;  %3945 = vmatpush.bf16.msrb.mxu2 %v5865_v29  ;;  %3958 = vmatpush.bf16.msrb.mxu3 %v5929_v43  ;;  %v7697_v37 = vld [vmem:[%s8582_s5 + $0x290] sm:$0xf]  ;;  %v7702_v62 = vld [vmem:[%s8582_s5 + $0x294] sm:$0xf0]  ;;  %v7731_v41 = vld [vmem:[%s8582_s5 + $0x200] sm:$0xf]  ;;  %v5777_v29 = vor.u32 %v7660_v49, %v7655_v3  ;;  %v5905_v63 = vor.u32 %v7682_v54, %v7677_v55 }
 0x25e   : > { %v2818_v47 = vmax.f32 %v2810_v24, 0.0  ;;  %v2751_v31 = vsel %vm2750_vm4, %v7532_v25, %v2747_v12  ;;  %v7650_v25 = vld [vmem:[%s8582_s5 + $0x224] sm:$0xf0]  ;;  %3920 = vmatpush.bf16.msrb.mxu0 %v5729_v35  ;;  %v7707_v45 = vld [vmem:[%s8582_s5 + $0x310] sm:$0xf]  ;;  %vm2770_vm7 = vmor %vm2768_vm6, %vm2769_vm5  ;;  %v5769_v43 = vor.u32 %v7702_v62, %v7697_v37  ;;  %vm2907_vm10 = vcmask 1043459  }
 0x25f   : > { %v2785_v50 = vmul.f32 %v2777_v16, %v2751_v31  ;;  %v2765_v22 = vmul.f32 0.5, %v2764_v23  ;;  %3933 = vmatpush.bf16.msrb.mxu1 %v5793_v44  ;;  %v7712_v28 = vld [vmem:[%s8582_s5 + $0x314] sm:$0xf0]  ;;  %v7721_v5 = vld [vmem:[%s8582_s5 + $0x390] sm:$0xf]  ;;  %v5713_v61 = vor.u32 %v7650_v25, %v7645_v33  ;;  %vm2910_vm11 = vcmask 1044484  }
 0x260   : > { %2826 = vst [vmem:[#allocation2 + $0x30] sm:$0xff] %v2818_v47  ;;  %v7726_v40 = vld [vmem:[%s8582_s5 + $0x394] sm:$0xf0]  ;;  %v7736_v1 = vld [vmem:[%s8582_s5 + $0x204] sm:$0xf0]  ;;  %v5833_v0 = vor.u32 %v7712_v28, %v7707_v45  ;;  %vm2913_vm12 = vcmask 1045509  }
 0x261   : > { %v2797_v53 = vmul.f32 %v7168_v9, %v2785_v50  ;;  %v2766_v10 = vsub.f32 1.5, %v2765_v22  ;;  %3946 = vmatpush.bf16.msrb.mxu2 %v5857_v4  ;;  %3959 = vmatpush.bf16.msrb.mxu3 %v5921_v42  ;;  %v2829_v20 = vld [vmem:[#allocation2 + $0x8] sm:$0x1]  ;;  %v2830_v38 = vld [vmem:[#allocation2 + $0x10] sm:$0x1]  ;;  %v5897_v16 = vor.u32 %v7726_v40, %v7721_v5  ;;  %v5697_v23 = vor.u32 %v7736_v1, %v7731_v41 }
 0x262   : > { %3921 = vmatpush.bf16.msrb.mxu0 %v5721_v6  ;;  %v7752_v57 = vld [vmem:[%s8582_s5 + $0x280] sm:$0xf]  ;;  %v7757_v32 = vld [vmem:[%s8582_s5 + $0x284] sm:$0xf0]  ;;  %v2831_v35 = vld [vmem:[#allocation2 + $0x18] sm:$0x1] }
 0x263   : > { %v2809_v56 = vadd.f32 %v7188_v2, %v2797_v53  ;;  %v2767_v60 = vmul.f32 %v7589_v59, %v2766_v10  ;;  %3934 = vmatpush.bf16.msrb.mxu1 %v5785_v51  ;;  %v7765_v46 = vld [vmem:[#allocation2 + $0x20] sm:$0x1]  ;;  %v2837_v36 = vld [vmem:[#allocation2 + $0x9] sm:$0x1]  ;;  %v2900_v44 = vrot.slane %v2829_v20, 7  ;;  %v2903_v15 = vrot.slane %v2830_v38, 6 }
 0x264   : > { %v7772_v24 = vld [vmem:[%s8582_s5 + $0x300] sm:$0xf]  ;;  %v7777_v12 = vld [vmem:[%s8582_s5 + $0x304] sm:$0xf0]  ;;  %v2838_v58 = vld [vmem:[#allocation2 + $0x11] sm:$0x1]  ;;  %v5761_v33 = vor.u32 %v7757_v32, %v7752_v57 }
 0x265   : > { %v2817_v21 = vmax.f32 %v2809_v56, 0.0  ;;  %v2771_v14 = vsel %vm2770_vm7, %v7589_v59, %v2767_v60  ;;  %3947 = vmatpush.bf16.msrb.mxu2 %v5849_v26  ;;  %v5705_v59 = vor.u32 %v7692_v27, %v7687_v39  ;;  %3960 = vmatpush.bf16.msrb.mxu3 %v5913_v18  ;;  %v2828_v4 = vld [vmem:[#allocation2] sm:$0x1]  ;;  %v2839_v7 = vld [vmem:[#allocation2 + $0x19] sm:$0x1]  ;;  %v2906_v11 = vrot.slane %v2831_v35, 5 }
 0x266   : > { %v2787_v48 = vmul.f32 %v2779_v19, %v2771_v14  ;;  %3922 = vmatpush.bf16.msrb.mxu0 %v5713_v61  ;;  %v7784_v17 = vld [vmem:[#allocation2 + $0x21] sm:$0x1]  ;;  %v2845_v47 = vld [vmem:[#allocation2 + $0xa] sm:$0x1]  ;;  %v2909_v13 = vrot.slane %v7765_v46, 4  ;;  %v2930_v50 = vrot.slane %v2837_v36, 7  ;;  %v2902_v51 = vsel %vm2901_vm8, %v2900_v44, %v2828_v4 }
 0x267   : > { %2825 = vst [vmem:[#allocation2 + $0x28] sm:$0xff] %v2817_v21  ;;  %3935 = vmatpush.bf16.msrb.mxu1 %v5777_v29  ;;  %v7789_v31 = vld [vmem:[%s8582_s5 + $0x380] sm:$0xf]  ;;  %v2846_v22 = vld [vmem:[#allocation2 + $0x12] sm:$0x1]  ;;  %v2932_v3 = vrot.slane %v2838_v58, 6  ;;  %v2905_v55 = vsel %vm2904_vm9, %v2903_v15, %v2902_v51 }
 0x268   : > { %v2799_v34 = vmul.f32 %v7168_v9, %v2787_v48  ;;  %v7794_v9 = vld [vmem:[%s8582_s5 + $0x384] sm:$0xf0]  ;;  %v2836_v25 = vld [vmem:[#allocation2 + $0x1] sm:$0x1]  ;;  %v2847_v49 = vld [vmem:[#allocation2 + $0x1a] sm:$0x1]  ;;  %v2908_v45 = vsel %vm2907_vm10, %v2906_v11, %v2905_v55 }
 0x269   : > { %3948 = vmatpush.bf16.msrb.mxu2 %v5841_v30  ;;  %v2853_v6 = vld [vmem:[#allocation2 + $0xb] sm:$0x1]  ;;  %3961 = vmatpush.bf16.msrb.mxu3 %v5905_v63  ;;  %v2934_v8 = vrot.slane %v2839_v7, 5  ;;  %v2936_v52 = vrot.slane %v7784_v17, 4  ;;  %v2953_v53 = vrot.slane %v2845_v47, 7  ;;  %vm2916_vm13 = vcmask 1046534  }
 0x26a   : > { %v2811_v42 = vadd.f32 %v7188_v2, %v2799_v34  ;;  %v2854_v10 = vld [vmem:[#allocation2 + $0x13] sm:$0x1]  ;;  %3923 = vmatpush.bf16.msrb.mxu0 %v5705_v59  ;;  %v5825_v2 = vor.u32 %v7777_v12, %v7772_v24  ;;  %v2844_v54 = vld [vmem:[#allocation2 + $0x2] sm:$0x1]  ;;  %v2955_v27 = vrot.slane %v2846_v22, 6  ;;  %vm2919_vm14 = vcmask 1047559  }
 0x26b   : > { %3936 = vmatpush.bf16.msrb.mxu1 %v5769_v43  ;;  %v2848_v39 = vld [vmem:[#allocation2 + $0x22] sm:$0x1]  ;;  %v2855_v37 = vld [vmem:[#allocation2 + $0x1b] sm:$0x1]  ;;  %v7805_v62 = vld [vmem:[#allocation2 + $0x30] sm:$0x1]  ;;  %v2931_v56 = vsel %vm2901_vm8, %v2930_v50, %v2836_v25  ;;  %v5889_v40 = vor.u32 %v7794_v9, %v7789_v31  ;;  %v2911_v1 = vsel %vm2910_vm11, %v2909_v13, %v2908_v45  ;;  %v2954_v30 = vsel %vm2901_vm8, %v2953_v53, %v2844_v54 }
 0x26c   : > { %v2819_v26 = vmax.f32 %v2811_v42, 0.0  ;;  %v7808_v28 = vld [vmem:[#allocation2 + $0x31] sm:$0x1]  ;;  %v2957_v60 = vrot.slane %v2847_v49, 5  ;;  %v2856_v18 = vld [vmem:[#allocation2 + $0x23] sm:$0x1]  ;;  %v2933_v61 = vsel %vm2904_vm9, %v2932_v3, %v2931_v56 }
 0x26d   : > { %3949 = vmatpush.bf16.msrb.mxu2 %v5833_v0  ;;  %v2976_v5 = vrot.slane %v2853_v6, 7  ;;  %v2850_v29 = vld [vmem:[#allocation2 + $0x32] sm:$0x1]  ;;  %v2852_v20 = vld [vmem:[#allocation2 + $0x3] sm:$0x1]  ;;  %v2978_v38 = vrot.slane %v2854_v10, 6  ;;  %3962 = vmatpush.bf16.msrb.mxu3 %v5897_v16  ;;  %v2935_v21 = vsel %vm2907_vm10, %v2934_v8, %v2933_v61  ;;  %v2956_v0 = vsel %vm2904_vm9, %v2955_v27, %v2954_v30 }
 0x26e   : > { %2827 = vst [vmem:[#allocation2 + $0x38] sm:$0xff] %v2819_v26  ;;  %v2833_v41 = vld [vmem:[#allocation2 + $0x28] sm:$0x1]  ;;  %v2841_v19 = vld [vmem:[#allocation2 + $0x29] sm:$0x1]  ;;  %v2959_v57 = vrot.slane %v2848_v39, 4  ;;  %3924 = vmatpush.bf16.msrb.mxu0 %v5697_v23  ;;  %v2937_v36 = vsel %vm2910_vm11, %v2936_v52, %v2935_v21  ;;  %v2958_v58 = vsel %vm2907_vm10, %v2957_v60, %v2956_v0 }
 0x26f   : > { %v2849_v14 = vld [vmem:[#allocation2 + $0x2a] sm:$0x1]  ;;  %v2857_v32 = vld [vmem:[#allocation2 + $0x2b] sm:$0x1]  ;;  %v2980_v48 = vrot.slane %v2855_v37, 5  ;;  %3937 = vmatpush.bf16.msrb.mxu1 %v5761_v33  ;;  %v2912_v63 = vrot.slane %v2833_v41, 3  ;;  %v2977_v24 = vsel %vm2901_vm8, %v2976_v5, %v2852_v20 }
 0x270   : > { %v2938_v59 = vrot.slane %v2841_v19, 3  ;;  %v2961_v43 = vrot.slane %v2849_v14, 3  ;;  %v2858_v35 = vld [vmem:[#allocation2 + $0x33] sm:$0x1]  ;;  %v2982_v46 = vrot.slane %v2856_v18, 4  ;;  %v2984_v12 = vrot.slane %v2857_v32, 3 }
 0x271   : > { %3950 = vmatpush.bf16.msrb.mxu2 %v5825_v2  ;;  %v2915_v44 = vrot.slane %v7805_v62, 2  ;;  %v2940_v15 = vrot.slane %v7808_v28, 2  ;;  %v2979_v34 = vsel %vm2904_vm9, %v2978_v38, %v2977_v24  ;;  %v7827_v16 = vld [vmem:[%s8582_s5 + $0x74] sm:$0xf]  ;;  %v7832_v23 = vld [vmem:[%s8582_s5 + $0x78] sm:$0xf0]  ;;  %3963 = vmatpush.bf16.msrb.mxu3 %v5889_v40  ;;  %v2960_v4 = vsel %vm2910_vm11, %v2959_v57, %v2958_v58 }
 0x272   : > { %v2963_v7 = vrot.slane %v2850_v29, 2  ;;  %v2981_v17 = vsel %vm2907_vm10, %v2980_v48, %v2979_v34  ;;  %v2986_v47 = vrot.slane %v2858_v35, 2  ;;  %v7839_v31 = vld [vmem:[%s8582_s5 + $0xf4] sm:$0xf]  ;;  %v7844_v9 = vld [vmem:[%s8582_s5 + $0xf8] sm:$0xf0]  ;;  %v2914_v11 = vsel %vm2913_vm12, %v2912_v63, %v2911_v1 }
 0x273   : > { %v2939_v13 = vsel %vm2913_vm12, %v2938_v59, %v2937_v36  ;;  %v2962_v50 = vsel %vm2913_vm12, %v2961_v43, %v2960_v4  ;;  %v2983_v22 = vsel %vm2910_vm11, %v2982_v46, %v2981_v17  ;;  %v5501_v49 = vor.u32 %v7827_v16, %v7832_v23  ;;  %v7856_v6 = vld [vmem:[%s8582_s5 + $0x174] sm:$0xf]  ;;  %v5626_v51 = vld [vmem:[%s8582_s5 + $0x178] sm:$0xf0]  ;;  %v7875_v62 = vld [vmem:[%s8582_s5 + $0x64] sm:$0xf] }
 0x274   : > { %v2985_v3 = vsel %vm2913_vm12, %v2984_v12, %v2983_v22  ;;  %v6344_v8 = vld [vmem:[%s8582_s5 + $0x1f4] sm:$0xf]  ;;  %v5690_v52 = vld [vmem:[%s8582_s5 + $0x1f8] sm:$0xf0]  ;;  %v5565_v55 = vor.u32 %v7839_v31, %v7844_v9  ;;  %v2917_v54 = vsel %vm2916_vm13, %v2915_v44, %v2914_v11  ;;  %v2941_v39 = vsel %vm2916_vm13, %v2940_v15, %v2939_v13  ;;  %v7880_v45 = vld [vmem:[%s8582_s5 + $0x68] sm:$0xf0] }
 0x275   : > { %v2835_v42 = vld [vmem:[#allocation2 + $0x38] sm:$0x1]  ;;  %v2843_v33 = vld [vmem:[#allocation2 + $0x39] sm:$0x1]  ;;  %v2851_v25 = vld [vmem:[#allocation2 + $0x3a] sm:$0x1]  ;;  %v2964_v27 = vsel %vm2916_vm13, %v2963_v7, %v2962_v50  ;;  %v2987_v18 = vsel %vm2916_vm13, %v2986_v47, %v2985_v3  ;;  %v5629_v30 = vor.u32 %v7856_v6, %v5626_v51  ;;  %v5693_v57 = vor.u32 %v6344_v8, %v5690_v52 }
 0x276   : > { %v2918_v53 = vrot.slane %v2835_v42, 1  ;;  %v2942_v10 = vrot.slane %v2843_v33, 1  ;;  %v2965_v26 = vrot.slane %v2851_v25, 1  ;;  %v2859_v2 = vld [vmem:[#allocation2 + $0x3b] sm:$0x1]  ;;  %v5493_v16 = vor.u32 %v7875_v62, %v7880_v45 }
 0x277   : > { %v2988_v37 = vrot.slane %v2859_v2, 1  ;;  %v7889_v5 = vld [vmem:[%s8582_s5 + $0xe4] sm:$0xf]  ;;  %v7894_v40 = vld [vmem:[%s8582_s5 + $0xe8] sm:$0xf0]  ;;  %vm4075_vm15 = vcmask 719872  }
 0x278   : > { %v2920_v28 = vsel %vm2919_vm14, %v2918_v53, %v2917_v54  ;;  %v2943_v56 = vsel %vm2919_vm14, %v2942_v10, %v2941_v39  ;;  %v2966_v60 = vsel %vm2919_vm14, %v2965_v26, %v2964_v27  ;;  %v7899_v41 = vld [vmem:[%s8582_s5 + $0x164] sm:$0xf]  ;;  %v7911_v20 = vld [vmem:[%s8582_s5 + $0x168] sm:$0xf0]  ;;  %v7929_v32 = vld [vmem:[%s8582_s5 + $0x54] sm:$0xf]  ;;  %v5557_v23 = vor.u32 %v7889_v5, %v7894_v40 }
 0x279   : > { %v7901_v1 = vpack.c.bf16 %v2920_v28, %v2920_v28  ;;  %v7903_v19 = vpack.c.bf16 %v2943_v56, %v2943_v56  ;;  %v7905_v61 = vpack.c.bf16 %v2966_v60, %v2966_v60  ;;  %v2989_v29 = vsel %vm2919_vm14, %v2988_v37, %v2987_v18  ;;  %v7916_v38 = vld [vmem:[%s8582_s5 + $0x1e4] sm:$0xf]  ;;  %v7921_v21 = vld [vmem:[%s8582_s5 + $0x1e8] sm:$0xf0]  ;;  %v7934_v48 = vld [vmem:[%s8582_s5 + $0x58] sm:$0xf0] }
 0x27a   : > { %v7923_v14 = vpack.c.bf16 %v2989_v29, %v2989_v29  ;;  %v7939_v63 = vld [vmem:[%s8582_s5 + $0xd4] sm:$0xf]  ;;  %v7944_v59 = vld [vmem:[%s8582_s5 + $0xd8] sm:$0xf0]  ;;  %v7971_v0 = vld [vmem:[%s8582_s5 + $0x44] sm:$0xf]  ;;  %v5621_v47 = vor.u32 %v7899_v41, %v7911_v20  ;;  %v5685_v50 = vor.u32 %v7916_v38, %v7921_v21  ;;  %v5485_v3 = vor.u32 %v7929_v32, %v7934_v48 }
 0x27b   : > { %v7949_v43 = vld [vmem:[%s8582_s5 + $0x154] sm:$0xf]  ;;  %v7954_v35 = vld [vmem:[%s8582_s5 + $0x158] sm:$0xf0]  ;;  %3873 = vmatmul.bf16.vlgmr.msra.gmra.mxu0 %v7901_v1  ;;  %3886 = vmatmul.bf16.vlgmr.msra.gmra.mxu1 %v7903_v19  ;;  %v7976_v24 = vld [vmem:[%s8582_s5 + $0x48] sm:$0xf0] }
 0x27c   : > { %v7961_v46 = vld [vmem:[%s8582_s5 + $0x1d4] sm:$0xf]  ;;  %v7966_v36 = vld [vmem:[%s8582_s5 + $0x1d8] sm:$0xf0]  ;;  %v7981_v12 = vld [vmem:[%s8582_s5 + $0xc4] sm:$0xf]  ;;  %3899 = vmatmul.bf16.vlgmr.msra.gmra.mxu2 %v7905_v61  ;;  %3912 = vmatmul.bf16.vlgmr.msra.gmra.mxu3 %v7923_v14  ;;  %v5613_v6 = vor.u32 %v7949_v43, %v7954_v35  ;;  %v5477_v39 = vor.u32 %v7971_v0, %v7976_v24 }
 0x27d   : > { %v7986_v44 = vld [vmem:[%s8582_s5 + $0xc8] sm:$0xf0]  ;;  %v2862_v58 = vld [vmem:[#allocation2 + $0x14] sm:$0x1]  ;;  %v2863_v34 = vld [vmem:[#allocation2 + $0x1c] sm:$0x1]  ;;  %3969 = vmatpush.bf16.msra.mxu0 %v5501_v49  ;;  %3982 = vmatpush.bf16.msra.mxu1 %v5565_v55  ;;  %v5549_v49 = vor.u32 %v7939_v63, %v7944_v59  ;;  %v5677_v54 = vor.u32 %v7961_v46, %v7966_v36 }
 0x27e   : > { %v2861_v15 = vld [vmem:[#allocation2 + $0xc] sm:$0x1]  ;;  %v2860_v4 = vld [vmem:[#allocation2 + $0x4] sm:$0x1]  ;;  %v2867_v31 = vld [vmem:[#allocation2 + $0x3c] sm:$0x1]  ;;  %3995 = vmatpush.bf16.msra.mxu2 %v5629_v30  ;;  %4008 = vmatpush.bf16.msra.mxu3 %v5693_v57  ;;  %v5541_v27 = vor.u32 %v7981_v12, %v7986_v44 }
 0x27f   : > { %v2864_v7 = vld [vmem:[#allocation2 + $0x24] sm:$0x1]  ;;  %v2865_v17 = vld [vmem:[#allocation2 + $0x2c] sm:$0x1]  ;;  %v2999_v9 = vrot.slane %v2861_v15, 7  ;;  %v3001_v11 = vrot.slane %v2862_v58, 6 }
 0x280   : > { %v3003_v13 = vrot.slane %v2863_v34, 5  ;;  %v2866_v22 = vld [vmem:[#allocation2 + $0x34] sm:$0x1]  ;;  %v3005_v42 = vrot.slane %v2864_v7, 4  ;;  %v3007_v33 = vrot.slane %v2865_v17, 3  ;;  %v3011_v25 = vrot.slane %v2867_v31, 1 }
 0x281   : > { %v8007_v51 = vld [vmem:[%s8582_s5 + $0x144] sm:$0xf]  ;;  %v8012_v8 = vld [vmem:[%s8582_s5 + $0x148] sm:$0xf0]  ;;  %v3000_v10 = vsel %vm2901_vm8, %v2999_v9, %v2860_v4  ;;  %v2870_v2 = vld [vmem:[#allocation2 + $0x15] sm:$0x1]  ;;  %3970 = vmatpush.bf16.msra.mxu0 %v5493_v16  ;;  %3983 = vmatpush.bf16.msra.mxu1 %v5557_v23 }
 0x282   : > { %v8017_v52 = vld [vmem:[%s8582_s5 + $0x1c4] sm:$0xf]  ;;  %v8022_v53 = vld [vmem:[%s8582_s5 + $0x1c8] sm:$0xf0]  ;;  %v2871_v55 = vld [vmem:[#allocation2 + $0x1d] sm:$0x1]  ;;  %v3002_v37 = vsel %vm2904_vm9, %v3001_v11, %v3000_v10  ;;  %3996 = vmatpush.bf16.msra.mxu2 %v5621_v47  ;;  %4009 = vmatpush.bf16.msra.mxu3 %v5685_v50  ;;  %v5605_v43 = vor.u32 %v8007_v51, %v8012_v8 }
 0x283   : > { %v2869_v26 = vld [vmem:[#allocation2 + $0xd] sm:$0x1]  ;;  %v2872_v62 = vld [vmem:[#allocation2 + $0x25] sm:$0x1]  ;;  %v2874_v28 = vld [vmem:[#allocation2 + $0x35] sm:$0x1]  ;;  %v3004_v56 = vsel %vm2907_vm10, %v3003_v13, %v3002_v37  ;;  %v5669_v35 = vor.u32 %v8017_v52, %v8022_v53 }
 0x284   : > { %v2873_v45 = vld [vmem:[#allocation2 + $0x2d] sm:$0x1]  ;;  %v2875_v60 = vld [vmem:[#allocation2 + $0x3d] sm:$0x1]  ;;  %v3022_v18 = vrot.slane %v2869_v26, 7  ;;  %v3024_v5 = vrot.slane %v2870_v2, 6  ;;  %v3006_v41 = vsel %vm2910_vm11, %v3005_v42, %v3004_v56 }
 0x285   : > { %v3026_v40 = vrot.slane %v2871_v55, 5  ;;  %v3009_v29 = vrot.slane %v2866_v22, 2  ;;  %v2868_v20 = vld [vmem:[#allocation2 + $0x5] sm:$0x1]  ;;  %v3028_v38 = vrot.slane %v2872_v62, 4  ;;  %v3030_v21 = vrot.slane %v2873_v45, 3  ;;  %3971 = vmatpush.bf16.msra.mxu0 %v5485_v3  ;;  %3984 = vmatpush.bf16.msra.mxu1 %v5549_v49 }
 0x286   : > { %v3008_v30 = vsel %vm2913_vm12, %v3007_v33, %v3006_v41  ;;  %v3023_v57 = vsel %vm2901_vm8, %v3022_v18, %v2868_v20  ;;  %v3032_v32 = vrot.slane %v2874_v28, 2  ;;  %v3034_v48 = vrot.slane %v2875_v60, 1  ;;  %v2877_v63 = vld [vmem:[#allocation2 + $0xe] sm:$0x1]  ;;  %v2878_v59 = vld [vmem:[#allocation2 + $0x16] sm:$0x1]  ;;  %3997 = vmatpush.bf16.msra.mxu2 %v5613_v6  ;;  %4010 = vmatpush.bf16.msra.mxu3 %v5677_v54 }
 0x287   : > { %v3010_v46 = vsel %vm2916_vm13, %v3009_v29, %v3008_v30  ;;  %v3025_v36 = vsel %vm2904_vm9, %v3024_v5, %v3023_v57  ;;  %v2879_v0 = vld [vmem:[#allocation2 + $0x1e] sm:$0x1]  ;;  %v2880_v24 = vld [vmem:[#allocation2 + $0x26] sm:$0x1]  ;;  %v2881_v12 = vld [vmem:[#allocation2 + $0x2e] sm:$0x1] }
 0x288   : > { %v3012_v44 = vsel %vm2919_vm14, %v3011_v25, %v3010_v46  ;;  %v3027_v15 = vsel %vm2907_vm10, %v3026_v40, %v3025_v36  ;;  %v2882_v58 = vld [vmem:[#allocation2 + $0x36] sm:$0x1]  ;;  %v2883_v34 = vld [vmem:[#allocation2 + $0x3e] sm:$0x1]  ;;  %v3045_v16 = vrot.slane %v2877_v63, 7  ;;  %v3047_v23 = vrot.slane %v2878_v59, 6 }
 0x289   : > { %v8044_v4 = vpack.c.bf16 %v3012_v44, %v3012_v44  ;;  %v3029_v7 = vsel %vm2910_vm11, %v3028_v38, %v3027_v15  ;;  %v2876_v17 = vld [vmem:[#allocation2 + $0x6] sm:$0x1]  ;;  %v3049_v47 = vrot.slane %v2879_v0, 5  ;;  %v3051_v31 = vrot.slane %v2880_v24, 4  ;;  %v2885_v9 = vld [vmem:[#allocation2 + $0xf] sm:$0x1]  ;;  %3972 = vmatpush.bf16.msra.mxu0 %v5477_v39  ;;  %3985 = vmatpush.bf16.msra.mxu1 %v5541_v27 }
 0x28a   : > { %v3031_v11 = vsel %vm2913_vm12, %v3030_v21, %v3029_v7  ;;  %v3046_v13 = vsel %vm2901_vm8, %v3045_v16, %v2876_v17  ;;  %v3053_v50 = vrot.slane %v2881_v12, 3  ;;  %v3055_v22 = vrot.slane %v2882_v58, 2  ;;  %v2884_v42 = vld [vmem:[#allocation2 + $0x7] sm:$0x1]  ;;  %v2886_v33 = vld [vmem:[#allocation2 + $0x17] sm:$0x1]  ;;  %3998 = vmatpush.bf16.msra.mxu2 %v5605_v43  ;;  %4011 = vmatpush.bf16.msra.mxu3 %v5669_v35 }
 0x28b   : > { %v2887_v25 = vld [vmem:[#allocation2 + $0x1f] sm:$0x1]  ;;  %v3033_v3 = vsel %vm2916_vm13, %v3032_v32, %v3031_v11  ;;  %v3048_v49 = vsel %vm2904_vm9, %v3047_v23, %v3046_v13  ;;  %v3057_v6 = vrot.slane %v2883_v34, 1  ;;  %v2888_v51 = vld [vmem:[#allocation2 + $0x27] sm:$0x1]  ;;  %v3068_v52 = vrot.slane %v2885_v9, 7  ;;  %3925 = vmatmul.bf16.vlgmr.msrb.gmra.mxu0 %v8044_v4 }
 0x28c   : > { %v2889_v8 = vld [vmem:[#allocation2 + $0x2f] sm:$0x1]  ;;  %v3035_v53 = vsel %vm2919_vm14, %v3034_v48, %v3033_v3  ;;  %v3050_v10 = vsel %vm2907_vm10, %v3049_v47, %v3048_v49  ;;  %v2890_v26 = vld [vmem:[#allocation2 + $0x37] sm:$0x1]  ;;  %v2891_v2 = vld [vmem:[#allocation2 + $0x3f] sm:$0x1] }
 0x28d   : > { %v3070_v55 = vrot.slane %v2886_v33, 6  ;;  %v3072_v54 = vrot.slane %v2887_v25, 5  ;;  %v8053_v37 = vpack.c.bf16 %v3035_v53, %v3035_v53  ;;  %v3052_v62 = vsel %vm2910_vm11, %v3051_v31, %v3050_v10  ;;  %v6288_v39 = vld [vmem:[%s8582_s5 + $0x34] sm:$0xf]  ;;  %v5466_v27 = vld [vmem:[%s8582_s5 + $0x38] sm:$0xf0] }
 0x28e   : > { %v3069_v45 = vsel %vm2901_vm8, %v3068_v52, %v2884_v42  ;;  %v3074_v28 = vrot.slane %v2888_v51, 4  ;;  %v3054_v56 = vsel %vm2913_vm12, %v3053_v50, %v3052_v62  ;;  %v3076_v18 = vrot.slane %v2889_v8, 3  ;;  %v6304_v40 = vld [vmem:[%s8582_s5 + $0xb4] sm:$0xf]  ;;  %v5530_v41 = vld [vmem:[%s8582_s5 + $0xb8] sm:$0xf0] }
 0x28f   : > { %v3071_v60 = vsel %vm2904_vm9, %v3070_v55, %v3069_v45  ;;  %v3078_v5 = vrot.slane %v2890_v26, 2  ;;  %3938 = vmatmul.bf16.vlgmr.msrb.gmra.mxu1 %v8053_v37  ;;  %v3056_v29 = vsel %vm2916_vm13, %v3055_v22, %v3054_v56  ;;  %v3080_v38 = vrot.slane %v2891_v2, 1  ;;  %v6320_v30 = vld [vmem:[%s8582_s5 + $0x134] sm:$0xf]  ;;  %v5594_v57 = vld [vmem:[%s8582_s5 + $0x138] sm:$0xf0] }
 0x290   : > { %v3073_v20 = vsel %vm2907_vm10, %v3072_v54, %v3071_v60  ;;  %v5469_v21 = vor.u32 %v6288_v39, %v5466_v27  ;;  %v3058_v32 = vsel %vm2919_vm14, %v3057_v6, %v3056_v29  ;;  %v5533_v63 = vor.u32 %v6304_v40, %v5530_v41  ;;  %v6336_v43 = vld [vmem:[%s8582_s5 + $0x1b4] sm:$0xf]  ;;  %v5658_v35 = vld [vmem:[%s8582_s5 + $0x1b8] sm:$0xf0]  ;;  %v6286_v46 = vld [vmem:[%s8582_s5 + $0x24] sm:$0xf] }
 0x291   : > { %v3075_v48 = vsel %vm2910_vm11, %v3074_v28, %v3073_v20  ;;  %v5597_v59 = vor.u32 %v6320_v30, %v5594_v57  ;;  %v8092_v36 = vpack.c.bf16 %v3058_v32, %v3058_v32  ;;  %v5661_v24 = vor.u32 %v6336_v43, %v5658_v35  ;;  %v5458_v12 = vld [vmem:[%s8582_s5 + $0x28] sm:$0xf0]  ;;  %v6302_v44 = vld [vmem:[%s8582_s5 + $0xa4] sm:$0xf]  ;;  %v6284_v11 = vld [vmem:[%s8582_s5 + $0x14] sm:$0xf] }
 0x292   : > { %v3077_v0 = vsel %vm2913_vm12, %v3076_v18, %v3075_v48  ;;  %3973 = vmatpush.bf16.msra.mxu0 %v5469_v21  ;;  %v5522_v15 = vld [vmem:[%s8582_s5 + $0xa8] sm:$0xf0]  ;;  %3986 = vmatpush.bf16.msra.mxu1 %v5533_v63  ;;  %v5461_v34 = vor.u32 %v6286_v46, %v5458_v12  ;;  %v6318_v23 = vld [vmem:[%s8582_s5 + $0x124] sm:$0xf]  ;;  %v5450_v13 = vld [vmem:[%s8582_s5 + $0x18] sm:$0xf0] }
 0x293   : > { %v3079_v58 = vsel %vm2916_vm13, %v3078_v5, %v3077_v0  ;;  %3999 = vmatpush.bf16.msra.mxu2 %v5597_v59  ;;  %v5525_v16 = vor.u32 %v6302_v44, %v5522_v15  ;;  %v5586_v7 = vld [vmem:[%s8582_s5 + $0x128] sm:$0xf0]  ;;  %v6334_v17 = vld [vmem:[%s8582_s5 + $0x1a4] sm:$0xf]  ;;  %4012 = vmatpush.bf16.msra.mxu3 %v5661_v24  ;;  %v6300_v42 = vld [vmem:[%s8582_s5 + $0x94] sm:$0xf]  ;;  %v5453_v3 = vor.u32 %v6284_v11, %v5450_v13 }
 0x294   : > { %3951 = vmatmul.bf16.vlgmr.msrb.gmra.mxu2 %v8092_v36  ;;  %v3081_v47 = vsel %vm2919_vm14, %v3080_v38, %v3079_v58  ;;  %v5589_v31 = vor.u32 %v6318_v23, %v5586_v7  ;;  %v5650_v9 = vld [vmem:[%s8582_s5 + $0x1a8] sm:$0xf0]  ;;  %v5514_v33 = vld [vmem:[%s8582_s5 + $0x98] sm:$0xf0]  ;;  %v6316_v25 = vld [vmem:[%s8582_s5 + $0x114] sm:$0xf] }
 0x295   : > { %v8125_v50 = vpack.c.bf16 %v3081_v47, %v3081_v47  ;;  %v5653_v22 = vor.u32 %v6334_v17, %v5650_v9  ;;  %v5578_v49 = vld [vmem:[%s8582_s5 + $0x118] sm:$0xf0]  ;;  %v6332_v6 = vld [vmem:[%s8582_s5 + $0x194] sm:$0xf]  ;;  %v5517_v8 = vor.u32 %v6300_v42, %v5514_v33  ;;  %v6282_v52 = vld [vmem:[%s8582_s5 + $0x4] sm:$0xf] }
 0x296   : > { %3974 = vmatpush.bf16.msra.mxu0 %v5461_v34  ;;  %v5642_v51 = vld [vmem:[%s8582_s5 + $0x198] sm:$0xf0]  ;;  %3987 = vmatpush.bf16.msra.mxu1 %v5525_v16  ;;  %v5442_v53 = vld [vmem:[%s8582_s5 + $0x8] sm:$0xf0]  ;;  %v6298_v10 = vld [vmem:[%s8582_s5 + $0x84] sm:$0xf]  ;;  %v5581_v26 = vor.u32 %v6316_v25, %v5578_v49 }
 0x297   : > { %3964 = vmatmul.bf16.vlgmr.msrb.gmra.mxu3 %v8125_v50  ;;  %4000 = vmatpush.bf16.msra.mxu2 %v5589_v31  ;;  %v5645_v2 = vor.u32 %v6332_v6, %v5642_v51  ;;  %v5506_v55 = vld [vmem:[%s8582_s5 + $0x88] sm:$0xf0]  ;;  %v6314_v54 = vld [vmem:[%s8582_s5 + $0x104] sm:$0xf]  ;;  %v6360_v39 = vld [vmem:[%s8582_s5 + $0x274] sm:$0xf]  ;;  %v5445_v27 = vor.u32 %v6282_v52, %v5442_v53 }
 0x298   : > { %4013 = vmatpush.bf16.msra.mxu3 %v5653_v22  ;;  %v5570_v62 = vld [vmem:[%s8582_s5 + $0x108] sm:$0xf0]  ;;  %v6330_v45 = vld [vmem:[%s8582_s5 + $0x184] sm:$0xf]  ;;  %v5754_v56 = vld [vmem:[%s8582_s5 + $0x278] sm:$0xf0]  ;;  %v5509_v5 = vor.u32 %v6298_v10, %v5506_v55 }
 0x299   : > { %v5634_v28 = vld [vmem:[%s8582_s5 + $0x188] sm:$0xf0]  ;;  %v6376_v60 = vld [vmem:[%s8582_s5 + $0x2f4] sm:$0xf]  ;;  %v5818_v18 = vld [vmem:[%s8582_s5 + $0x2f8] sm:$0xf0]  ;;  %v5757_v40 = vor.u32 %v6360_v39, %v5754_v56  ;;  %v5573_v38 = vor.u32 %v6314_v54, %v5570_v62 }
 0x29a   : > { %3975 = vmatpush.bf16.msra.mxu0 %v5453_v3  ;;  %3988 = vmatpush.bf16.msra.mxu1 %v5517_v8  ;;  %v6392_v41 = vld [vmem:[%s8582_s5 + $0x374] sm:$0xf]  ;;  %v5882_v29 = vld [vmem:[%s8582_s5 + $0x378] sm:$0xf0]  ;;  %v5637_v21 = vor.u32 %v6330_v45, %v5634_v28  ;;  %v6358_v57 = vld [vmem:[%s8582_s5 + $0x264] sm:$0xf]  ;;  %v5821_v48 = vor.u32 %v6376_v60, %v5818_v18 }
 0x29b   : > { %v6408_v20 = vld [vmem:[%s8582_s5 + $0x3f4] sm:$0xf]  ;;  %4001 = vmatpush.bf16.msra.mxu2 %v5581_v26  ;;  %v5946_v30 = vld [vmem:[%s8582_s5 + $0x3f8] sm:$0xf0]  ;;  %v5746_v32 = vld [vmem:[%s8582_s5 + $0x268] sm:$0xf0]  ;;  %v5885_v63 = vor.u32 %v6392_v41, %v5882_v29 }
 0x29c   : > { %4014 = vmatpush.bf16.msra.mxu3 %v5645_v2  ;;  %v6374_v59 = vld [vmem:[%s8582_s5 + $0x2e4] sm:$0xf]  ;;  %v5949_v43 = vor.u32 %v6408_v20, %v5946_v30  ;;  %v5810_v35 = vld [vmem:[%s8582_s5 + $0x2e8] sm:$0xf0]  ;;  %v5749_v24 = vor.u32 %v6358_v57, %v5746_v32  ;;  %v6356_v15 = vld [vmem:[%s8582_s5 + $0x254] sm:$0xf] }
 0x29d   : > { %v6390_v46 = vld [vmem:[%s8582_s5 + $0x364] sm:$0xf]  ;;  %v5874_v0 = vld [vmem:[%s8582_s5 + $0x368] sm:$0xf0]  ;;  %v5738_v58 = vld [vmem:[%s8582_s5 + $0x258] sm:$0xf0]  ;;  %v5813_v34 = vor.u32 %v6374_v59, %v5810_v35 }
 0x29e   : > { %3976 = vmatpush.bf16.msra.mxu0 %v5445_v27  ;;  %3989 = vmatpush.bf16.msra.mxu1 %v5509_v5  ;;  %v6406_v12 = vld [vmem:[%s8582_s5 + $0x3e4] sm:$0xf]  ;;  %v5938_v44 = vld [vmem:[%s8582_s5 + $0x3e8] sm:$0xf0]  ;;  %v5877_v16 = vor.u32 %v6390_v46, %v5874_v0  ;;  %v6372_v23 = vld [vmem:[%s8582_s5 + $0x2d4] sm:$0xf]  ;;  %v5741_v9 = vor.u32 %v6356_v15, %v5738_v58 }
 0x29f   : > { %4002 = vmatpush.bf16.msra.mxu2 %v5573_v38  ;;  %v5941_v7 = vor.u32 %v6406_v12, %v5938_v44  ;;  %v5802_v17 = vld [vmem:[%s8582_s5 + $0x2d8] sm:$0xf0]  ;;  %v6388_v47 = vld [vmem:[%s8582_s5 + $0x354] sm:$0xf]  ;;  %v6354_v13 = vld [vmem:[%s8582_s5 + $0x244] sm:$0xf] }
 0x2a0   : > { %4015 = vmatpush.bf16.msra.mxu3 %v5637_v21  ;;  %v5866_v31 = vld [vmem:[%s8582_s5 + $0x358] sm:$0xf0]  ;;  %v5805_v22 = vor.u32 %v6372_v23, %v5802_v17  ;;  %v6370_v33 = vld [vmem:[%s8582_s5 + $0x2c4] sm:$0xf]  ;;  %v5858_v49 = vld [vmem:[%s8582_s5 + $0x348] sm:$0xf0] }
 0x2a1   : > { %3977 = vmatmul.bf16.vlgmr.msra.gmra.mxu0 %v7901_v1  ;;  %3990 = vmatmul.bf16.vlgmr.msra.gmra.mxu1 %v7903_v19  ;;  %v6404_v1 = vld [vmem:[%s8582_s5 + $0x3d4] sm:$0xf]  ;;  %v5930_v11 = vld [vmem:[%s8582_s5 + $0x3d8] sm:$0xf0]  ;;  %v5730_v19 = vld [vmem:[%s8582_s5 + $0x248] sm:$0xf0]  ;;  %v5869_v42 = vor.u32 %v6388_v47, %v5866_v31 }
 0x2a2   : > { %4021 = vmatpush.bf16.msrb.mxu0 %v5757_v40  ;;  %4034 = vmatpush.bf16.msrb.mxu1 %v5821_v48  ;;  %v5933_v25 = vor.u32 %v6404_v1, %v5930_v11  ;;  %v6386_v3 = vld [vmem:[%s8582_s5 + $0x344] sm:$0xf]  ;;  %v5733_v6 = vor.u32 %v6354_v13, %v5730_v19  ;;  %v5922_v8 = vld [vmem:[%s8582_s5 + $0x3c8] sm:$0xf0]  ;;  %v6352_v52 = vld [vmem:[%s8582_s5 + $0x234] sm:$0xf] }
 0x2a3   : > { %4047 = vmatpush.bf16.msrb.mxu2 %v5885_v63  ;;  %v6402_v51 = vld [vmem:[%s8582_s5 + $0x3c4] sm:$0xf]  ;;  %v5722_v53 = vld [vmem:[%s8582_s5 + $0x238] sm:$0xf0]  ;;  %v5861_v10 = vor.u32 %v6386_v3, %v5858_v49  ;;  %v6368_v26 = vld [vmem:[%s8582_s5 + $0x2b4] sm:$0xf] }
 0x2a4   : > { %4060 = vmatpush.bf16.msrb.mxu3 %v5949_v43  ;;  %4003 = vmatmul.bf16.vlgmr.msra.gmra.mxu2 %v7905_v61  ;;  %v5794_v61 = vld [vmem:[%s8582_s5 + $0x2c8] sm:$0xf0]  ;;  %v5925_v2 = vor.u32 %v6402_v51, %v5922_v8  ;;  %v5786_v55 = vld [vmem:[%s8582_s5 + $0x2b8] sm:$0xf0]  ;;  %v6384_v54 = vld [vmem:[%s8582_s5 + $0x334] sm:$0xf]  ;;  %v5725_v45 = vor.u32 %v6352_v52, %v5722_v53 }
 0x2a5   : > { %v5850_v62 = vld [vmem:[%s8582_s5 + $0x338] sm:$0xf0]  ;;  %v6400_v28 = vld [vmem:[%s8582_s5 + $0x3b4] sm:$0xf]  ;;  %v6350_v27 = vld [vmem:[%s8582_s5 + $0x224] sm:$0xf]  ;;  %v5789_v60 = vor.u32 %v6368_v26, %v5786_v55 }
 0x2a6   : > { %4022 = vmatpush.bf16.msrb.mxu0 %v5749_v24  ;;  %4035 = vmatpush.bf16.msrb.mxu1 %v5813_v34  ;;  %v5914_v39 = vld [vmem:[%s8582_s5 + $0x3b8] sm:$0xf0]  ;;  %v5714_v56 = vld [vmem:[%s8582_s5 + $0x228] sm:$0xf0]  ;;  %v5853_v18 = vor.u32 %v6384_v54, %v5850_v62  ;;  %v6366_v5 = vld [vmem:[%s8582_s5 + $0x2a4] sm:$0xf] }
 0x2a7   : > { %4048 = vmatpush.bf16.msrb.mxu2 %v5877_v16  ;;  %4016 = vmatmul.bf16.vlgmr.msra.gmra.mxu3 %v7923_v14  ;;  %v5797_v14 = vor.u32 %v6370_v33, %v5794_v61  ;;  %v5917_v40 = vor.u32 %v6400_v28, %v5914_v39  ;;  %v5778_v41 = vld [vmem:[%s8582_s5 + $0x2a8] sm:$0xf0]  ;;  %v6382_v29 = vld [vmem:[%s8582_s5 + $0x324] sm:$0xf]  ;;  %v5717_v38 = vor.u32 %v6350_v27, %v5714_v56  ;;  %v6348_v57 = vld [vmem:[%s8582_s5 + $0x214] sm:$0xf] }
 0x2a8   : > { %4061 = vmatpush.bf16.msrb.mxu3 %v5941_v7  ;;  %v5842_v20 = vld [vmem:[%s8582_s5 + $0x328] sm:$0xf0]  ;;  %v6398_v21 = vld [vmem:[%s8582_s5 + $0x3a4] sm:$0xf]  ;;  %v5706_v32 = vld [vmem:[%s8582_s5 + $0x218] sm:$0xf0]  ;;  %v5781_v48 = vor.u32 %v6366_v5, %v5778_v41 }
 0x2a9   : > { %v5906_v30 = vld [vmem:[%s8582_s5 + $0x3a8] sm:$0xf0]  ;;  %v5845_v63 = vor.u32 %v6382_v29, %v5842_v20  ;;  %v6364_v59 = vld [vmem:[%s8582_s5 + $0x294] sm:$0xf]  ;;  %v5770_v35 = vld [vmem:[%s8582_s5 + $0x298] sm:$0xf0]  ;;  %v5709_v24 = vor.u32 %v6348_v57, %v5706_v32 }
 0x2aa   : > { %4023 = vmatpush.bf16.msrb.mxu0 %v5741_v9  ;;  %4036 = vmatpush.bf16.msrb.mxu1 %v5805_v22  ;;  %v5909_v43 = vor.u32 %v6398_v21, %v5906_v30  ;;  %v6380_v46 = vld [vmem:[%s8582_s5 + $0x314] sm:$0xf]  ;;  %v5834_v0 = vld [vmem:[%s8582_s5 + $0x318] sm:$0xf0]  ;;  %v6346_v15 = vld [vmem:[%s8582_s5 + $0x204] sm:$0xf]  ;;  %v5773_v34 = vor.u32 %v6364_v59, %v5770_v35 }
 0x2ab   : > { %4049 = vmatpush.bf16.msrb.mxu2 %v5869_v42  ;;  %v6396_v12 = vld [vmem:[%s8582_s5 + $0x394] sm:$0xf]  ;;  %v5898_v44 = vld [vmem:[%s8582_s5 + $0x398] sm:$0xf0]  ;;  %v5698_v58 = vld [vmem:[%s8582_s5 + $0x208] sm:$0xf0]  ;;  %v5837_v16 = vor.u32 %v6380_v46, %v5834_v0 }
 0x2ac   : > { %4062 = vmatpush.bf16.msrb.mxu3 %v5933_v25  ;;  %v6362_v23 = vld [vmem:[%s8582_s5 + $0x284] sm:$0xf]  ;;  %v5901_v7 = vor.u32 %v6396_v12, %v5898_v44  ;;  %v5762_v17 = vld [vmem:[%s8582_s5 + $0x288] sm:$0xf0]  ;;  %v5701_v9 = vor.u32 %v6346_v15, %v5698_v58  ;;  %v3219_v54 = vld [vmem:[%s8583_s6] sm:$0x3] }
 0x2ad   : > { %v6378_v47 = vld [vmem:[%s8582_s5 + $0x304] sm:$0xf]  ;;  %v5826_v31 = vld [vmem:[%s8582_s5 + $0x308] sm:$0xf0]  ;;  %v5765_v13 = vor.u32 %v6362_v23, %v5762_v17  ;;  %v3221_v28 = vperm.slane %v3219_v54, 0  ;;  %v3222_v39 = vperm.slane %v3219_v54, 1 }
 0x2ae   : > { %4024 = vmatpush.bf16.msrb.mxu0 %v5733_v6  ;;  %4037 = vmatpush.bf16.msrb.mxu1 %v5797_v14  ;;  %v6394_v1 = vld [vmem:[%s8582_s5 + $0x384] sm:$0xf]  ;;  %v5890_v11 = vld [vmem:[%s8582_s5 + $0x388] sm:$0xf0]  ;;  %v5829_v19 = vor.u32 %v6378_v47, %v5826_v31  ;;  %v6417_v31 = vld [vmem:[%s8586_s9 + $0x38] sm:$0xff]  ;;  %vm4239_vm0 = vcmask 1043456  }
 0x2af   : > { %4050 = vmatpush.bf16.msrb.mxu2 %v5861_v10  ;;  %v5893_v22 = vor.u32 %v6394_v1, %v5890_v11  ;;  %v4150_v1 = vld [vmem:[%s8586_s9 + $0x68] sm:$0xf]  ;;  %v6418_v54 = vld [vmem:[%s8586_s9 + $0x40] sm:$0xff]  ;;  %vm4271_vm4 = vcmask 261120  }
 0x2b0   : > { %4063 = vmatpush.bf16.msrb.mxu3 %v5925_v2 }
 0x2b2   : > { %4025 = vmatpush.bf16.msrb.mxu0 %v5725_v45  ;;  %4038 = vmatpush.bf16.msrb.mxu1 %v5789_v60 }
 0x2b3   : > { %4051 = vmatpush.bf16.msrb.mxu2 %v5853_v18 }
 0x2b4   : > { %4064 = vmatpush.bf16.msrb.mxu3 %v5917_v40 }
 0x2b6   : > { %4026 = vmatpush.bf16.msrb.mxu0 %v5717_v38  ;;  %4039 = vmatpush.bf16.msrb.mxu1 %v5781_v48 }
 0x2b7   : > { %4052 = vmatpush.bf16.msrb.mxu2 %v5845_v63 }
 0x2b8   : > { %4065 = vmatpush.bf16.msrb.mxu3 %v5909_v43 }
 0x2ba   : > { %4027 = vmatpush.bf16.msrb.mxu0 %v5709_v24  ;;  %4040 = vmatpush.bf16.msrb.mxu1 %v5773_v34 }
 0x2bb   : > { %4053 = vmatpush.bf16.msrb.mxu2 %v5837_v16 }
 0x2bc   : > { %4066 = vmatpush.bf16.msrb.mxu3 %v5901_v7 }
 0x2be   : > { %4028 = vmatpush.bf16.msrb.mxu0 %v5701_v9  ;;  %4041 = vmatpush.bf16.msrb.mxu1 %v5765_v13  ;;  %v6416_v13 = vld [vmem:[%s8586_s9 + $0x30] sm:$0xff] }
 0x2bf   : > { %4054 = vmatpush.bf16.msrb.mxu2 %v5829_v19  ;;  %v4208_v19 = vunpack.c.l.b16 %v4150_v1  ;;  %v6425_v1 = vld [vmem:[%s8590_s13 + $0x14] sm:$0xf] }
 0x2c0   : > { %4067 = vmatpush.bf16.msrb.mxu3 %v5893_v22 }
 0x2c1   : > { %4029 = vmatmul.bf16.vlgmr.msrb.gmra.mxu0 %v8044_v4  ;;  %4042 = vmatmul.bf16.vlgmr.msrb.gmra.mxu1 %v8053_v37 }
 0x2c2   : > { %4055 = vmatmul.bf16.vlgmr.msrb.gmra.mxu2 %v8092_v36  ;;  %4243 = vmatpush.bf16.msra.mxu0 %v6417_v31 }
 0x2c3   : > { %4068 = vmatmul.bf16.vlgmr.msrb.gmra.mxu3 %v8125_v50 }
 0x2c6   : > { %4244 = vmatpush.bf16.msra.mxu0 %v6416_v13  ;;  %v6013_v13 = vld [vmem:[%s8590_s13 + $0x10] sm:$0xf] }
 0x2f8   : > { %v3874_v42 = vpop.f32.mrf.mxu0  ;;  %v3887_v33 = vpop.f32.mrf.mxu1 }
 0x2f9   : > { %v3875_v27 = vadd.f32 %v3874_v42, %v3221_v28  ;;  %v6410_v28 = vld [vmem:[%s8586_s9] sm:$0xff] }
 0x2fb   : > { %v3888_v5 = vadd.f32 %v3887_v33, %v3875_v27  ;;  %v4074_v27 = vld [vmem:[%s8585_s8] sm:$0x3] }
 0x2ff   : > { %v3900_v25 = vpop.f32.mrf.mxu2  ;;  %v3913_v61 = vpop.f32.mrf.mxu3 }
 0x300   : > { %v3876_v3 = vpop.f32.mrf.mxu0  ;;  %v3889_v49 = vpop.f32.mrf.mxu1  ;;  %v3901_v40 = vadd.f32 %v3900_v25, %v3888_v5  ;;  %v4222_v25 = vpack.c.b16 %v4208_v19, %v4208_v19 }
 0x301   : > { %v6415_v3 = vld [vmem:[%s8586_s9 + $0x28] sm:$0xff] }
 0x302   : > { %v3914_v20 = vadd.f32 %v3913_v61, %v3901_v40  ;;  %v4241_v49 = vsel %vm4239_vm0, %v4222_v25, 0  ;;  %4245 = vmatpush.bf16.msra.mxu0 %v6415_v3  ;;  %v6005_v3 = vld [vmem:[%s8590_s13] sm:$0xf] }
 0x303   : > { %4258 = vmatpush.bf16.msra.mxu1 %v4241_v49  ;;  %v6424_v49 = vld [vmem:[%s8590_s13 + $0x4] sm:$0xf0] }
 0x307   : > { %v3902_v6 = vpop.f32.mrf.mxu2  ;;  %v3915_v51 = vpop.f32.mrf.mxu3 }
 0x308   : > { %v3926_v8 = vpop.f32.mrf.mxu0  ;;  %v6422_v51 = vld [vmem:[%s8586_s9 + $0x60] sm:$0xff] }
 0x309   : > { %v3927_v38 = vadd.f32 %v3926_v8, %v3914_v20  ;;  %4259 = vmatpush.bf16.msra.mxu1 %v6422_v51  ;;  %v4114_v20 = vperm.slane %v4074_v27, 0 }
 0x30c   : > { %v3939_v52 = vpop.f32.mrf.mxu1 }
 0x30d   : > { %v3940_v48 = vadd.f32 %v3939_v52, %v3927_v38  ;;  %v6414_v52 = vld [vmem:[%s8586_s9 + $0x20] sm:$0xff]  ;;  %v4115_v38 = vperm.slane %v4074_v27, 1 }
 0x30e   : > { %4246 = vmatpush.bf16.msra.mxu0 %v6414_v52 }
 0x310   : > { %v3928_v53 = vpop.f32.mrf.mxu0 }
 0x311   : > { %v6421_v53 = vld [vmem:[%s8586_s9 + $0x58] sm:$0xff] }
 0x312   : > { %4260 = vmatpush.bf16.msra.mxu1 %v6421_v53 }
 0x314   : > { %v3941_v14 = vpop.f32.mrf.mxu1 }
 0x315   : > { %v6413_v14 = vld [vmem:[%s8586_s9 + $0x18] sm:$0xff] }
 0x316   : > { %4247 = vmatpush.bf16.msra.mxu0 %v6413_v14 }
 0x317   : > { %v3952_v10 = vpop.f32.mrf.mxu2 }
 0x318   : > { %v3953_v63 = vadd.f32 %v3952_v10, %v3940_v48  ;;  %v6420_v10 = vld [vmem:[%s8586_s9 + $0x50] sm:$0xff] }
 0x319   : > { %4261 = vmatpush.bf16.msra.mxu1 %v6420_v10 }
 0x31a   : > { %v3965_v4 = vpop.f32.mrf.mxu3 }
 0x31b   : > { %v8373_v24 = vadd.f32 %v3965_v4, %v3953_v63 }
 0x31d   : > { %v4081_v16 = vmul.f32 %v8373_v24, %v8373_v24 }
 0x31e   : > { %v3978_v37 = vpop.f32.mrf.mxu0  ;;  %v3991_v2 = vpop.f32.mrf.mxu1 }
 0x31f   : > { %v3954_v26 = vpop.f32.mrf.mxu2  ;;  %v3979_v60 = vadd.f32 %v3978_v37, %v3222_v39 }
 0x320   : > { %v6412_v26 = vld [vmem:[%s8586_s9 + $0x10] sm:$0xff] }
 0x321   : > { %v3992_v41 = vadd.f32 %v3991_v2, %v3979_v60  ;;  %v6419_v2 = vld [vmem:[%s8586_s9 + $0x48] sm:$0xff]  ;;  %4248 = vmatpush.bf16.msra.mxu0 %v6412_v26 }
 0x322   : > { %v3967_v36 = vpop.f32.mrf.mxu3  ;;  %4262 = vmatpush.bf16.msra.mxu1 %v6419_v2  ;;  %v6499_v2 = vld [vmem:[%s8588_s11] ss:$0 sm:$0xff] }
 0x326   : > { %v3980_v50 = vpop.f32.mrf.mxu0  ;;  %v3993_v62 = vpop.f32.mrf.mxu1  ;;  %4263 = vmatpush.bf16.msra.mxu1 %v6418_v54 }
 0x327   : > { %v4004_v55 = vpop.f32.mrf.mxu2  ;;  %v4073_v62 = vld [vmem:[%s8584_s7] sm:$0x3] }
 0x328   : > { %v4005_v29 = vadd.f32 %v4004_v55, %v3992_v41  ;;  %v6411_v55 = vld [vmem:[%s8586_s9 + $0x8] sm:$0xff]  ;;  %v4108_v5 = vperm.slane %v4073_v62, 1 }
 0x329   : > { %4249 = vmatpush.bf16.msra.mxu0 %v6411_v55  ;;  %v6500_v55 = vld [vmem:[%s8589_s12] ss:$0 sm:$0xff] }
 0x32a   : > { %v4017_v45 = vpop.f32.mrf.mxu3 }
 0x32b   : > { %v4018_v30 = vadd.f32 %v4017_v45, %v4005_v29 }
 0x32d   : > { %4250 = vmatpush.bf16.msra.mxu0 %v6410_v28 }
 0x32f   : > { %v4006_v56 = vpop.f32.mrf.mxu2 }
 0x332   : > { %v4019_v18 = vpop.f32.mrf.mxu3 }
 0x333   : > { %v4107_v18 = vperm.slane %v4073_v62, 0 }
 0x33e   : > { %v4030_v21 = vpop.f32.mrf.mxu0  ;;  %v4043_v57 = vpop.f32.mrf.mxu1 }
 0x33f   : > { %v4031_v32 = vadd.f32 %v4030_v21, %v4018_v30 }
 0x341   : > { %v4044_v59 = vadd.f32 %v4043_v57, %v4031_v32 }
 0x345   : > { %v4056_v43 = vpop.f32.mrf.mxu2 }
 0x346   : > { %v4032_v35 = vpop.f32.mrf.mxu0  ;;  %v4057_v46 = vadd.f32 %v4056_v43, %v4044_v59  ;;  %v4069_v0 = vpop.f32.mrf.mxu3 }
 0x347   : > { %v4045_v12 = vpop.f32.mrf.mxu1  ;;  %v6498_v35 = vld [vmem:[%s8587_s10] ss:$0 sm:$0xff] }
 0x348   : > { %v8375_v44 = vadd.f32 %v4069_v0, %v4057_v46 }
 0x34a   : > { %v4076_v15 = vsel %vm4075_vm15, %v8375_v44, 0.0  ;;  %v4082_v58 = vmul.f32 %v8375_v44, %v8375_v44 }
 0x34b   : > { %v4077_v34 = vadd.f32 %v4076_v15, %v8373_v24 }
 0x34c   : > { %v4083_v23 = vsel %vm4075_vm15, %v4082_v58, 0.0 }
 0x34d   : > { %v4058_v7 = vpop.f32.mrf.mxu2  ;;  %4078 = vadd.xlane.f32.xlu1 %v4077_v34  ;;  %v4084_v17 = vadd.f32 %v4083_v23, %v4081_v16 }
 0x34e   : > { %v4071_v47 = vpop.f32.mrf.mxu3 }
 0x34f   : > { %4085 = vadd.xlane.f32.xlu2 %v4084_v17 }
 0x3c0   : > { %v4079_v9 = vpop.xlane.xlu1 %4078 }
 0x3c1   : > { %v4080_v11 = vmul.f32 0.0046296297, %v4079_v9 }
 0x3c2   : > { %v4086_v22 = vpop.xlane.xlu2 %4085 }
 0x3c3   : > { %v4087_v42 = vmul.f32 0.0046296297, %v4086_v22  ;;  %v4088_v33 = vmul.f32 %v4080_v11, %v4080_v11  ;;  %v4102_v56 = vsub.f32 %v8373_v24, %v4080_v11  ;;  %v4103_v60 = vsub.f32 %v8375_v44, %v4080_v11  ;;  %v6015_v11 = vld [vmem:[%s8590_s13 + $0x18] sm:$0xf0]  ;;  %v6426_v22 = vld [vmem:[%s8590_s13 + $0x14] sm:$0xf0] }
 0x3c4   : > { %v6018_v19 = vor.u32 %v6425_v1, %v6015_v11  ;;  %v6428_v11 = vld [vmem:[%s8594_s17 + $0x8] sm:$0xff] }
 0x3c5   : > { %v4089_v61 = vsub.f32 %v4087_v42, %v4088_v33  ;;  %v6423_v42 = vld [vmem:[%s8590_s13 + $0x4] sm:$0xf]  ;;  %v6007_v33 = vld [vmem:[%s8590_s13 + $0x8] sm:$0xf0] }
 0x3c6   : > { %4359 = vmatpush.bf16.msra.mxu3 %v6018_v19 }
 0x3c7   : > { %v4090_v6 = vmax.f32 %v4089_v61, 0.0  ;;  %v6014_v61 = vor.u32 %v6426_v22, %v6013_v13  ;;  %v6436_v13 = vld [vmem:[%s8594_s17 + $0x48] sm:$0xff]  ;;  %v4366_v22 = vld [vmem:[%s8592_s15] sm:$0x3] }
 0x3c9   : > { %v4091_v8 = vadd.f32 1e-05, %v4090_v6  ;;  %v6010_v6 = vor.u32 %v6423_v42, %v6007_v33  ;;  %4346 = vmatpush.bf16.msrb.mxu1 %v6014_v61  ;;  %v6427_v33 = vld [vmem:[%s8594_s17] sm:$0xff] }
 0x3cb   : > { %6518 = vrsqrt.f32 %v4091_v8  ;;  %vm4098_vm2 = vweird.f32 %v4091_v8  ;;  %4360 = vmatpush.bf16.msra.mxu3 %v6010_v6 }
 0x3d1   : > { %v6519_v4 = vpop.eup %6518 }
 0x3d2   : > { %v4093_v37 = vmul.f32 %v6519_v4, %v4091_v8  ;;  %vm4099_vm1 = vweird.f32 %v6519_v4  ;;  %v6006_v8 = vor.u32 %v6424_v49, %v6005_v3  ;;  %v4367_v3 = vld [vmem:[%s8593_s16] sm:$0x3] }
 0x3d3   : > { %vm4100_vm3 = vmor %vm4098_vm2, %vm4099_vm1 }
 0x3d4   : > { %v4094_v36 = vmul.f32 %v6519_v4, %v4093_v37  ;;  %4347 = vmatpush.bf16.msrb.mxu1 %v6006_v8  ;;  %v4398_v8 = vperm.slane %v4366_v22, 1 }
 0x3d6   : > { %v4095_v50 = vmul.f32 0.5, %v4094_v36 }
 0x3d8   : > { %v4096_v45 = vsub.f32 1.5, %v4095_v50 }
 0x3da   : > { %v4097_v39 = vmul.f32 %v6519_v4, %v4096_v45 }
 0x3dc   : > { %v4101_v40 = vsel %vm4100_vm3, %v6519_v4, %v4097_v39  ;;  %v4311_v39 = vld [vmem:[%s8591_s14] sm:$0x3] }
 0x3dd   : > { %v4104_v41 = vmul.f32 %v4102_v56, %v4101_v40  ;;  %v4105_v29 = vmul.f32 %v4103_v60, %v4101_v40  ;;  %v4313_v56 = vperm.slane %v4311_v39, 0  ;;  %v4314_v60 = vperm.slane %v4311_v39, 1 }
 0x3df   : > { %v4111_v21 = vmul.f32 %v4107_v18, %v4104_v41  ;;  %v4112_v30 = vmul.f32 %v4108_v5, %v4105_v29 }
 0x3e1   : > { %v4118_v57 = vadd.f32 %v4114_v20, %v4111_v21  ;;  %v4119_v32 = vadd.f32 %v4115_v38, %v4112_v30 }
 0x3e3   : > { %v4120_v48 = vmax.f32 %v4118_v57, 0.0  ;;  %v4121_v63 = vmax.f32 %v4119_v32, 0.0  ;;  %v6434_v57 = vld [vmem:[%s8594_s17 + $0x38] sm:$0xff] }
 0x3e4   : > { %v6442_v32 = vld [vmem:[%s8594_s17 + $0x78] sm:$0xff]  ;;  %4546 = vmatpush.bf16.msra.mxu2 %v6434_v57 }
 0x3e5   : > { %v4122_v59 = vpack.c.bf16 %v4120_v48, %v4120_v48  ;;  %v4123_v43 = vpack.c.bf16 %v4121_v63, %v4121_v63  ;;  %4559 = vmatpush.bf16.msrb.mxu3 %v6442_v32 }
 0x3e7   : > { %4251 = vmatmul.bf16.vlgmr.msra.gmra.mxu0 %v4122_v59  ;;  %6002 = vmatmul.msk.bf16.vlgmr.msra.gmra.mxu1 %vm4075_vm15, %v4123_v43  ;;  %v6433_v59 = vld [vmem:[%s8594_s17 + $0x30] sm:$0xff] }
 0x3e8   : > { %v6441_v43 = vld [vmem:[%s8594_s17 + $0x70] sm:$0xff]  ;;  %4547 = vmatpush.bf16.msra.mxu2 %v6433_v59 }
 0x3e9   : > { %4560 = vmatpush.bf16.msrb.mxu3 %v6441_v43 }
 0x464   : > { %v4252_v46 = vpop.f32.mrf.mxu0  ;;  %v4265_v0 = vpop.f32.mrf.mxu1 }
 0x465   : > { %v4253_v24 = vadd.f32 %v6498_v35, %v4252_v46 }
 0x467   : > { %v4266_v12 = vadd.f32 %v4265_v0, %v4253_v24 }
 0x469   : > { %v4272_v44 = vsel %vm4271_vm4, %v4266_v12, 0.0  ;;  %v4276_v15 = vmul.f32 %v4266_v12, %v4266_v12 }
 0x46a   : > { %4273 = vadd.xlane.f32.xlu0 %v4272_v44  ;;  %v6440_v44 = vld [vmem:[%s8594_s17 + $0x68] sm:$0xff] }
 0x46b   : > { %v4277_v58 = vsel %vm4271_vm4, %v4276_v15, 0.0  ;;  %4561 = vmatpush.bf16.msrb.mxu3 %v6440_v44 }
 0x46c   : > { %v4254_v34 = vpop.f32.mrf.mxu0  ;;  %v4267_v16 = vpop.f32.mrf.mxu1  ;;  %4278 = vadd.xlane.f32.xlu1 %v4277_v58 }
 0x46d   : > { %v6431_v34 = vld [vmem:[%s8594_s17 + $0x20] sm:$0xff] }
 0x46e   : > { %v6439_v16 = vld [vmem:[%s8594_s17 + $0x60] sm:$0xff] }
 0x46f   : > { %4562 = vmatpush.bf16.msrb.mxu3 %v6439_v16 }
 0x4dd   : > { %v4274_v23 = vpop.xlane.xlu0 %4273 }
 0x4de   : > { %v4275_v7 = vmul.f32 0.03125, %v4274_v23  ;;  %v6430_v23 = vld [vmem:[%s8594_s17 + $0x18] sm:$0xff] }
 0x4df   : > { %v4279_v17 = vpop.xlane.xlu1 %4278 }
 0x4e0   : > { %v4281_v47 = vmul.f32 %v4275_v7, %v4275_v7  ;;  %v4280_v31 = vmul.f32 0.03125, %v4279_v17  ;;  %v4295_v37 = vsub.f32 %v4266_v12, %v4275_v7  ;;  %v6432_v12 = vld [vmem:[%s8594_s17 + $0x28] sm:$0xff]  ;;  %v6438_v7 = vld [vmem:[%s8594_s17 + $0x58] sm:$0xff] }
 0x4e1   : > { %4548 = vmatpush.bf16.msra.mxu2 %v6432_v12  ;;  %4563 = vmatpush.bf16.msrb.mxu3 %v6438_v7 }
 0x4e2   : > { %v4282_v9 = vsub.f32 %v4280_v31, %v4281_v47  ;;  %v6429_v47 = vld [vmem:[%s8594_s17 + $0x10] sm:$0xff] }
 0x4e3   : > { %v6437_v31 = vld [vmem:[%s8594_s17 + $0x50] sm:$0xff] }
 0x4e4   : > { %v4283_v25 = vmax.f32 %v4282_v9, 0.0 }
 0x4e5   : > { %4549 = vmatpush.bf16.msra.mxu2 %v6431_v34  ;;  %4564 = vmatpush.bf16.msrb.mxu3 %v6437_v31 }
 0x4e6   : > { %v4284_v51 = vadd.f32 1e-05, %v4283_v25  ;;  %v6435_v25 = vld [vmem:[%s8594_s17 + $0x40] sm:$0xff] }
 0x4e8   : > { %6520 = vrsqrt.f32 %v4284_v51  ;;  %vm4291_vm6 = vweird.f32 %v4284_v51 }
 0x4e9   : > { %4550 = vmatpush.bf16.msra.mxu2 %v6430_v23  ;;  %4565 = vmatpush.bf16.msrb.mxu3 %v6436_v13 }
 0x4ed   : > { %4551 = vmatpush.bf16.msra.mxu2 %v6429_v47  ;;  %4566 = vmatpush.bf16.msrb.mxu3 %v6435_v25 }
 0x4ee   : > { %v6521_v52 = vpop.eup %6520 }
 0x4ef   : > { %v4286_v53 = vmul.f32 %v6521_v52, %v4284_v51  ;;  %vm4292_vm5 = vweird.f32 %v6521_v52  ;;  %v4397_v51 = vperm.slane %v4366_v22, 0 }
 0x4f0   : > { %vm4293_vm7 = vmor %vm4291_vm6, %vm4292_vm5 }
 0x4f1   : > { %v4287_v14 = vmul.f32 %v6521_v52, %v4286_v53  ;;  %4552 = vmatpush.bf16.msra.mxu2 %v6428_v11 }
 0x4f3   : > { %v4288_v10 = vmul.f32 0.5, %v4287_v14 }
 0x4f5   : > { %v4289_v4 = vsub.f32 1.5, %v4288_v10  ;;  %4553 = vmatpush.bf16.msra.mxu2 %v6427_v33  ;;  %v4404_v10 = vperm.slane %v4367_v3, 0 }
 0x4f7   : > { %v4290_v26 = vmul.f32 %v6521_v52, %v4289_v4  ;;  %v4405_v4 = vperm.slane %v4367_v3, 1 }
 0x4f9   : > { %v4294_v36 = vsel %vm4293_vm7, %v6521_v52, %v4290_v26 }
 0x4fa   : > { %v4296_v50 = vmul.f32 %v4295_v37, %v4294_v36 }
 0x4fc   : > { %v4300_v54 = vmul.f32 %v6499_v2, %v4296_v50 }
 0x4fe   : > { %v4304_v62 = vadd.f32 %v6500_v55, %v4300_v54 }
 0x500   : > { %v4305_v45 = vmax.f32 %v4304_v62, 0.0 }
 0x502   : > { %v4306_v28 = vpack.c.bf16 %v4305_v45, %v4305_v45  ;;  %v6501_v45 = vld [vmem:[%s8595_s18] ss:$0 sm:$0xff] }
 0x504   : > { %6019 = vmatmul.msk.bf16.vlgmr.msrb.gmra.mxu1 %vm4271_vm4, %v4306_v28  ;;  %6020 = vmatmul.msk.bf16.vlgmr.msra.gmra.mxu3 %vm4271_vm4, %v4306_v28 }
 0x581   : > { %v4349_v27 = vpop.f32.mrf.mxu1 }
 0x582   : > { %v8476_v18 = vadd.f32 %v4349_v27, %v4313_v56 }
 0x584   : > { %v4372_v20 = vmul.f32 %v8476_v18, %v8476_v18 }
 0x587   : > { %v4362_v5 = vpop.f32.mrf.mxu3 }
 0x588   : > { %v8478_v40 = vadd.f32 %v4362_v5, %v4314_v60 }
 0x589   : > { %v4351_v41 = vpop.f32.mrf.mxu1 }
 0x58a   : > { %v4368_v29 = vadd.f32 %v8478_v40, %v8476_v18  ;;  %v4373_v38 = vmul.f32 %v8478_v40, %v8478_v40 }
 0x58c   : > { %4369 = vadd.xlane.f32.xlu2 %v4368_v29  ;;  %v4374_v21 = vadd.f32 %v4373_v38, %v4372_v20 }
 0x58e   : > { %4375 = vadd.xlane.f32.xlu0 %v4374_v21 }
 0x58f   : > { %v4364_v30 = vpop.f32.mrf.mxu3 }
 0x5ff   : > { %v4370_v48 = vpop.xlane.xlu2 %4369 }
 0x600   : > { %v4371_v63 = vmul.f32 0.00390625, %v4370_v48 }
 0x601   : > { %v4376_v35 = vpop.xlane.xlu0 %4375 }
 0x602   : > { %v4377_v46 = vmul.f32 0.00390625, %v4376_v35  ;;  %v4378_v0 = vmul.f32 %v4371_v63, %v4371_v63  ;;  %v4392_v49 = vsub.f32 %v8476_v18, %v4371_v63  ;;  %v4393_v6 = vsub.f32 %v8478_v40, %v4371_v63 }
 0x604   : > { %v4379_v24 = vsub.f32 %v4377_v46, %v4378_v0 }
 0x606   : > { %v4380_v15 = vmax.f32 %v4379_v24, 0.0 }
 0x608   : > { %v4381_v58 = vadd.f32 1e-05, %v4380_v15 }
 0x60a   : > { %6522 = vrsqrt.f32 %v4381_v58  ;;  %vm4388_vm9 = vweird.f32 %v4381_v58 }
 0x610   : > { %v6523_v17 = vpop.eup %6522 }
 0x611   : > { %v4383_v9 = vmul.f32 %v6523_v17, %v4381_v58  ;;  %vm4389_vm8 = vweird.f32 %v6523_v17 }
 0x612   : > { %vm4390_vm10 = vmor %vm4388_vm9, %vm4389_vm8 }
 0x613   : > { %v4384_v1 = vmul.f32 %v6523_v17, %v4383_v9 }
 0x615   : > { %v4385_v19 = vmul.f32 0.5, %v4384_v1 }
 0x617   : > { %v4386_v42 = vsub.f32 1.5, %v4385_v19 }
 0x619   : > { %v4387_v61 = vmul.f32 %v6523_v17, %v4386_v42 }
 0x61b   : > { %v4391_v52 = vsel %vm4390_vm10, %v6523_v17, %v4387_v61 }
 0x61c   : > { %v4394_v53 = vmul.f32 %v4392_v49, %v4391_v52  ;;  %v4395_v14 = vmul.f32 %v4393_v6, %v4391_v52 }
 0x61e   : > { %v4401_v26 = vmul.f32 %v4397_v51, %v4394_v53  ;;  %v4402_v37 = vmul.f32 %v4398_v8, %v4395_v14 }
 0x620   : > { %v4408_v2 = vadd.f32 %v4404_v10, %v4401_v26  ;;  %v4409_v36 = vadd.f32 %v4405_v4, %v4402_v37 }
 0x622   : > { %v4410_v55 = vmax.f32 %v4408_v2, 0.0  ;;  %v4411_v50 = vmax.f32 %v4409_v36, 0.0 }
 0x624   : > { %v4412_v54 = vpack.c.bf16 %v4410_v55, %v4410_v55  ;;  %v4413_v62 = vpack.c.bf16 %v4411_v50, %v4411_v50 }
 0x626   : > { %4554 = vmatmul.bf16.vlgmr.msra.gmra.mxu2 %v4412_v54  ;;  %4567 = vmatmul.bf16.vlgmr.msrb.gmra.mxu3 %v4413_v62 }
 0x6a9   : > { %v4555_v28 = vpop.f32.mrf.mxu2  ;;  %v4568_v39 = vpop.f32.mrf.mxu3 }
 0x6aa   : > { %v4556_v27 = vadd.f32 %v6501_v45, %v4555_v28 }
 0x6ac   : > { %v4569_v56 = vadd.f32 %v4568_v39, %v4556_v27 }
 0x6ae   : > { %4572 = vst [vmem:[%s615_s23] sm:$0xff] %v4569_v56 }
 0x6af   : > { %6581 = shalt.err (!%p6578_p8)
}
 0x6b0   : > { %6447 = dma.vmem_to_hbm [thread:$0]  (%p6763_p5), %s4587_s1, 128, %s4589_s25, %s4574_s27  }
 0x6b1   : > { %v4557_v60 = vpop.f32.mrf.mxu2  ;;  %v4570_v18 = vpop.f32.mrf.mxu3 }
 0x6b2 PF: > { %s8623_s29 = sld [smem:[#allocation9_spill]]  ;;  %p6459_p9 = scmp.ge.s32.totalorder %s6620_s21, 2 }
 0x6b4   : > { %p6454_p10 = pnand %p6459_p9, %p6767_p6 }
 0x6b6   : > { %p6455_p11 = pneg %p6454_p10 }
 0x6b8   : > { %s4600_s23 = sand.u32 1, %s8623_s29  }
 0x6b9   : > { %s4601_s20 = scalar_lea.sflag [#allocation5], %s4600_s23 }
 0x6ba   : > { %6603 = dma.done.wait (%p6455_p11), %s4601_s20, 128  }
 0x6bb   : > { %6605 = vsyncadd (%p6455_p11), %s4601_s20, 4294967168  ;;  %s8625_s21 = sld [smem:[#allocation11_spill]]  ;;  %s8628_s0 = smov %s6612_s30 }
 0x6bc   : > { %s8626_s28 = sld [smem:[#allocation10_spill]] }
 0x6bd   : > { %s8627_s20 = sld [smem:[#allocation12_spill]] }
 0x6c1   : > { %p30_p5 = scmp.ge.s32.totalorder %s8625_s21, 4  }
 0x6c2   : > { %s8629_s30 = smov %s8626_s28 }
 0x6c3   :  { %32 = sbr.rel (!%p30_p5) target bundleno = 10 (0xa), region = 136 }
 0x6c8   :  { %4607 = vsyncpa [#allocation4], 1 }
 0x6c9   :  { %4609 = vsyncpa [#allocation4 + $0x1], 1 }
 0x6ca   :  { %4610 = vsyncpa [#allocation5], 1 }
 0x6cb   :  { %4612 = vsyncpa [#allocation5 + $0x1], 1 }

</bundles_post_ra>
